<compile_context>
chip_gen: v7x
topology: tpu7x:2x2x1
jax: 0.10.0
libtpu: 0.0.40
codegen_flags: <defaults>
</compile_context>

<pallas_src>
import functools

import jax
import jax.numpy as jnp
from jax.experimental import pallas as pl
from jax.experimental.pallas import tpu as pltpu


ACT_DTYPE = jnp.bfloat16   # HBM activation dtype
MXU_DTYPE = jnp.bfloat16   # MXU operand dtype (f32 accumulation)

LAST_CONV = 64             # last_conv_factory['res_50']
HEAD_CONV = 64             # head_conv_factory['res_50']
IN_CHANNELS = 3


# ----------------------------------------------------------------------------
# generation-dependent VMEM budget + band sizing
# ----------------------------------------------------------------------------
@functools.lru_cache(maxsize=None)
def _vmem_limit_bytes():
    cap = 64 * 1024 * 1024
    try:
        cap = int(pltpu.get_tpu_info().vmem_capacity_bytes)
    except Exception:
        pass
    if cap >= 100 * 1024 * 1024:      # v5e / v6e: 128 MiB physical VMEM
        return 96 * 1024 * 1024
    return 32 * 1024 * 1024           # v7x: 64 MiB physical VMEM


def _round_up(v, m):
    return -(-v // m) * m


def _tile_bytes(shape, itemsize):
    """(8,128)-tile-padded VMEM footprint of an array of `shape`."""
    if len(shape) == 1:
        return _round_up(shape[0], 128) * itemsize
    lead = 1
    for d in shape[:-2]:
        lead *= d
    return lead * _round_up(shape[-2], 8) * _round_up(shape[-1], 128) * itemsize


def _pick_band_rows(ho, est_fn, *, min_bands=1):
    """Largest divisor of `ho` whose estimated VMEM footprint fits the budget,
    keeping at least `min_bands` bands (for megacore load balancing)."""
    budget = int(0.7 * _vmem_limit_bytes())
    best = 1
    for bh in range(1, ho + 1):
        if ho % bh:
            continue
        if ho // bh < min_bands:
            continue
        if est_fn(bh) <= budget:
            best = bh
    return best


# ----------------------------------------------------------------------------
# in-kernel helpers (all bf16; f32 only in the MXU accumulator)
# ----------------------------------------------------------------------------
def _assemble_padded_band(mid_ref, top_ref, bot_ref):
    """Stack (top halo | band rows | bottom halo); image-border halos -> 0."""
    r = pl.program_id(1)
    n_bands = pl.num_programs(1)
    top = jnp.where(r == 0, jnp.zeros_like(top_ref[0]), top_ref[0])
    bot = jnp.where(r == n_bands - 1, jnp.zeros_like(bot_ref[0]), bot_ref[0])
    return jnp.concatenate([top, mid_ref[0], bot], axis=0)


def _im2col_s1(xp, *, bh, wo):
    """(bh+2, wo+2, Cin) W-padded band -> (bh*wo, 9*Cin) patches, stride 1."""
    cin = xp.shape[-1]
    taps = [xp[dy:dy + bh, dx:dx + wo, :] for dy in range(3) for dx in range(3)]
    return jnp.concatenate([t.reshape(bh * wo, cin) for t in taps], axis=1)


def _im2col_s2_packed(xp, *, bh, wo, cin, pad_left):
    """Stride-2 patches from a column-pair-packed band.

    xp: (2*bh+2, n_pairs, 2*cin); padded column = real column + pad_left and
    pair j holds padded columns (2j, 2j+1), so every tap is a contiguous
    slice along the pair axis and a 64-lane slice along channels.  Row phases
    come from a free leading-dim reshape.
    """
    xpr = xp.reshape(xp.shape[0] // 2, 2, xp.shape[1], xp.shape[2])
    taps = []
    for dy in range(3):
        rphase = xpr[:, dy % 2]                       # (bh+1, n_pairs, 2*cin)
        r0 = dy // 2
        for dx in range(3):
            off = dx - 1 + pad_left
            p0, c0 = off // 2, (off % 2) * cin
            taps.append(rphase[r0:r0 + bh, p0:p0 + wo, c0:c0 + cin])
    return jnp.concatenate([t.reshape(bh * wo, cin) for t in taps], axis=1)


# ----------------------------------------------------------------------------
# kernels
# ----------------------------------------------------------------------------
def _stem_packed_kernel(mid_ref, top_ref, bot_ref, w_ref, b_ref, out_ref, *,
                        bh, wo):
    """Stride-1 3x3 conv on a pair-packed band, emitting a column-pair packed
    (128-lane dense) output directly from the MXU (K = 12*Cin)."""
    cin2 = mid_ref.shape[-1]                    # 2*Cin
    cout2 = out_ref.shape[-1]                   # 2*Cout
    q = wo // 2
    xp = _assemble_padded_band(mid_ref, top_ref, bot_ref)   # (bh+2, q+1, 2*Cin)
    taps = [xp[dy:dy + bh, po:po + q, :] for dy in range(3) for po in range(2)]
    patches = jnp.concatenate([t.reshape(bh * q, cin2) for t in taps], axis=1)
    acc = jnp.dot(patches, w_ref[...], preferred_element_type=jnp.float32)
    acc = jnp.maximum(acc + b_ref[...], 0.0)                 # (bh*q, 2*Cout)
    pk = acc.astype(out_ref.dtype).reshape(bh, q, cout2)
    zp = jnp.zeros((bh, 1, cout2), out_ref.dtype)
    out_ref[0] = jnp.concatenate([zp, pk, zp], axis=1)       # single dense store


def _conv3x3_s2_kernel(mid_ref, top_ref, bot_ref, w_ref, b_ref, out_ref, *,
                       bh, wo, cin, pad_left, relu):
    """Stride-2 3x3 conv (pad 1) consuming a pair-packed band; one K=9*Cin
    matmul; emits a W-padded (wo+2, Cout) block with a single store."""
    cout = out_ref.shape[-1]
    xp = _assemble_padded_band(mid_ref, top_ref, bot_ref)
    patches = _im2col_s2_packed(xp, bh=bh, wo=wo, cin=cin, pad_left=pad_left)
    acc = jnp.dot(patches, w_ref[...], preferred_element_type=jnp.float32)
    acc = acc + b_ref[...]
    if relu:
        acc = jnp.maximum(acc, 0.0)
    res = acc.astype(out_ref.dtype).reshape(bh, wo, cout)
    zc = jnp.zeros((bh, 1, cout), out_ref.dtype)
    out_ref[0] = jnp.concatenate([zc, res, zc], axis=1)


def _head_band_kernel(mid_ref, top_ref, bot_ref, w1_ref, b1_ref, w2_ref, b2_ref,
                      out_ref, *, bh, wo):
    """Fused CenterNet head band: Conv3x3(64->192)+ReLU -> Conv1x1(192->Ctot)."""
    ctot = out_ref.shape[-1]
    xp = _assemble_padded_band(mid_ref, top_ref, bot_ref)
    patches = _im2col_s1(xp, bh=bh, wo=wo)                   # (bh*wo, 9*64) bf16
    h = jnp.dot(patches, w1_ref[...], preferred_element_type=jnp.float32)
    h = jnp.maximum(h + b1_ref[...], 0.0)                    # (bh*wo, 192) f32
    y = jnp.dot(h.astype(MXU_DTYPE), w2_ref[...],
                preferred_element_type=jnp.float32)
    y = y + b2_ref[...]                                      # (bh*wo, Ctot)
    out_ref[0] = y.reshape(bh, wo, ctot).astype(out_ref.dtype)


# ----------------------------------------------------------------------------
# wrappers
# ----------------------------------------------------------------------------
def stem_conv_packed(x_img, w, b):
    """x_img: (N, H, W, 3) NHWC -> (N, H, W//2 + 2, 128) bf16, pair-packed
    (pad_left=2 pairing, channel blocks = [even col | odd col])."""
    n, hin, win, cin = x_img.shape
    cout = w.shape[-1]
    assert win % 4 == 0 and hin % 4 == 0
    ho, wo = hin, win
    npair = (win + 2) // 2

    # W-pad by 1 each side, pair-pack (free reshape), bf16.
    xk = jnp.pad(x_img, ((0, 0), (0, 0), (1, 1), (0, 0))).astype(ACT_DTYPE)
    xk = xk.reshape(n, hin, npair, 2 * cin)

    # Column-pair-packed weight (12*cin, 2*cout): output channel blocks are
    # [even output column | odd output column] of the same output pair.
    w12 = jnp.zeros((3, 2, 2, cin, 2 * cout), jnp.float32)
    w12 = w12.at[:, 0, 0, :, :cout].set(w[:, 0])   # even col, dx=0
    w12 = w12.at[:, 0, 1, :, :cout].set(w[:, 1])   # even col, dx=1
    w12 = w12.at[:, 1, 0, :, :cout].set(w[:, 2])   # even col, dx=2
    w12 = w12.at[:, 0, 1, :, cout:].set(w[:, 0])   # odd  col, dx=0
    w12 = w12.at[:, 1, 0, :, cout:].set(w[:, 1])   # odd  col, dx=1
    w12 = w12.at[:, 1, 1, :, cout:].set(w[:, 2])   # odd  col, dx=2
    w12 = w12.reshape(12 * cin, 2 * cout).astype(MXU_DTYPE)
    b2 = jnp.concatenate([b, b]).reshape(1, 2 * cout).astype(jnp.float32)

    out_w, out_c = wo // 2 + 2, 2 * cout

    def est(bh):
        blocks = 2 * (_tile_bytes((bh, npair, 2 * cin), 2)
                      + 2 * _tile_bytes((1, npair, 2 * cin), 2)
                      + _tile_bytes((12 * cin, 2 * cout), 2)
                      + _tile_bytes((1, 2 * cout), 4)
                      + _tile_bytes((bh, out_w, out_c), 2))
        tmp = (_tile_bytes((bh + 2, npair, 2 * cin), 2)
               + _tile_bytes((bh * wo // 2, 12 * cin), 2)
               + _tile_bytes((bh * wo // 2, 2 * cout), 4)
               + _tile_bytes((bh, out_w, out_c), 2))
        return blocks + tmp

    min_bands = 2 if (n < 2 and ho >= 2) else 1
    bh = _pick_band_rows(ho, est, min_bands=min_bands)
    n_bands = ho // bh

    kern = functools.partial(_stem_packed_kernel, bh=bh, wo=wo)
    return pl.pallas_call(
        kern,
        out_shape=jax.ShapeDtypeStruct((n, ho, out_w, out_c), ACT_DTYPE),
        grid_spec=pltpu.PrefetchScalarGridSpec(
            num_scalar_prefetch=0,
            grid=(n, n_bands),
            in_specs=[
                pl.BlockSpec((1, bh, npair, 2 * cin),
                             lambda bi, ri: (bi, ri, 0, 0)),
                pl.BlockSpec((1, 1, npair, 2 * cin),
                             lambda bi, ri: (bi, jnp.maximum(ri * bh - 1, 0), 0, 0)),
                pl.BlockSpec((1, 1, npair, 2 * cin),
                             lambda bi, ri: (bi, jnp.minimum(ri * bh + bh, hin - 1), 0, 0)),
                pl.BlockSpec((12 * cin, 2 * cout), lambda bi, ri: (0, 0)),
                pl.BlockSpec((1, 2 * cout), lambda bi, ri: (0, 0)),
            ],
            out_specs=pl.BlockSpec((1, bh, out_w, out_c),
                                   lambda bi, ri: (bi, ri, 0, 0)),
        ),
        compiler_params=pltpu.CompilerParams(
            dimension_semantics=("parallel", "parallel"),
            vmem_limit_bytes=_vmem_limit_bytes()),
    )(xk, xk, xk, w12, b2)


def conv3x3_s2(x_packed, w, b, *, cin, pad_left, relu=True):
    """Stride-2 3x3 conv.

    x_packed: (N, Hin, n_pairs, 2*cin) pair-packed activation with `pad_left`
    zero columns on each side before pairing (1 or 2).
    Returns (N, Hin//2, Win//2 + 2, cout) W-padded bf16.
    """
    n, hin, npair, cin2 = x_packed.shape
    assert cin2 == 2 * cin
    win = 2 * npair - 2 * pad_left
    cout = w.shape[-1]
    ho, wo = hin // 2, win // 2
    out_w = wo + 2

    w9 = w.reshape(9 * cin, cout).astype(MXU_DTYPE)
    b2 = b.reshape(1, cout).astype(jnp.float32)

    def est(bh):
        blocks = 2 * (_tile_bytes((2 * bh, npair, cin2), 2)
                      + 2 * _tile_bytes((1, npair, cin2), 2)
                      + _tile_bytes((9 * cin, cout), 2)
                      + _tile_bytes((1, cout), 4)
                      + _tile_bytes((bh, out_w, cout), 2))
        tmp = (_tile_bytes((2 * bh + 2, npair, cin2), 2)
               + _tile_bytes((bh * wo, 9 * cin), 2)
               + _tile_bytes((bh * wo, cout), 4)
               + _tile_bytes((bh, out_w, cout), 2))
        return blocks + tmp

    min_bands = 2 if (n < 2 and ho >= 2) else 1
    bh = _pick_band_rows(ho, est, min_bands=min_bands)
    n_bands = ho // bh
    band = 2 * bh

    kern = functools.partial(_conv3x3_s2_kernel, bh=bh, wo=wo, cin=cin,
                             pad_left=pad_left, relu=relu)
    return pl.pallas_call(
        kern,
        out_shape=jax.ShapeDtypeStruct((n, ho, out_w, cout), ACT_DTYPE),
        grid_spec=pltpu.PrefetchScalarGridSpec(
            num_scalar_prefetch=0,
            grid=(n, n_bands),
            in_specs=[
                pl.BlockSpec((1, band, npair, cin2),
                             lambda bi, ri: (bi, ri, 0, 0)),
                pl.BlockSpec((1, 1, npair, cin2),
                             lambda bi, ri: (bi, jnp.maximum(ri * band - 1, 0), 0, 0)),
                pl.BlockSpec((1, 1, npair, cin2),
                             lambda bi, ri: (bi, jnp.minimum(ri * band + band, hin - 1), 0, 0)),
                pl.BlockSpec((9 * cin, cout), lambda bi, ri: (0, 0)),
                pl.BlockSpec((1, cout), lambda bi, ri: (0, 0)),
            ],
            out_specs=pl.BlockSpec((1, bh, out_w, cout),
                                   lambda bi, ri: (bi, ri, 0, 0)),
        ),
        compiler_params=pltpu.CompilerParams(
            dimension_semantics=("parallel", "parallel"),
            vmem_limit_bytes=_vmem_limit_bytes()),
    )(x_packed, x_packed, x_packed, w9, b2)


def centernet_head_fused(x, w1, b1, w2, b2):
    """x: (N, Hf, Wf+2, 64) W-padded bf16 -> (N, Hf, Wf, Ctot) float32."""
    n, hf, wp_in, cin = x.shape
    wf = wp_in - 2
    hmid = w1.shape[-1]
    ctot = w2.shape[-1]

    w1r = w1.reshape(9 * cin, hmid).astype(MXU_DTYPE)
    b1r = b1.reshape(1, hmid).astype(jnp.float32)
    w2r = w2.astype(MXU_DTYPE)
    b2r = b2.reshape(1, ctot).astype(jnp.float32)

    def est(bh):
        blocks = 2 * (_tile_bytes((bh, wp_in, cin), 2)
                      + 2 * _tile_bytes((1, wp_in, cin), 2)
                      + _tile_bytes((9 * cin, hmid), 2)
                      + _tile_bytes((1, hmid), 4)
                      + _tile_bytes((w2.shape[0], ctot), 2)
                      + _tile_bytes((1, ctot), 4)
                      + _tile_bytes((bh, wf, ctot), 4))
        tmp = (_tile_bytes((bh + 2, wp_in, cin), 2)
               + _tile_bytes((bh * wf, 9 * cin), 2)
               + _tile_bytes((bh * wf, hmid), 4)
               + _tile_bytes((bh * wf, hmid), 2)
               + _tile_bytes((bh * wf, ctot), 4))
        return blocks + tmp

    min_bands = 2 if (n < 2 and hf >= 2) else 1
    bh = _pick_band_rows(hf, est, min_bands=min_bands)
    n_bands = hf // bh

    kern = functools.partial(_head_band_kernel, bh=bh, wo=wf)
    return pl.pallas_call(
        kern,
        out_shape=jax.ShapeDtypeStruct((n, hf, wf, ctot), jnp.float32),
        grid_spec=pltpu.PrefetchScalarGridSpec(
            num_scalar_prefetch=0,
            grid=(n, n_bands),
            in_specs=[
                pl.BlockSpec((1, bh, wp_in, cin),
                             lambda bi, ri: (bi, ri, 0, 0)),
                pl.BlockSpec((1, 1, wp_in, cin),
                             lambda bi, ri: (bi, jnp.maximum(ri * bh - 1, 0), 0, 0)),
                pl.BlockSpec((1, 1, wp_in, cin),
                             lambda bi, ri: (bi, jnp.minimum(ri * bh + bh, hf - 1), 0, 0)),
                pl.BlockSpec((9 * cin, hmid), lambda bi, ri: (0, 0)),
                pl.BlockSpec((1, hmid), lambda bi, ri: (0, 0)),
                pl.BlockSpec((w2.shape[0], ctot), lambda bi, ri: (0, 0)),
                pl.BlockSpec((1, ctot), lambda bi, ri: (0, 0)),
            ],
            out_specs=pl.BlockSpec((1, bh, wf, ctot),
                                   lambda bi, ri: (bi, ri, 0, 0)),
        ),
        compiler_params=pltpu.CompilerParams(
            dimension_semantics=("parallel", "parallel"),
            vmem_limit_bytes=_vmem_limit_bytes()),
    )(x, x, x, w1r, b1r, w2r, b2r)


# ----------------------------------------------------------------------------
# HUModel: parameters + forward
# ----------------------------------------------------------------------------
def init_params(key, num_classes):
    ks = iter(jax.random.split(key, 16))

    def w(kh, kw, cin, cout):
        return 0.05 * jax.random.normal(next(ks), (kh, kw, cin, cout),
                                        jnp.float32)

    p = {}
    # synthetic backbone: stem + two stride-2 downsamples -> 64ch @ H/4
    p['stem_w'] = w(3, 3, IN_CHANNELS, LAST_CONV)
    p['stem_b'] = jnp.zeros((LAST_CONV,), jnp.float32)
    p['down1_w'] = w(3, 3, LAST_CONV, LAST_CONV)
    p['down1_b'] = jnp.zeros((LAST_CONV,), jnp.float32)
    p['down2_w'] = w(3, 3, LAST_CONV, LAST_CONV)
    p['down2_b'] = jnp.zeros((LAST_CONV,), jnp.float32)

    # CenterNet head branches
    head_out = {'hm': num_classes, 'wh': 2, 'reg': 2}
    for name, cout in head_out.items():
        p[f'{name}_w1'] = w(3, 3, LAST_CONV, HEAD_CONV)
        p[f'{name}_b1'] = jnp.zeros((HEAD_CONV,), jnp.float32)
        p[f'{name}_w2'] = 0.01 * jax.random.normal(
            next(ks), (HEAD_CONV, cout), jnp.float32)
        if name == 'hm':
            p[f'{name}_b2'] = jnp.full((cout,), -2.19, jnp.float32)
        else:
            p[f'{name}_b2'] = jnp.zeros((cout,), jnp.float32)
    return p


def hu_model_forward(params, x_nchw):
    """x_nchw: (N, 3, H, W) -> dict of NCHW head outputs at (H/4, W/4)."""
    nc = params['hm_b2'].shape[0]
    ctot = nc + 4

    # NCHW -> NHWC (tiny 3-channel tensor; W-pad + pair-pack are free views).
    x = jnp.transpose(x_nchw, (0, 2, 3, 1))

    # backbone
    x = stem_conv_packed(x, params['stem_w'], params['stem_b'])
    # (N, H, W/2 + 2, 128) pair-packed, pad_left = 2
    x = conv3x3_s2(x, params['down1_w'], params['down1_b'],
                   cin=LAST_CONV, pad_left=2, relu=True)
    # (N, H/2, W/2 + 2, 64) W-padded
    n, h2, wp, c = x.shape
    x = x.reshape(n, h2, wp // 2, 2 * c)     # free pair-pack, pad_left = 1
    x = conv3x3_s2(x, params['down2_w'], params['down2_b'],
                   cin=LAST_CONV, pad_left=1, relu=True)
    # (N, H/4, W/4 + 2, 64) W-padded

    # fused CenterNet head: concat 3x3 weights, block-diagonal 1x1 weights
    w1 = jnp.concatenate([params['hm_w1'], params['wh_w1'], params['reg_w1']],
                         axis=-1)                              # (3,3,64,192)
    b1 = jnp.concatenate([params['hm_b1'], params['wh_b1'], params['reg_b1']])
    w2 = jnp.zeros((3 * HEAD_CONV, ctot), jnp.float32)
    w2 = w2.at[:HEAD_CONV, :nc].set(params['hm_w2'])
    w2 = w2.at[HEAD_CONV:2 * HEAD_CONV, nc:nc + 2].set(params['wh_w2'])
    w2 = w2.at[2 * HEAD_CONV:, nc + 2:].set(params['reg_w2'])
    b2 = jnp.concatenate([params['hm_b2'], params['wh_b2'], params['reg_b2']])

    y = centernet_head_fused(x, w1, b1, w2, b2)    # (N, H/4, W/4, nc+4) f32
    y = jnp.transpose(y, (0, 3, 1, 2))             # NHWC -> NCHW (tiny tensor)
    return {'hm': y[:, :nc], 'wh': y[:, nc:nc + 2], 'reg': y[:, nc + 2:]}


def _reference_forward(params, x_nchw):
    """Pure-XLA reference at matching (bf16 activation / bf16 MXU) precision."""
    x = jnp.transpose(x_nchw, (0, 2, 3, 1)).astype(ACT_DTYPE)

    def conv(x, w, b, stride):
        y = jax.lax.conv_general_dilated(
            x, w.astype(MXU_DTYPE), (stride, stride), ((1, 1), (1, 1)),
            dimension_numbers=('NHWC', 'HWIO', 'NHWC'),
            preferred_element_type=jnp.float32)
        return jnp.maximum(y + b, 0.0).astype(ACT_DTYPE)

    x = conv(x, params['stem_w'], params['stem_b'], 1)
    x = conv(x, params['down1_w'], params['down1_b'], 2)
    x = conv(x, params['down2_w'], params['down2_b'], 2)

    outs = {}
    for name in ('hm', 'wh', 'reg'):
        h = conv(x, params[f'{name}_w1'], params[f'{name}_b1'], 1)
        y = jnp.einsum('nhwc,co->nhwo', h,
                       params[f'{name}_w2'].astype(MXU_DTYPE),
                       preferred_element_type=jnp.float32)
        y = y + params[f'{name}_b2']
        outs[name] = jnp.transpose(y, (0, 3, 1, 2)).astype(jnp.float32)
    return outs


if __name__ == "__main__":
    num_classes = 3                                # len(opt.class_name)
    params = init_params(jax.random.PRNGKey(0), num_classes)

    x = jax.random.normal(jax.random.PRNGKey(0), (2, 3, 16, 16), jnp.float32)

    out = jax.jit(hu_model_forward)(params, x)
    out = jax.block_until_ready(out)

    assert out['hm'].shape == (2, num_classes, 4, 4)
    assert out['wh'].shape == (2, 2, 4, 4)
    assert out['reg'].shape == (2, 2, 4, 4)

    # numerical check against an XLA reference at matching precision
    ref = jax.jit(_reference_forward)(params, x)
    ref = jax.block_until_ready(ref)
    for k in ('hm', 'wh', 'reg'):
        err = float(jnp.max(jnp.abs(out[k] - ref[k])))
        assert err < 5e-2, (k, err)

    print("KERNEL_OK")
</pallas_src>

<mosaic_0001>
module attributes {stable_mosaic.version = 11 : i64} {
  func.func @_stem_packed_kernel(%arg0: i32, %arg1: i32, %arg2: memref<1x16x9x6xbf16, #tpu.memory_space<vmem>>, %arg3: memref<1x1x9x6xbf16, #tpu.memory_space<vmem>>, %arg4: memref<1x1x9x6xbf16, #tpu.memory_space<vmem>>, %arg5: memref<36x128xbf16, #tpu.memory_space<vmem>>, %arg6: memref<1x128xf32, #tpu.memory_space<vmem>>, %arg7: memref<1x16x10x128xbf16, #tpu.memory_space<vmem>>) attributes {dimension_semantics = [#tpu.dimension_semantics<parallel>, #tpu.dimension_semantics<parallel>], iteration_bounds = array<i64: 2, 1>, scalar_prefetch = 0 : i64, scratch_operands = 0 : i64, tpu.core_type = #tpu.core_type<tc>, window_params = [{transform_indices = @transform_0, window_bounds = array<i64: 1, 16, 9, 6>}, {transform_indices = @transform_1, window_bounds = array<i64: 1, 1, 9, 6>}, {transform_indices = @transform_2, window_bounds = array<i64: 1, 1, 9, 6>}, {pipeline_mode = #tpu.pipeline_mode<synchronous>, transform_indices = @transform_3, window_bounds = array<i64: 36, 128>}, {pipeline_mode = #tpu.pipeline_mode<synchronous>, transform_indices = @transform_4, window_bounds = array<i64: 1, 128>}, {transform_indices = @transform_5, window_bounds = array<i64: 1, 16, 10, 128>}]} {
    %c0_i32 = arith.constant 0 : i32
    %0 = arith.cmpi eq, %arg1, %c0_i32 : i32
    %cst = arith.constant 0.000000e+00 : bf16
    %1 = vector.broadcast %cst : bf16 to vector<1x9x6xbf16>
    %c0 = arith.constant 0 : index
    %c0_0 = arith.constant 0 : index
    %c0_1 = arith.constant 0 : index
    %c0_2 = arith.constant 0 : index
    %2 = vector.load %arg3[%c0, %c0_0, %c0_1, %c0_2] : memref<1x1x9x6xbf16, #tpu.memory_space<vmem>>, vector<1x1x9x6xbf16>
    %3 = vector.shape_cast %2 : vector<1x1x9x6xbf16> to vector<1x9x6xbf16>
    %4 = arith.select %0, %1, %3 : vector<1x9x6xbf16>
    %c0_i32_3 = arith.constant 0 : i32
    %5 = arith.cmpi eq, %arg1, %c0_i32_3 : i32
    %cst_4 = arith.constant 0.000000e+00 : bf16
    %6 = vector.broadcast %cst_4 : bf16 to vector<1x9x6xbf16>
    %c0_5 = arith.constant 0 : index
    %c0_6 = arith.constant 0 : index
    %c0_7 = arith.constant 0 : index
    %c0_8 = arith.constant 0 : index
    %7 = vector.load %arg4[%c0_5, %c0_6, %c0_7, %c0_8] : memref<1x1x9x6xbf16, #tpu.memory_space<vmem>>, vector<1x1x9x6xbf16>
    %8 = vector.shape_cast %7 : vector<1x1x9x6xbf16> to vector<1x9x6xbf16>
    %9 = arith.select %5, %6, %8 : vector<1x9x6xbf16>
    %c0_9 = arith.constant 0 : index
    %c0_10 = arith.constant 0 : index
    %c0_11 = arith.constant 0 : index
    %c0_12 = arith.constant 0 : index
    %10 = vector.load %arg2[%c0_9, %c0_10, %c0_11, %c0_12] : memref<1x16x9x6xbf16, #tpu.memory_space<vmem>>, vector<1x16x9x6xbf16>
    %11 = vector.shape_cast %10 : vector<1x16x9x6xbf16> to vector<16x9x6xbf16>
    %12 = tpu.concatenate %4, %11, %9 in 0 : vector<1x9x6xbf16>, vector<16x9x6xbf16>, vector<1x9x6xbf16> -> vector<18x9x6xbf16>
    %13 = vector.extract_strided_slice %12 {offsets = [0, 0, 0], sizes = [16, 8, 6], strides = [1, 1, 1]} : vector<18x9x6xbf16> to vector<16x8x6xbf16>
    %14 = vector.extract_strided_slice %12 {offsets = [0, 1, 0], sizes = [16, 8, 6], strides = [1, 1, 1]} : vector<18x9x6xbf16> to vector<16x8x6xbf16>
    %15 = vector.extract_strided_slice %12 {offsets = [1, 0, 0], sizes = [16, 8, 6], strides = [1, 1, 1]} : vector<18x9x6xbf16> to vector<16x8x6xbf16>
    %16 = vector.extract_strided_slice %12 {offsets = [1, 1, 0], sizes = [16, 8, 6], strides = [1, 1, 1]} : vector<18x9x6xbf16> to vector<16x8x6xbf16>
    %17 = vector.extract_strided_slice %12 {offsets = [2, 0, 0], sizes = [16, 8, 6], strides = [1, 1, 1]} : vector<18x9x6xbf16> to vector<16x8x6xbf16>
    %18 = vector.extract_strided_slice %12 {offsets = [2, 1, 0], sizes = [16, 8, 6], strides = [1, 1, 1]} : vector<18x9x6xbf16> to vector<16x8x6xbf16>
    %19 = vector.shape_cast %13 : vector<16x8x6xbf16> to vector<128x6xbf16>
    %20 = vector.shape_cast %14 : vector<16x8x6xbf16> to vector<128x6xbf16>
    %21 = vector.shape_cast %15 : vector<16x8x6xbf16> to vector<128x6xbf16>
    %22 = vector.shape_cast %16 : vector<16x8x6xbf16> to vector<128x6xbf16>
    %23 = vector.shape_cast %17 : vector<16x8x6xbf16> to vector<128x6xbf16>
    %24 = vector.shape_cast %18 : vector<16x8x6xbf16> to vector<128x6xbf16>
    %25 = tpu.concatenate %19, %20, %21, %22, %23, %24 in 1 : vector<128x6xbf16>, vector<128x6xbf16>, vector<128x6xbf16>, vector<128x6xbf16>, vector<128x6xbf16>, vector<128x6xbf16> -> vector<128x36xbf16>
    %c0_13 = arith.constant 0 : index
    %c0_14 = arith.constant 0 : index
    %26 = vector.load %arg5[%c0_13, %c0_14] : memref<36x128xbf16, #tpu.memory_space<vmem>>, vector<36x128xbf16>
    %cst_15 = arith.constant dense<0.000000e+00> : vector<128x128xf32>
    %27 = tpu.matmul %25, %26, %cst_15 {dimension_numbers = #tpu.dot_dimension_numbers<[1], [0], [0], [1], [0, 0, 1, 1], [], []>} : vector<128x36xbf16>, vector<36x128xbf16>, vector<128x128xf32> -> vector<128x128xf32>
    %c0_16 = arith.constant 0 : index
    %c0_17 = arith.constant 0 : index
    %28 = vector.load %arg6[%c0_16, %c0_17] : memref<1x128xf32, #tpu.memory_space<vmem>>, vector<1x128xf32>
    %29 = vector.broadcast %28 : vector<1x128xf32> to vector<128x128xf32>
    %30 = arith.addf %27, %29 : vector<128x128xf32>
    %cst_18 = arith.constant 0.000000e+00 : f32
    %31 = vector.broadcast %cst_18 : f32 to vector<128x128xf32>
    %32 = arith.maximumf %30, %31 : vector<128x128xf32>
    %33 = arith.truncf %32 : vector<128x128xf32> to vector<128x128xbf16>
    %34 = vector.shape_cast %33 : vector<128x128xbf16> to vector<16x8x128xbf16>
    %cst_19 = arith.constant 0.000000e+00 : bf16
    %35 = vector.broadcast %cst_19 : bf16 to vector<16x1x128xbf16>
    %36 = tpu.concatenate %35, %34, %35 in 1 : vector<16x1x128xbf16>, vector<16x8x128xbf16>, vector<16x1x128xbf16> -> vector<16x10x128xbf16>
    %c0_20 = arith.constant 0 : index
    %c0_21 = arith.constant 0 : index
    %c0_22 = arith.constant 0 : index
    %c0_23 = arith.constant 0 : index
    %37 = vector.load %arg7[%c0_20, %c0_21, %c0_22, %c0_23] : memref<1x16x10x128xbf16, #tpu.memory_space<vmem>>, vector<1x16x10x128xbf16>
    %38 = vector.shape_cast %37 : vector<1x16x10x128xbf16> to vector<16x10x128xbf16>
    %39 = vector.shape_cast %36 : vector<16x10x128xbf16> to vector<1x16x10x128xbf16>
    tpu.vector_store %arg7[%c0_20, %c0_21, %c0_22, %c0_23], %39 {strides = array<i32>} : memref<1x16x10x128xbf16, #tpu.memory_space<vmem>>, vector<1x16x10x128xbf16>,
    return
  }
  func.func @transform_0(%arg0: i32, %arg1: i32) -> (i32, i32, i32, i32) {
    %c0_i32 = arith.constant 0 : i32
    %c0_i32_0 = arith.constant 0 : i32
    %c0_i32_1 = arith.constant 0 : i32
    return %arg0, %arg1, %c0_i32, %c0_i32_0 : i32, i32, i32, i32
  }
  func.func @transform_1(%arg0: i32, %arg1: i32) -> (i32, i32, i32, i32) {
    %c16_i32 = arith.constant 16 : i32
    %0 = arith.muli %arg1, %c16_i32 : i32
    %c1_i32 = arith.constant 1 : i32
    %1 = arith.subi %0, %c1_i32 : i32
    %c0_i32 = arith.constant 0 : i32
    %2 = arith.maxsi %1, %c0_i32 : i32
    %c0_i32_0 = arith.constant 0 : i32
    %c0_i32_1 = arith.constant 0 : i32
    %c0_i32_2 = arith.constant 0 : i32
    return %arg0, %2, %c0_i32_0, %c0_i32_1 : i32, i32, i32, i32
  }
  func.func @transform_2(%arg0: i32, %arg1: i32) -> (i32, i32, i32, i32) {
    %c16_i32 = arith.constant 16 : i32
    %0 = arith.muli %arg1, %c16_i32 : i32
    %c16_i32_0 = arith.constant 16 : i32
    %1 = arith.addi %0, %c16_i32_0 : i32
    %c15_i32 = arith.constant 15 : i32
    %2 = arith.minsi %1, %c15_i32 : i32
    %c0_i32 = arith.constant 0 : i32
    %c0_i32_1 = arith.constant 0 : i32
    %c0_i32_2 = arith.constant 0 : i32
    return %arg0, %2, %c0_i32, %c0_i32_1 : i32, i32, i32, i32
  }
  func.func @transform_3(%arg0: i32, %arg1: i32) -> (i32, i32) {
    %c0_i32 = arith.constant 0 : i32
    %c0_i32_0 = arith.constant 0 : i32
    %c0_i32_1 = arith.constant 0 : i32
    return %c0_i32, %c0_i32_0 : i32, i32
  }
  func.func @transform_4(%arg0: i32, %arg1: i32) -> (i32, i32) {
    %c0_i32 = arith.constant 0 : i32
    %c0_i32_0 = arith.constant 0 : i32
    %c0_i32_1 = arith.constant 0 : i32
    return %c0_i32, %c0_i32_0 : i32, i32
  }
  func.func @transform_5(%arg0: i32, %arg1: i32) -> (i32, i32, i32, i32) {
    %c0_i32 = arith.constant 0 : i32
    %c0_i32_0 = arith.constant 0 : i32
    %c0_i32_1 = arith.constant 0 : i32
    return %arg0, %arg1, %c0_i32, %c0_i32_0 : i32, i32, i32, i32
  }
}

module attributes {stable_mosaic.version = 11 : i64} {
  func.func @_conv3x3_s2_kernel(%arg0: i32, %arg1: i32, %arg2: memref<1x16x10x128xbf16, #tpu.memory_space<vmem>>, %arg3: memref<1x1x10x128xbf16, #tpu.memory_space<vmem>>, %arg4: memref<1x1x10x128xbf16, #tpu.memory_space<vmem>>, %arg5: memref<576x64xbf16, #tpu.memory_space<vmem>>, %arg6: memref<1x64xf32, #tpu.memory_space<vmem>>, %arg7: memref<1x8x10x64xbf16, #tpu.memory_space<vmem>>) attributes {dimension_semantics = [#tpu.dimension_semantics<parallel>, #tpu.dimension_semantics<parallel>], iteration_bounds = array<i64: 2, 1>, scalar_prefetch = 0 : i64, scratch_operands = 0 : i64, tpu.core_type = #tpu.core_type<tc>, window_params = [{transform_indices = @transform_0, window_bounds = array<i64: 1, 16, 10, 128>}, {transform_indices = @transform_1, window_bounds = array<i64: 1, 1, 10, 128>}, {transform_indices = @transform_2, window_bounds = array<i64: 1, 1, 10, 128>}, {pipeline_mode = #tpu.pipeline_mode<synchronous>, transform_indices = @transform_3, window_bounds = array<i64: 576, 64>}, {pipeline_mode = #tpu.pipeline_mode<synchronous>, transform_indices = @transform_4, window_bounds = array<i64: 1, 64>}, {transform_indices = @transform_5, window_bounds = array<i64: 1, 8, 10, 64>}]} {
    %c0_i32 = arith.constant 0 : i32
    %0 = arith.cmpi eq, %arg1, %c0_i32 : i32
    %cst = arith.constant 0.000000e+00 : bf16
    %1 = vector.broadcast %cst : bf16 to vector<1x10x128xbf16>
    %c0 = arith.constant 0 : index
    %c0_0 = arith.constant 0 : index
    %c0_1 = arith.constant 0 : index
    %c0_2 = arith.constant 0 : index
    %2 = vector.load %arg3[%c0, %c0_0, %c0_1, %c0_2] : memref<1x1x10x128xbf16, #tpu.memory_space<vmem>>, vector<1x1x10x128xbf16>
    %3 = vector.shape_cast %2 : vector<1x1x10x128xbf16> to vector<1x10x128xbf16>
    %4 = arith.select %0, %1, %3 : vector<1x10x128xbf16>
    %c0_i32_3 = arith.constant 0 : i32
    %5 = arith.cmpi eq, %arg1, %c0_i32_3 : i32
    %cst_4 = arith.constant 0.000000e+00 : bf16
    %6 = vector.broadcast %cst_4 : bf16 to vector<1x10x128xbf16>
    %c0_5 = arith.constant 0 : index
    %c0_6 = arith.constant 0 : index
    %c0_7 = arith.constant 0 : index
    %c0_8 = arith.constant 0 : index
    %7 = vector.load %arg4[%c0_5, %c0_6, %c0_7, %c0_8] : memref<1x1x10x128xbf16, #tpu.memory_space<vmem>>, vector<1x1x10x128xbf16>
    %8 = vector.shape_cast %7 : vector<1x1x10x128xbf16> to vector<1x10x128xbf16>
    %9 = arith.select %5, %6, %8 : vector<1x10x128xbf16>
    %c0_9 = arith.constant 0 : index
    %c0_10 = arith.constant 0 : index
    %c0_11 = arith.constant 0 : index
    %c0_12 = arith.constant 0 : index
    %10 = vector.load %arg2[%c0_9, %c0_10, %c0_11, %c0_12] : memref<1x16x10x128xbf16, #tpu.memory_space<vmem>>, vector<1x16x10x128xbf16>
    %11 = vector.shape_cast %10 : vector<1x16x10x128xbf16> to vector<16x10x128xbf16>
    %12 = tpu.concatenate %4, %11, %9 in 0 : vector<1x10x128xbf16>, vector<16x10x128xbf16>, vector<1x10x128xbf16> -> vector<18x10x128xbf16>
    %13 = vector.shape_cast %12 : vector<18x10x128xbf16> to vector<9x2x10x128xbf16>
    %14 = vector.extract_strided_slice %13 {offsets = [0, 0, 0, 0], sizes = [9, 1, 10, 128], strides = [1, 1, 1, 1]} : vector<9x2x10x128xbf16> to vector<9x1x10x128xbf16>
    %15 = vector.shape_cast %14 : vector<9x1x10x128xbf16> to vector<9x10x128xbf16>
    %16 = vector.extract_strided_slice %15 {offsets = [0, 0, 64], sizes = [8, 8, 64], strides = [1, 1, 1]} : vector<9x10x128xbf16> to vector<8x8x64xbf16>
    %17 = vector.extract_strided_slice %15 {offsets = [0, 1, 0], sizes = [8, 8, 64], strides = [1, 1, 1]} : vector<9x10x128xbf16> to vector<8x8x64xbf16>
    %18 = vector.extract_strided_slice %15 {offsets = [0, 1, 64], sizes = [8, 8, 64], strides = [1, 1, 1]} : vector<9x10x128xbf16> to vector<8x8x64xbf16>
    %19 = vector.extract_strided_slice %13 {offsets = [0, 1, 0, 0], sizes = [9, 1, 10, 128], strides = [1, 1, 1, 1]} : vector<9x2x10x128xbf16> to vector<9x1x10x128xbf16>
    %20 = vector.shape_cast %19 : vector<9x1x10x128xbf16> to vector<9x10x128xbf16>
    %21 = vector.extract_strided_slice %20 {offsets = [0, 0, 64], sizes = [8, 8, 64], strides = [1, 1, 1]} : vector<9x10x128xbf16> to vector<8x8x64xbf16>
    %22 = vector.extract_strided_slice %20 {offsets = [0, 1, 0], sizes = [8, 8, 64], strides = [1, 1, 1]} : vector<9x10x128xbf16> to vector<8x8x64xbf16>
    %23 = vector.extract_strided_slice %20 {offsets = [0, 1, 64], sizes = [8, 8, 64], strides = [1, 1, 1]} : vector<9x10x128xbf16> to vector<8x8x64xbf16>
    %24 = vector.extract_strided_slice %13 {offsets = [0, 0, 0, 0], sizes = [9, 1, 10, 128], strides = [1, 1, 1, 1]} : vector<9x2x10x128xbf16> to vector<9x1x10x128xbf16>
    %25 = vector.shape_cast %24 : vector<9x1x10x128xbf16> to vector<9x10x128xbf16>
    %26 = vector.extract_strided_slice %25 {offsets = [1, 0, 64], sizes = [8, 8, 64], strides = [1, 1, 1]} : vector<9x10x128xbf16> to vector<8x8x64xbf16>
    %27 = vector.extract_strided_slice %25 {offsets = [1, 1, 0], sizes = [8, 8, 64], strides = [1, 1, 1]} : vector<9x10x128xbf16> to vector<8x8x64xbf16>
    %28 = vector.extract_strided_slice %25 {offsets = [1, 1, 64], sizes = [8, 8, 64], strides = [1, 1, 1]} : vector<9x10x128xbf16> to vector<8x8x64xbf16>
    %29 = vector.shape_cast %16 : vector<8x8x64xbf16> to vector<64x64xbf16>
    %30 = vector.shape_cast %17 : vector<8x8x64xbf16> to vector<64x64xbf16>
    %31 = vector.shape_cast %18 : vector<8x8x64xbf16> to vector<64x64xbf16>
    %32 = vector.shape_cast %21 : vector<8x8x64xbf16> to vector<64x64xbf16>
    %33 = vector.shape_cast %22 : vector<8x8x64xbf16> to vector<64x64xbf16>
    %34 = vector.shape_cast %23 : vector<8x8x64xbf16> to vector<64x64xbf16>
    %35 = vector.shape_cast %26 : vector<8x8x64xbf16> to vector<64x64xbf16>
    %36 = vector.shape_cast %27 : vector<8x8x64xbf16> to vector<64x64xbf16>
    %37 = vector.shape_cast %28 : vector<8x8x64xbf16> to vector<64x64xbf16>
    %38 = tpu.concatenate %29, %30, %31, %32, %33, %34, %35, %36, %37 in 1 : vector<64x64xbf16>, vector<64x64xbf16>, vector<64x64xbf16>, vector<64x64xbf16>, vector<64x64xbf16>, vector<64x64xbf16>, vector<64x64xbf16>, vector<64x64xbf16>, vector<64x64xbf16> -> vector<64x576xbf16>
    %c0_13 = arith.constant 0 : index
    %c0_14 = arith.constant 0 : index
    %39 = vector.load %arg5[%c0_13, %c0_14] : memref<576x64xbf16, #tpu.memory_space<vmem>>, vector<576x64xbf16>
    %cst_15 = arith.constant dense<0.000000e+00> : vector<64x64xf32>
    %40 = tpu.matmul %38, %39, %cst_15 {dimension_numbers = #tpu.dot_dimension_numbers<[1], [0], [0], [1], [0, 0, 1, 1], [], []>} : vector<64x576xbf16>, vector<576x64xbf16>, vector<64x64xf32> -> vector<64x64xf32>
    %c0_16 = arith.constant 0 : index
    %c0_17 = arith.constant 0 : index
    %41 = vector.load %arg6[%c0_16, %c0_17] : memref<1x64xf32, #tpu.memory_space<vmem>>, vector<1x64xf32>
    %42 = vector.broadcast %41 : vector<1x64xf32> to vector<64x64xf32>
    %43 = arith.addf %40, %42 : vector<64x64xf32>
    %cst_18 = arith.constant 0.000000e+00 : f32
    %44 = vector.broadcast %cst_18 : f32 to vector<64x64xf32>
    %45 = arith.maximumf %43, %44 : vector<64x64xf32>
    %46 = arith.truncf %45 : vector<64x64xf32> to vector<64x64xbf16>
    %47 = vector.shape_cast %46 : vector<64x64xbf16> to vector<8x8x64xbf16>
    %cst_19 = arith.constant 0.000000e+00 : bf16
    %48 = vector.broadcast %cst_19 : bf16 to vector<8x1x64xbf16>
    %49 = tpu.concatenate %48, %47, %48 in 1 : vector<8x1x64xbf16>, vector<8x8x64xbf16>, vector<8x1x64xbf16> -> vector<8x10x64xbf16>
    %c0_20 = arith.constant 0 : index
    %c0_21 = arith.constant 0 : index
    %c0_22 = arith.constant 0 : index
    %c0_23 = arith.constant 0 : index
    %50 = vector.load %arg7[%c0_20, %c0_21, %c0_22, %c0_23] : memref<1x8x10x64xbf16, #tpu.memory_space<vmem>>, vector<1x8x10x64xbf16>
    %51 = vector.shape_cast %50 : vector<1x8x10x64xbf16> to vector<8x10x64xbf16>
    %52 = vector.shape_cast %49 : vector<8x10x64xbf16> to vector<1x8x10x64xbf16>
    tpu.vector_store %arg7[%c0_20, %c0_21, %c0_22, %c0_23], %52 {strides = array<i32>} : memref<1x8x10x64xbf16, #tpu.memory_space<vmem>>, vector<1x8x10x64xbf16>,
    return
  }
  func.func @transform_0(%arg0: i32, %arg1: i32) -> (i32, i32, i32, i32) {
    %c0_i32 = arith.constant 0 : i32
    %c0_i32_0 = arith.constant 0 : i32
    %c0_i32_1 = arith.constant 0 : i32
    return %arg0, %arg1, %c0_i32, %c0_i32_0 : i32, i32, i32, i32
  }
  func.func @transform_1(%arg0: i32, %arg1: i32) -> (i32, i32, i32, i32) {
    %c16_i32 = arith.constant 16 : i32
    %0 = arith.muli %arg1, %c16_i32 : i32
    %c1_i32 = arith.constant 1 : i32
    %1 = arith.subi %0, %c1_i32 : i32
    %c0_i32 = arith.constant 0 : i32
    %2 = arith.maxsi %1, %c0_i32 : i32
    %c0_i32_0 = arith.constant 0 : i32
    %c0_i32_1 = arith.constant 0 : i32
    %c0_i32_2 = arith.constant 0 : i32
    return %arg0, %2, %c0_i32_0, %c0_i32_1 : i32, i32, i32, i32
  }
  func.func @transform_2(%arg0: i32, %arg1: i32) -> (i32, i32, i32, i32) {
    %c16_i32 = arith.constant 16 : i32
    %0 = arith.muli %arg1, %c16_i32 : i32
    %c16_i32_0 = arith.constant 16 : i32
    %1 = arith.addi %0, %c16_i32_0 : i32
    %c15_i32 = arith.constant 15 : i32
    %2 = arith.minsi %1, %c15_i32 : i32
    %c0_i32 = arith.constant 0 : i32
    %c0_i32_1 = arith.constant 0 : i32
    %c0_i32_2 = arith.constant 0 : i32
    return %arg0, %2, %c0_i32, %c0_i32_1 : i32, i32, i32, i32
  }
  func.func @transform_3(%arg0: i32, %arg1: i32) -> (i32, i32) {
    %c0_i32 = arith.constant 0 : i32
    %c0_i32_0 = arith.constant 0 : i32
    %c0_i32_1 = arith.constant 0 : i32
    return %c0_i32, %c0_i32_0 : i32, i32
  }
  func.func @transform_4(%arg0: i32, %arg1: i32) -> (i32, i32) {
    %c0_i32 = arith.constant 0 : i32
    %c0_i32_0 = arith.constant 0 : i32
    %c0_i32_1 = arith.constant 0 : i32
    return %c0_i32, %c0_i32_0 : i32, i32
  }
  func.func @transform_5(%arg0: i32, %arg1: i32) -> (i32, i32, i32, i32) {
    %c0_i32 = arith.constant 0 : i32
    %c0_i32_0 = arith.constant 0 : i32
    %c0_i32_1 = arith.constant 0 : i32
    return %arg0, %arg1, %c0_i32, %c0_i32_0 : i32, i32, i32, i32
  }
}

module attributes {stable_mosaic.version = 11 : i64} {
  func.func @_conv3x3_s2_kernel(%arg0: i32, %arg1: i32, %arg2: memref<1x8x5x128xbf16, #tpu.memory_space<vmem>>, %arg3: memref<1x1x5x128xbf16, #tpu.memory_space<vmem>>, %arg4: memref<1x1x5x128xbf16, #tpu.memory_space<vmem>>, %arg5: memref<576x64xbf16, #tpu.memory_space<vmem>>, %arg6: memref<1x64xf32, #tpu.memory_space<vmem>>, %arg7: memref<1x4x6x64xbf16, #tpu.memory_space<vmem>>) attributes {dimension_semantics = [#tpu.dimension_semantics<parallel>, #tpu.dimension_semantics<parallel>], iteration_bounds = array<i64: 2, 1>, scalar_prefetch = 0 : i64, scratch_operands = 0 : i64, tpu.core_type = #tpu.core_type<tc>, window_params = [{transform_indices = @transform_0, window_bounds = array<i64: 1, 8, 5, 128>}, {transform_indices = @transform_1, window_bounds = array<i64: 1, 1, 5, 128>}, {transform_indices = @transform_2, window_bounds = array<i64: 1, 1, 5, 128>}, {pipeline_mode = #tpu.pipeline_mode<synchronous>, transform_indices = @transform_3, window_bounds = array<i64: 576, 64>}, {pipeline_mode = #tpu.pipeline_mode<synchronous>, transform_indices = @transform_4, window_bounds = array<i64: 1, 64>}, {transform_indices = @transform_5, window_bounds = array<i64: 1, 4, 6, 64>}]} {
    %c0_i32 = arith.constant 0 : i32
    %0 = arith.cmpi eq, %arg1, %c0_i32 : i32
    %cst = arith.constant 0.000000e+00 : bf16
    %1 = vector.broadcast %cst : bf16 to vector<1x5x128xbf16>
    %c0 = arith.constant 0 : index
    %c0_0 = arith.constant 0 : index
    %c0_1 = arith.constant 0 : index
    %c0_2 = arith.constant 0 : index
    %2 = vector.load %arg3[%c0, %c0_0, %c0_1, %c0_2] : memref<1x1x5x128xbf16, #tpu.memory_space<vmem>>, vector<1x1x5x128xbf16>
    %3 = vector.shape_cast %2 : vector<1x1x5x128xbf16> to vector<1x5x128xbf16>
    %4 = arith.select %0, %1, %3 : vector<1x5x128xbf16>
    %c0_i32_3 = arith.constant 0 : i32
    %5 = arith.cmpi eq, %arg1, %c0_i32_3 : i32
    %cst_4 = arith.constant 0.000000e+00 : bf16
    %6 = vector.broadcast %cst_4 : bf16 to vector<1x5x128xbf16>
    %c0_5 = arith.constant 0 : index
    %c0_6 = arith.constant 0 : index
    %c0_7 = arith.constant 0 : index
    %c0_8 = arith.constant 0 : index
    %7 = vector.load %arg4[%c0_5, %c0_6, %c0_7, %c0_8] : memref<1x1x5x128xbf16, #tpu.memory_space<vmem>>, vector<1x1x5x128xbf16>
    %8 = vector.shape_cast %7 : vector<1x1x5x128xbf16> to vector<1x5x128xbf16>
    %9 = arith.select %5, %6, %8 : vector<1x5x128xbf16>
    %c0_9 = arith.constant 0 : index
    %c0_10 = arith.constant 0 : index
    %c0_11 = arith.constant 0 : index
    %c0_12 = arith.constant 0 : index
    %10 = vector.load %arg2[%c0_9, %c0_10, %c0_11, %c0_12] : memref<1x8x5x128xbf16, #tpu.memory_space<vmem>>, vector<1x8x5x128xbf16>
    %11 = vector.shape_cast %10 : vector<1x8x5x128xbf16> to vector<8x5x128xbf16>
    %12 = tpu.concatenate %4, %11, %9 in 0 : vector<1x5x128xbf16>, vector<8x5x128xbf16>, vector<1x5x128xbf16> -> vector<10x5x128xbf16>
    %13 = vector.shape_cast %12 : vector<10x5x128xbf16> to vector<5x2x5x128xbf16>
    %14 = vector.extract_strided_slice %13 {offsets = [0, 0, 0, 0], sizes = [5, 1, 5, 128], strides = [1, 1, 1, 1]} : vector<5x2x5x128xbf16> to vector<5x1x5x128xbf16>
    %15 = vector.shape_cast %14 : vector<5x1x5x128xbf16> to vector<5x5x128xbf16>
    %16 = vector.extract_strided_slice %15 {offsets = [0, 0, 0], sizes = [4, 4, 64], strides = [1, 1, 1]} : vector<5x5x128xbf16> to vector<4x4x64xbf16>
    %17 = vector.extract_strided_slice %15 {offsets = [0, 0, 64], sizes = [4, 4, 64], strides = [1, 1, 1]} : vector<5x5x128xbf16> to vector<4x4x64xbf16>
    %18 = vector.extract_strided_slice %15 {offsets = [0, 1, 0], sizes = [4, 4, 64], strides = [1, 1, 1]} : vector<5x5x128xbf16> to vector<4x4x64xbf16>
    %19 = vector.extract_strided_slice %13 {offsets = [0, 1, 0, 0], sizes = [5, 1, 5, 128], strides = [1, 1, 1, 1]} : vector<5x2x5x128xbf16> to vector<5x1x5x128xbf16>
    %20 = vector.shape_cast %19 : vector<5x1x5x128xbf16> to vector<5x5x128xbf16>
    %21 = vector.extract_strided_slice %20 {offsets = [0, 0, 0], sizes = [4, 4, 64], strides = [1, 1, 1]} : vector<5x5x128xbf16> to vector<4x4x64xbf16>
    %22 = vector.extract_strided_slice %20 {offsets = [0, 0, 64], sizes = [4, 4, 64], strides = [1, 1, 1]} : vector<5x5x128xbf16> to vector<4x4x64xbf16>
    %23 = vector.extract_strided_slice %20 {offsets = [0, 1, 0], sizes = [4, 4, 64], strides = [1, 1, 1]} : vector<5x5x128xbf16> to vector<4x4x64xbf16>
    %24 = vector.extract_strided_slice %13 {offsets = [0, 0, 0, 0], sizes = [5, 1, 5, 128], strides = [1, 1, 1, 1]} : vector<5x2x5x128xbf16> to vector<5x1x5x128xbf16>
    %25 = vector.shape_cast %24 : vector<5x1x5x128xbf16> to vector<5x5x128xbf16>
    %26 = vector.extract_strided_slice %25 {offsets = [1, 0, 0], sizes = [4, 4, 64], strides = [1, 1, 1]} : vector<5x5x128xbf16> to vector<4x4x64xbf16>
    %27 = vector.extract_strided_slice %25 {offsets = [1, 0, 64], sizes = [4, 4, 64], strides = [1, 1, 1]} : vector<5x5x128xbf16> to vector<4x4x64xbf16>
    %28 = vector.extract_strided_slice %25 {offsets = [1, 1, 0], sizes = [4, 4, 64], strides = [1, 1, 1]} : vector<5x5x128xbf16> to vector<4x4x64xbf16>
    %29 = vector.shape_cast %16 : vector<4x4x64xbf16> to vector<16x64xbf16>
    %30 = vector.shape_cast %17 : vector<4x4x64xbf16> to vector<16x64xbf16>
    %31 = vector.shape_cast %18 : vector<4x4x64xbf16> to vector<16x64xbf16>
    %32 = vector.shape_cast %21 : vector<4x4x64xbf16> to vector<16x64xbf16>
    %33 = vector.shape_cast %22 : vector<4x4x64xbf16> to vector<16x64xbf16>
    %34 = vector.shape_cast %23 : vector<4x4x64xbf16> to vector<16x64xbf16>
    %35 = vector.shape_cast %26 : vector<4x4x64xbf16> to vector<16x64xbf16>
    %36 = vector.shape_cast %27 : vector<4x4x64xbf16> to vector<16x64xbf16>
    %37 = vector.shape_cast %28 : vector<4x4x64xbf16> to vector<16x64xbf16>
    %38 = tpu.concatenate %29, %30, %31, %32, %33, %34, %35, %36, %37 in 1 : vector<16x64xbf16>, vector<16x64xbf16>, vector<16x64xbf16>, vector<16x64xbf16>, vector<16x64xbf16>, vector<16x64xbf16>, vector<16x64xbf16>, vector<16x64xbf16>, vector<16x64xbf16> -> vector<16x576xbf16>
    %c0_13 = arith.constant 0 : index
    %c0_14 = arith.constant 0 : index
    %39 = vector.load %arg5[%c0_13, %c0_14] : memref<576x64xbf16, #tpu.memory_space<vmem>>, vector<576x64xbf16>
    %cst_15 = arith.constant dense<0.000000e+00> : vector<16x64xf32>
    %40 = tpu.matmul %38, %39, %cst_15 {dimension_numbers = #tpu.dot_dimension_numbers<[1], [0], [0], [1], [0, 0, 1, 1], [], []>} : vector<16x576xbf16>, vector<576x64xbf16>, vector<16x64xf32> -> vector<16x64xf32>
    %c0_16 = arith.constant 0 : index
    %c0_17 = arith.constant 0 : index
    %41 = vector.load %arg6[%c0_16, %c0_17] : memref<1x64xf32, #tpu.memory_space<vmem>>, vector<1x64xf32>
    %42 = vector.broadcast %41 : vector<1x64xf32> to vector<16x64xf32>
    %43 = arith.addf %40, %42 : vector<16x64xf32>
    %cst_18 = arith.constant 0.000000e+00 : f32
    %44 = vector.broadcast %cst_18 : f32 to vector<16x64xf32>
    %45 = arith.maximumf %43, %44 : vector<16x64xf32>
    %46 = arith.truncf %45 : vector<16x64xf32> to vector<16x64xbf16>
    %47 = vector.shape_cast %46 : vector<16x64xbf16> to vector<4x4x64xbf16>
    %cst_19 = arith.constant 0.000000e+00 : bf16
    %48 = vector.broadcast %cst_19 : bf16 to vector<4x1x64xbf16>
    %49 = tpu.concatenate %48, %47, %48 in 1 : vector<4x1x64xbf16>, vector<4x4x64xbf16>, vector<4x1x64xbf16> -> vector<4x6x64xbf16>
    %c0_20 = arith.constant 0 : index
    %c0_21 = arith.constant 0 : index
    %c0_22 = arith.constant 0 : index
    %c0_23 = arith.constant 0 : index
    %50 = vector.load %arg7[%c0_20, %c0_21, %c0_22, %c0_23] : memref<1x4x6x64xbf16, #tpu.memory_space<vmem>>, vector<1x4x6x64xbf16>
    %51 = vector.shape_cast %50 : vector<1x4x6x64xbf16> to vector<4x6x64xbf16>
    %52 = vector.shape_cast %49 : vector<4x6x64xbf16> to vector<1x4x6x64xbf16>
    tpu.vector_store %arg7[%c0_20, %c0_21, %c0_22, %c0_23], %52 {strides = array<i32>} : memref<1x4x6x64xbf16, #tpu.memory_space<vmem>>, vector<1x4x6x64xbf16>,
    return
  }
  func.func @transform_0(%arg0: i32, %arg1: i32) -> (i32, i32, i32, i32) {
    %c0_i32 = arith.constant 0 : i32
    %c0_i32_0 = arith.constant 0 : i32
    %c0_i32_1 = arith.constant 0 : i32
    return %arg0, %arg1, %c0_i32, %c0_i32_0 : i32, i32, i32, i32
  }
  func.func @transform_1(%arg0: i32, %arg1: i32) -> (i32, i32, i32, i32) {
    %c8_i32 = arith.constant 8 : i32
    %0 = arith.muli %arg1, %c8_i32 : i32
    %c1_i32 = arith.constant 1 : i32
    %1 = arith.subi %0, %c1_i32 : i32
    %c0_i32 = arith.constant 0 : i32
    %2 = arith.maxsi %1, %c0_i32 : i32
    %c0_i32_0 = arith.constant 0 : i32
    %c0_i32_1 = arith.constant 0 : i32
    %c0_i32_2 = arith.constant 0 : i32
    return %arg0, %2, %c0_i32_0, %c0_i32_1 : i32, i32, i32, i32
  }
  func.func @transform_2(%arg0: i32, %arg1: i32) -> (i32, i32, i32, i32) {
    %c8_i32 = arith.constant 8 : i32
    %0 = arith.muli %arg1, %c8_i32 : i32
    %c8_i32_0 = arith.constant 8 : i32
    %1 = arith.addi %0, %c8_i32_0 : i32
    %c7_i32 = arith.constant 7 : i32
    %2 = arith.minsi %1, %c7_i32 : i32
    %c0_i32 = arith.constant 0 : i32
    %c0_i32_1 = arith.constant 0 : i32
    %c0_i32_2 = arith.constant 0 : i32
    return %arg0, %2, %c0_i32, %c0_i32_1 : i32, i32, i32, i32
  }
  func.func @transform_3(%arg0: i32, %arg1: i32) -> (i32, i32) {
    %c0_i32 = arith.constant 0 : i32
    %c0_i32_0 = arith.constant 0 : i32
    %c0_i32_1 = arith.constant 0 : i32
    return %c0_i32, %c0_i32_0 : i32, i32
  }
  func.func @transform_4(%arg0: i32, %arg1: i32) -> (i32, i32) {
    %c0_i32 = arith.constant 0 : i32
    %c0_i32_0 = arith.constant 0 : i32
    %c0_i32_1 = arith.constant 0 : i32
    return %c0_i32, %c0_i32_0 : i32, i32
  }
  func.func @transform_5(%arg0: i32, %arg1: i32) -> (i32, i32, i32, i32) {
    %c0_i32 = arith.constant 0 : i32
    %c0_i32_0 = arith.constant 0 : i32
    %c0_i32_1 = arith.constant 0 : i32
    return %arg0, %arg1, %c0_i32, %c0_i32_0 : i32, i32, i32, i32
  }
}

module attributes {stable_mosaic.version = 11 : i64} {
  func.func @_head_band_kernel(%arg0: i32, %arg1: i32, %arg2: memref<1x4x6x64xbf16, #tpu.memory_space<vmem>>, %arg3: memref<1x1x6x64xbf16, #tpu.memory_space<vmem>>, %arg4: memref<1x1x6x64xbf16, #tpu.memory_space<vmem>>, %arg5: memref<576x192xbf16, #tpu.memory_space<vmem>>, %arg6: memref<1x192xf32, #tpu.memory_space<vmem>>, %arg7: memref<192x7xbf16, #tpu.memory_space<vmem>>, %arg8: memref<1x7xf32, #tpu.memory_space<vmem>>, %arg9: memref<1x4x4x7xf32, #tpu.memory_space<vmem>>) attributes {dimension_semantics = [#tpu.dimension_semantics<parallel>, #tpu.dimension_semantics<parallel>], iteration_bounds = array<i64: 2, 1>, scalar_prefetch = 0 : i64, scratch_operands = 0 : i64, tpu.core_type = #tpu.core_type<tc>, window_params = [{transform_indices = @transform_0, window_bounds = array<i64: 1, 4, 6, 64>}, {transform_indices = @transform_1, window_bounds = array<i64: 1, 1, 6, 64>}, {transform_indices = @transform_2, window_bounds = array<i64: 1, 1, 6, 64>}, {pipeline_mode = #tpu.pipeline_mode<synchronous>, transform_indices = @transform_3, window_bounds = array<i64: 576, 192>}, {pipeline_mode = #tpu.pipeline_mode<synchronous>, transform_indices = @transform_4, window_bounds = array<i64: 1, 192>}, {pipeline_mode = #tpu.pipeline_mode<synchronous>, transform_indices = @transform_5, window_bounds = array<i64: 192, 7>}, {pipeline_mode = #tpu.pipeline_mode<synchronous>, transform_indices = @transform_6, window_bounds = array<i64: 1, 7>}, {transform_indices = @transform_7, window_bounds = array<i64: 1, 4, 4, 7>}]} {
    %c0_i32 = arith.constant 0 : i32
    %0 = arith.cmpi eq, %arg1, %c0_i32 : i32
    %cst = arith.constant 0.000000e+00 : bf16
    %1 = vector.broadcast %cst : bf16 to vector<1x6x64xbf16>
    %c0 = arith.constant 0 : index
    %c0_0 = arith.constant 0 : index
    %c0_1 = arith.constant 0 : index
    %c0_2 = arith.constant 0 : index
    %2 = vector.load %arg3[%c0, %c0_0, %c0_1, %c0_2] : memref<1x1x6x64xbf16, #tpu.memory_space<vmem>>, vector<1x1x6x64xbf16>
    %3 = vector.shape_cast %2 : vector<1x1x6x64xbf16> to vector<1x6x64xbf16>
    %4 = arith.select %0, %1, %3 : vector<1x6x64xbf16>
    %c0_i32_3 = arith.constant 0 : i32
    %5 = arith.cmpi eq, %arg1, %c0_i32_3 : i32
    %cst_4 = arith.constant 0.000000e+00 : bf16
    %6 = vector.broadcast %cst_4 : bf16 to vector<1x6x64xbf16>
    %c0_5 = arith.constant 0 : index
    %c0_6 = arith.constant 0 : index
    %c0_7 = arith.constant 0 : index
    %c0_8 = arith.constant 0 : index
    %7 = vector.load %arg4[%c0_5, %c0_6, %c0_7, %c0_8] : memref<1x1x6x64xbf16, #tpu.memory_space<vmem>>, vector<1x1x6x64xbf16>
    %8 = vector.shape_cast %7 : vector<1x1x6x64xbf16> to vector<1x6x64xbf16>
    %9 = arith.select %5, %6, %8 : vector<1x6x64xbf16>
    %c0_9 = arith.constant 0 : index
    %c0_10 = arith.constant 0 : index
    %c0_11 = arith.constant 0 : index
    %c0_12 = arith.constant 0 : index
    %10 = vector.load %arg2[%c0_9, %c0_10, %c0_11, %c0_12] : memref<1x4x6x64xbf16, #tpu.memory_space<vmem>>, vector<1x4x6x64xbf16>
    %11 = vector.shape_cast %10 : vector<1x4x6x64xbf16> to vector<4x6x64xbf16>
    %12 = tpu.concatenate %4, %11, %9 in 0 : vector<1x6x64xbf16>, vector<4x6x64xbf16>, vector<1x6x64xbf16> -> vector<6x6x64xbf16>
    %13 = vector.extract_strided_slice %12 {offsets = [0, 0, 0], sizes = [4, 4, 64], strides = [1, 1, 1]} : vector<6x6x64xbf16> to vector<4x4x64xbf16>
    %14 = vector.extract_strided_slice %12 {offsets = [0, 1, 0], sizes = [4, 4, 64], strides = [1, 1, 1]} : vector<6x6x64xbf16> to vector<4x4x64xbf16>
    %15 = vector.extract_strided_slice %12 {offsets = [0, 2, 0], sizes = [4, 4, 64], strides = [1, 1, 1]} : vector<6x6x64xbf16> to vector<4x4x64xbf16>
    %16 = vector.extract_strided_slice %12 {offsets = [1, 0, 0], sizes = [4, 4, 64], strides = [1, 1, 1]} : vector<6x6x64xbf16> to vector<4x4x64xbf16>
    %17 = vector.extract_strided_slice %12 {offsets = [1, 1, 0], sizes = [4, 4, 64], strides = [1, 1, 1]} : vector<6x6x64xbf16> to vector<4x4x64xbf16>
    %18 = vector.extract_strided_slice %12 {offsets = [1, 2, 0], sizes = [4, 4, 64], strides = [1, 1, 1]} : vector<6x6x64xbf16> to vector<4x4x64xbf16>
    %19 = vector.extract_strided_slice %12 {offsets = [2, 0, 0], sizes = [4, 4, 64], strides = [1, 1, 1]} : vector<6x6x64xbf16> to vector<4x4x64xbf16>
    %20 = vector.extract_strided_slice %12 {offsets = [2, 1, 0], sizes = [4, 4, 64], strides = [1, 1, 1]} : vector<6x6x64xbf16> to vector<4x4x64xbf16>
    %21 = vector.extract_strided_slice %12 {offsets = [2, 2, 0], sizes = [4, 4, 64], strides = [1, 1, 1]} : vector<6x6x64xbf16> to vector<4x4x64xbf16>
    %22 = vector.shape_cast %13 : vector<4x4x64xbf16> to vector<16x64xbf16>
    %23 = vector.shape_cast %14 : vector<4x4x64xbf16> to vector<16x64xbf16>
    %24 = vector.shape_cast %15 : vector<4x4x64xbf16> to vector<16x64xbf16>
    %25 = vector.shape_cast %16 : vector<4x4x64xbf16> to vector<16x64xbf16>
    %26 = vector.shape_cast %17 : vector<4x4x64xbf16> to vector<16x64xbf16>
    %27 = vector.shape_cast %18 : vector<4x4x64xbf16> to vector<16x64xbf16>
    %28 = vector.shape_cast %19 : vector<4x4x64xbf16> to vector<16x64xbf16>
    %29 = vector.shape_cast %20 : vector<4x4x64xbf16> to vector<16x64xbf16>
    %30 = vector.shape_cast %21 : vector<4x4x64xbf16> to vector<16x64xbf16>
    %31 = tpu.concatenate %22, %23, %24, %25, %26, %27, %28, %29, %30 in 1 : vector<16x64xbf16>, vector<16x64xbf16>, vector<16x64xbf16>, vector<16x64xbf16>, vector<16x64xbf16>, vector<16x64xbf16>, vector<16x64xbf16>, vector<16x64xbf16>, vector<16x64xbf16> -> vector<16x576xbf16>
    %c0_13 = arith.constant 0 : index
    %c0_14 = arith.constant 0 : index
    %32 = vector.load %arg5[%c0_13, %c0_14] : memref<576x192xbf16, #tpu.memory_space<vmem>>, vector<576x192xbf16>
    %cst_15 = arith.constant dense<0.000000e+00> : vector<16x192xf32>
    %33 = tpu.matmul %31, %32, %cst_15 {dimension_numbers = #tpu.dot_dimension_numbers<[1], [0], [0], [1], [0, 0, 1, 1], [], []>} : vector<16x576xbf16>, vector<576x192xbf16>, vector<16x192xf32> -> vector<16x192xf32>
    %c0_16 = arith.constant 0 : index
    %c0_17 = arith.constant 0 : index
    %34 = vector.load %arg6[%c0_16, %c0_17] : memref<1x192xf32, #tpu.memory_space<vmem>>, vector<1x192xf32>
    %35 = vector.broadcast %34 : vector<1x192xf32> to vector<16x192xf32>
    %36 = arith.addf %33, %35 : vector<16x192xf32>
    %cst_18 = arith.constant 0.000000e+00 : f32
    %37 = vector.broadcast %cst_18 : f32 to vector<16x192xf32>
    %38 = arith.maximumf %36, %37 : vector<16x192xf32>
    %39 = arith.truncf %38 : vector<16x192xf32> to vector<16x192xbf16>
    %c0_19 = arith.constant 0 : index
    %c0_20 = arith.constant 0 : index
    %40 = vector.load %arg7[%c0_19, %c0_20] : memref<192x7xbf16, #tpu.memory_space<vmem>>, vector<192x7xbf16>
    %cst_21 = arith.constant dense<0.000000e+00> : vector<16x7xf32>
    %41 = tpu.matmul %39, %40, %cst_21 {dimension_numbers = #tpu.dot_dimension_numbers<[1], [0], [0], [1], [0, 0, 1, 1], [], []>} : vector<16x192xbf16>, vector<192x7xbf16>, vector<16x7xf32> -> vector<16x7xf32>
    %c0_22 = arith.constant 0 : index
    %c0_23 = arith.constant 0 : index
    %42 = vector.load %arg8[%c0_22, %c0_23] : memref<1x7xf32, #tpu.memory_space<vmem>>, vector<1x7xf32>
    %43 = vector.broadcast %42 : vector<1x7xf32> to vector<16x7xf32>
    %44 = arith.addf %41, %43 : vector<16x7xf32>
    %45 = vector.shape_cast %44 : vector<16x7xf32> to vector<4x4x7xf32>
    %c0_24 = arith.constant 0 : index
    %c0_25 = arith.constant 0 : index
    %c0_26 = arith.constant 0 : index
    %c0_27 = arith.constant 0 : index
    %46 = vector.load %arg9[%c0_24, %c0_25, %c0_26, %c0_27] : memref<1x4x4x7xf32, #tpu.memory_space<vmem>>, vector<1x4x4x7xf32>
    %47 = vector.shape_cast %46 : vector<1x4x4x7xf32> to vector<4x4x7xf32>
    %48 = vector.shape_cast %45 : vector<4x4x7xf32> to vector<1x4x4x7xf32>
    tpu.vector_store %arg9[%c0_24, %c0_25, %c0_26, %c0_27], %48 {strides = array<i32>} : memref<1x4x4x7xf32, #tpu.memory_space<vmem>>, vector<1x4x4x7xf32>,
    return
  }
  func.func @transform_0(%arg0: i32, %arg1: i32) -> (i32, i32, i32, i32) {
    %c0_i32 = arith.constant 0 : i32
    %c0_i32_0 = arith.constant 0 : i32
    %c0_i32_1 = arith.constant 0 : i32
    return %arg0, %arg1, %c0_i32, %c0_i32_0 : i32, i32, i32, i32
  }
  func.func @transform_1(%arg0: i32, %arg1: i32) -> (i32, i32, i32, i32) {
    %c4_i32 = arith.constant 4 : i32
    %0 = arith.muli %arg1, %c4_i32 : i32
    %c1_i32 = arith.constant 1 : i32
    %1 = arith.subi %0, %c1_i32 : i32
    %c0_i32 = arith.constant 0 : i32
    %2 = arith.maxsi %1, %c0_i32 : i32
    %c0_i32_0 = arith.constant 0 : i32
    %c0_i32_1 = arith.constant 0 : i32
    %c0_i32_2 = arith.constant 0 : i32
    return %arg0, %2, %c0_i32_0, %c0_i32_1 : i32, i32, i32, i32
  }
  func.func @transform_2(%arg0: i32, %arg1: i32) -> (i32, i32, i32, i32) {
    %c4_i32 = arith.constant 4 : i32
    %0 = arith.muli %arg1, %c4_i32 : i32
    %c4_i32_0 = arith.constant 4 : i32
    %1 = arith.addi %0, %c4_i32_0 : i32
    %c3_i32 = arith.constant 3 : i32
    %2 = arith.minsi %1, %c3_i32 : i32
    %c0_i32 = arith.constant 0 : i32
    %c0_i32_1 = arith.constant 0 : i32
    %c0_i32_2 = arith.constant 0 : i32
    return %arg0, %2, %c0_i32, %c0_i32_1 : i32, i32, i32, i32
  }
  func.func @transform_3(%arg0: i32, %arg1: i32) -> (i32, i32) {
    %c0_i32 = arith.constant 0 : i32
    %c0_i32_0 = arith.constant 0 : i32
    %c0_i32_1 = arith.constant 0 : i32
    return %c0_i32, %c0_i32_0 : i32, i32
  }
  func.func @transform_4(%arg0: i32, %arg1: i32) -> (i32, i32) {
    %c0_i32 = arith.constant 0 : i32
    %c0_i32_0 = arith.constant 0 : i32
    %c0_i32_1 = arith.constant 0 : i32
    return %c0_i32, %c0_i32_0 : i32, i32
  }
  func.func @transform_5(%arg0: i32, %arg1: i32) -> (i32, i32) {
    %c0_i32 = arith.constant 0 : i32
    %c0_i32_0 = arith.constant 0 : i32
    %c0_i32_1 = arith.constant 0 : i32
    return %c0_i32, %c0_i32_0 : i32, i32
  }
  func.func @transform_6(%arg0: i32, %arg1: i32) -> (i32, i32) {
    %c0_i32 = arith.constant 0 : i32
    %c0_i32_0 = arith.constant 0 : i32
    %c0_i32_1 = arith.constant 0 : i32
    return %c0_i32, %c0_i32_0 : i32, i32
  }
  func.func @transform_7(%arg0: i32, %arg1: i32) -> (i32, i32, i32, i32) {
    %c0_i32 = arith.constant 0 : i32
    %c0_i32_0 = arith.constant 0 : i32
    %c0_i32_1 = arith.constant 0 : i32
    return %arg0, %arg1, %c0_i32, %c0_i32_0 : i32, i32, i32, i32
  }
}

</mosaic_0001>

<bundles_post_ra>
// kernel: hu_model_forward.4
= control target key start
LH: loop header
LB: loop body
LE: loop exit
PB: predicated region body
PF: predicated region fallthrough
CT: control target
= control target key end

     0   :  { %s1890_s18 = smov 0   ;;  %s1892_s19 = smov 0   ;;  %s2423_s0 = inlined_call_operand.vmem [shape: bf16[2,16,9,6], index: 0, kind: input, shape index: {}, may-alias: {0,1,2}]   ;;  %s2424_s1 = inlined_call_operand.vmem [shape: bf16[2,16,9,6], index: 1, kind: input, shape index: {}, may-alias: {0,1,2}]   ;;  %s2425_s2 = inlined_call_operand.vmem [shape: bf16[2,16,9,6], index: 2, kind: input, shape index: {}, may-alias: {0,1,2}]   ;;  %s2426_s3 = inlined_call_operand.vmem [shape: bf16[36,128], index: 3, kind: input, shape index: {}]   ;;  %s2427_s4 = inlined_call_operand.vmem [shape: f32[1,128], index: 4, kind: input, shape index: {}]   ;;  %s2428_s5 = inlined_call_operand.vmem [shape: bf16[2,16,10,128], index: 5, kind: output, shape index: {}]  }
   0x1   :  { %s1894_s20 = smov 0  }
   0x2 LB: > { %s27_s1 = sadd.s32 1, %s1848_s19  ;;  %p1615_p0 = scmp.ge.s32.totalorder %s1852_s20, 1  ;;  %s1852_s20 = sphi %s1894_s20, %s15_s20   ;;  %s1848_s19 = sphi %s1892_s19, %s2436_s19   ;;  %s1844_s18 = sphi %s1890_s18, %s2435_s18  }
   0x3   : > { %p29_p1 = scmp.ge.s32.totalorder %s27_s1, 2  ;;  %p273_p2 = scmp.lt.s32.totalorder %s1852_s20, 3 }
   0x5   : > { %s2438_s1 = smov (%p29_p1, %s27_s1), 0  ;;  %p274_p3 = pnand %p1615_p0, %p273_p2 }
   0x6   : > { %p338_p4 = scmp.lt.s32.totalorder (!%p274_p3), %s1844_s18, 1  ;;  %vm438_vm0 = vsmask.f32 (!%p274_p3), 3328  ;;  %vm439_vm1 = vsmask.f32 (!%p274_p3), 7440  ;;  %v1854_v0 = vmov (!%p274_p3), 0  }
   0x7   : > { %277 = sbr.rel (%p274_p3) target bundleno = 464 (0x1d0), region = 40  ;;  %v444_v1 = vrot.slane (!%p274_p3), %v1854_v0, 4  ;;  %v447_v2 = vrot.slane (!%p274_p3), %v1854_v0, 5  ;;  %s1855_s24 = smov (!%p274_p3), 12   ;;  %vm1978_vm2 = vmor (!%p274_p3), %vm438_vm0, %vm439_vm1  ;;  %vm998_vm3 = vcmask (!%p274_p3), 1041408   ;;  %vm861_vm4 = vcmask (!%p274_p3), 48128  }
   0x8   : > { %s1856_s25 = smov (!%p274_p3), 6   ;;  %s1857_s28 = smov (!%p274_p3), 18   ;;  %vm903_vm5 = vcmask (!%p274_p3), 146432   ;;  %vm886_vm6 = vcmask (!%p274_p3), 97280   ;;  %vm920_vm7 = vcmask (!%p274_p3), 195584   ;;  %vm937_vm8 = vcmask (!%p274_p3), 244736  }
   0x9   : > { %v448_v20 = vor.u32 (!%p274_p3), %v447_v2, %v444_v1  ;;  %s1858_s6 = smov (!%p274_p3), 24   ;;  %s1859_s7 = smov (!%p274_p3), 30   ;;  %vm981_vm9 = vcmask (!%p274_p3), 293888   ;;  %vm1291_vm10 = vcmask (!%p274_p3), 1040384   ;;  %vm1292_vm11 = vsmask.f32 (!%p274_p3), 256 }
   0xa   : > { %vm1310_vm12 = vcmask (!%p274_p3), 1044480   ;;  %vm1311_vm13 = vsmask.f32 (!%p274_p3), 4352  ;;  %vm2283_vm14 = vmand (!%p274_p3), %vm1291_vm10, %vm1292_vm11 }
   0xb   : > { %v449_v48 = vrot.slane (!%p274_p3), %v448_v20, 4  ;;  %vm2289_vm15 = vmand (!%p274_p3), %vm1310_vm12, %vm1311_vm13 }
   0xd   : > { %v1988_v58 = vsel (!%p274_p3), %vm1978_vm2, %v449_v48, %v447_v2 }
   0xe   : > { %s2440_s18 = smov (!%p338_p4, %s1844_s18), 1 }
   0xf   : > { %s1720_s2 = sshll.u32 %s2440_s18, 7 }
  0x10   : > { %s1916_s23 = scalar_lea.vmem %s2423_s0, %s1720_s2  ;;  %s2301_s14 = scalar_lea.vmem %s2428_s5, %s1720_s2 }
  0x11   : > { %v1921_v3 = vld [vmem:[%s1916_s23 + $0x40] sm:$0xf]  ;;  %v1924_v4 = vld [vmem:[%s1916_s23 + $0x48] sm:$0xf]  ;;  %v1943_v15 = vld [vmem:[%s1916_s23 + $0x50] sm:$0xf] }
  0x12   : > { %v1927_v5 = vld [vmem:[%s1916_s23] sm:$0xf]  ;;  %v582_v6 = vshrl.u32 %v1924_v4, 16  ;;  %v585_v7 = vshll.u32 %v1924_v4, 16  ;;  %v1644_v8 = vcombine.low %v1921_v3, %v1924_v4  ;;  %v568_v9 = vshrl.u32 %v1921_v3, 16 }
  0x13   : > { %v1935_v10 = vld [vmem:[%s1916_s23 + $0x8] sm:$0xf]  ;;  %v571_v11 = vshll.u32 %v1921_v3, 16  ;;  %v456_v18 = vshrl.u32 %v1927_v5, 16  ;;  %v1948_v19 = vld [vmem:[%s1916_s23 + $0x58] sm:$0xf] }
  0x14   : > { %v470_v12 = vshrl.u32 %v1935_v10, 16  ;;  %v473_v13 = vshll.u32 %v1935_v10, 16  ;;  %v1640_v14 = vcombine.low %v1927_v5, %v1935_v10  ;;  %v584_v16 = vrot.slane %v582_v6, 4  ;;  %791 = vrot.lane.b32.xlu1 %v1644_v8, %s1855_s24  ;;  %v1955_v25 = vld [vmem:[%s1916_s23 + $0x10] sm:$0xf] }
  0x15   : > { %v587_v17 = vrot.slane %v585_v7, 5  ;;  %v1950_v21 = vrot.slane %v568_v9, 4  ;;  %v459_v24 = vshll.u32 %v1927_v5, 16  ;;  %v1957_v26 = vrot.slane %v571_v11, 5  ;;  %v1962_v30 = vld [vmem:[%s1916_s23 + $0x18] sm:$0xf] }
  0x16   : > { %v472_v22 = vrot.slane %v470_v12, 4  ;;  %v475_v23 = vrot.slane %v473_v13, 5  ;;  %783 = vrot.lane.b32.xlu0 %v1640_v14, %s1855_s24  ;;  %v458_v27 = vrot.slane %v456_v18, 4  ;;  %v596_v28 = vshrl.u32 %v1943_v15, 16  ;;  %v409_v35 = vld [vmem:[%s1916_s23 + $0xc] sm:$0x1] }
  0x17   : > { %v599_v29 = vshll.u32 %v1943_v15, 16  ;;  %v461_v31 = vrot.slane %v459_v24, 5  ;;  %v610_v32 = vshrl.u32 %v1948_v19, 16  ;;  %v1645_v33 = vcombine.low %v1943_v15, %v1948_v19  ;;  %v411_v40 = vld [vmem:[%s1916_s23 + $0x14] sm:$0x1] }
  0x18   : > { %v484_v34 = vshrl.u32 %v1955_v25, 16  ;;  %v613_v36 = vshll.u32 %v1948_v19, 16  ;;  %v487_v37 = vshll.u32 %v1955_v25, 16  ;;  %v498_v38 = vshrl.u32 %v1962_v30, 16  ;;  %v407_v46 = vld [vmem:[%s1916_s23 + $0x4] sm:$0x1] }
  0x19   : > { %v1641_v39 = vcombine.low %v1955_v25, %v1962_v30  ;;  %793 = vrot.lane.b32.xlu1 %v1645_v33, %s1855_s24  ;;  %v476_v42 = vor.u32 %v475_v23, %v472_v22  ;;  %v479_v43 = vshll.u32 %v409_v35, 16  ;;  %v493_v45 = vshll.u32 %v411_v40, 16  ;;  %v425_v51 = vld [vmem:[%s1916_s23 + $0x4c] sm:$0x1]  ;;  %v427_v55 = vld [vmem:[%s1916_s23 + $0x54] sm:$0x1] }
  0x1a   : > { %v486_v44 = vrot.slane %v484_v34, 4  ;;  %v489_v47 = vrot.slane %v487_v37, 5  ;;  %v462_v49 = vor.u32 %v461_v31, %v458_v27  ;;  %v465_v50 = vshll.u32 %v407_v46, 16  ;;  %v1991_v61 = vld [vmem:[%s1916_s23 + $0x38] sm:$0xf] }
  0x1b   : > { %785 = vrot.lane.b32.xlu0 %v1641_v39, %s1855_s24  ;;  %v477_v52 = vrot.slane %v476_v42, 4  ;;  %v481_v53 = vrot.slane %v479_v43, 5  ;;  %v495_v54 = vrot.slane %v493_v45, 5  ;;  %v588_v56 = vor.u32 %v587_v17, %v584_v16  ;;  %v421_v7 = vld [vmem:[%s1916_s23 + $0x3c] sm:$0x1] }
  0x1c   : > { %v490_v57 = vor.u32 %v489_v47, %v486_v44  ;;  %v463_v59 = vrot.slane %v462_v49, 4  ;;  %v467_v60 = vrot.slane %v465_v50, 5  ;;  %v591_v1 = vshll.u32 %v425_v51, 16  ;;  %v423_v14 = vld [vmem:[%s1916_s23 + $0x44] sm:$0x1] }
  0x1d   : > { %v1995_v62 = vsel %vm1978_vm2, %v477_v52, %v481_v53  ;;  %v589_v63 = vrot.slane %v588_v56, 4  ;;  %v598_v6 = vrot.slane %v596_v28, 4  ;;  %v601_v11 = vrot.slane %v599_v29, 5  ;;  %v429_v31 = vld [vmem:[%s1916_s23 + $0x5c] sm:$0x1] }
  0x1e   : > { %v491_v8 = vrot.slane %v490_v57, 4  ;;  %v2000_v9 = vsel %vm1978_vm2, %v463_v59, %v467_v60  ;;  %v605_v2 = vshll.u32 %v427_v55, 16  ;;  %v593_v13 = vrot.slane %v591_v1, 5  ;;  %v413_v44 = vld [vmem:[%s1916_s23 + $0x1c] sm:$0x1] }
  0x1f   : > { %v1632_v12 = vcombine.low %v1988_v58, %v2000_v9  ;;  %v554_v16 = vshrl.u32 %v1991_v61, 16  ;;  %v557_v17 = vshll.u32 %v1991_v61, 16  ;;  %v602_v20 = vor.u32 %v601_v11, %v598_v6  ;;  %v2036_v53 = vld [vmem:[%s1916_s23 + $0x60] sm:$0xf] }
  0x20   : > { %v2009_v18 = vsel %vm1978_vm2, %v491_v8, %v495_v54  ;;  %v607_v22 = vrot.slane %v605_v2, 5  ;;  %v563_v23 = vshll.u32 %v421_v7, 16  ;;  %v501_v24 = vshll.u32 %v1962_v30, 16  ;;  %v2045_v57 = vld [vmem:[%s1916_s23 + $0x20] sm:$0xf] }
  0x21   : > { %v2014_v27 = vcombine.low %v1995_v62, %v2009_v18  ;;  %757 = vrot.lane.b32.xlu0 %v1632_v12, %s1856_s25  ;;  %v556_v28 = vrot.slane %v554_v16, 4  ;;  %v559_v29 = vrot.slane %v557_v17, 5  ;;  %v594_v33 = vsel %vm1978_vm2, %v589_v63, %v593_v13  ;;  %v1827_v63 = vld [vmem:[%s2426_s3] sm:$0xff]  }
  0x22   : > { %v603_v34 = vrot.slane %v602_v20, 4  ;;  %v574_v35 = vor.u32 %v1957_v26, %v1950_v21  ;;  %v577_v37 = vshll.u32 %v423_v14, 16  ;;  %v565_v40 = vrot.slane %v563_v23, 5  ;;  %v431_v13 = vld [vmem:[%s1916_s23 + $0x64] sm:$0x1]  ;;  %1752 = vmatprep.subr.bf16.mxu0 %v1827_v63  ;;  %1774 = vmatprep.subr.bf16.mxu1 %v1827_v63 }
  0x23   : > { %759 = vrot.lane.b32.xlu1 %v2014_v27, %s1856_s25  ;;  %v560_v39 = vor.u32 %v559_v29, %v556_v28  ;;  %v612_v42 = vrot.slane %v610_v32, 4  ;;  %v615_v43 = vrot.slane %v613_v36, 5  ;;  %v619_v48 = vshll.u32 %v429_v31, 16  ;;  %v2069_v20 = vld [vmem:[%s1916_s23 + $0x68] sm:$0xf]  ;;  %1753 = vmatpush3.bf16.msra.mxu0 %v1827_v63 }
  0x24   : > { %v608_v45 = vsel %vm1978_vm2, %v603_v34, %v607_v22  ;;  %v575_v46 = vrot.slane %v574_v35, 4  ;;  %v579_v47 = vrot.slane %v577_v37, 5  ;;  %v500_v50 = vrot.slane %v498_v38, 4  ;;  %1777 = vmatpush3.bf16.msra.mxu1 %v1827_v63  ;;  %v2079_v28 = vld [vmem:[%s1916_s23 + $0x70] sm:$0xf] }
  0x25   : > { %v2029_v21 = vcombine.low %v594_v33, %v608_v45  ;;  %v561_v26 = vrot.slane %v560_v39, 4  ;;  %v616_v49 = vor.u32 %v615_v43, %v612_v42  ;;  %v621_v32 = vrot.slane %v619_v48, 5  ;;  %v417_v63 = vld [vmem:[%s1916_s23 + $0x2c] sm:$0x1] }
  0x26   : > { %v580_v51 = vsel %vm1978_vm2, %v575_v46, %v579_v47  ;;  %v503_v36 = vrot.slane %v501_v24, 5  ;;  %v507_v52 = vshll.u32 %v413_v44, 16  ;;  %v624_v6 = vshrl.u32 %v2036_v53, 16 }
  0x27   : > { %767 = vrot.lane.b32.xlu1 %v2029_v21, %s1856_s25  ;;  %v2042_v54 = vsel %vm1978_vm2, %v561_v26, %v565_v40  ;;  %v1652_v55 = vcombine.low %v580_v51, %v594_v33  ;;  %v617_v56 = vrot.slane %v616_v49, 4  ;;  %v627_v7 = vshll.u32 %v2036_v53, 16  ;;  %v415_v33 = vld [vmem:[%s1916_s23 + $0x24] sm:$0x1] }
  0x28   : > { %v2048_v38 = vcombine.low %v2042_v54, %v580_v51  ;;  %v504_v59 = vor.u32 %v503_v36, %v500_v50  ;;  %v509_v60 = vrot.slane %v507_v52, 5  ;;  %v1648_v8 = vcombine.low %v2000_v9, %v1995_v62  ;;  %v1828_v9 = vld [vmem:[%s2426_s3 + $0x8] sm:$0xff]  }
  0x29   : > { %v2055_v1 = vsel %vm1978_vm2, %v617_v56, %v621_v32  ;;  %v512_v2 = vshrl.u32 %v2045_v57, 16  ;;  %v515_v12 = vshll.u32 %v2045_v57, 16  ;;  %v626_v16 = vrot.slane %v624_v6, 4  ;;  %1754 = vmatprep.subr.bf16.mxu0 %v1828_v9  ;;  %1775 = vmatprep.subr.bf16.mxu1 %v1828_v9 }
  0x2a   : > { %765 = vrot.lane.b32.xlu0 %v2048_v38, %s1856_s25  ;;  %v505_v11 = vrot.slane %v504_v59, 4  ;;  %v1653_v14 = vcombine.low %v608_v45, %v2055_v1  ;;  %v629_v17 = vrot.slane %v627_v7, 5  ;;  %v633_v22 = vshll.u32 %v431_v13, 16  ;;  %1755 = vmatpush3.bf16.msra.mxu0 %v1828_v9  ;;  %v2102_v45 = vld [vmem:[%s1916_s23 + $0x30] sm:$0xf] }
  0x2b   : > { %816 = vrot.lane.b32.xlu1 %v1652_v55, %s1857_s28  ;;  %v514_v23 = vrot.slane %v512_v2, 4  ;;  %v517_v24 = vrot.slane %v515_v12, 5  ;;  %v638_v34 = vshrl.u32 %v2069_v20, 16  ;;  %v641_v35 = vshll.u32 %v2069_v20, 16  ;;  %1778 = vmatpush3.bf16.msra.mxu1 %v1828_v9  ;;  %v419_v12 = vld [vmem:[%s1916_s23 + $0x34] sm:$0x1] }
  0x2c   : > { %v2073_v62 = vsel %vm1978_vm2, %v505_v11, %v509_v60  ;;  %v630_v31 = vor.u32 %v629_v17, %v626_v16  ;;  %v2090_v37 = vcombine.low %v1924_v4, %v1943_v15  ;;  %v652_v39 = vshrl.u32 %v2079_v28, 16 }
  0x2d   : > { %v1649_v29 = vcombine.low %v2009_v18, %v2073_v62  ;;  %v655_v40 = vshll.u32 %v2079_v28, 16  ;;  %v2095_v18 = vld [vmem:[%s1916_s23 + $0x28] sm:$0xf]  ;;  %v2099_v42 = vcombine.low %v1935_v10, %v1955_v25  ;;  %v635_v43 = vrot.slane %v633_v22, 5  ;;  %v433_v10 = vld [vmem:[%s1916_s23 + $0x6c] sm:$0x1] }
  0x2e   : > { %808 = vrot.lane.b32.xlu0 %v1648_v8, %s1857_s28  ;;  %v521_v44 = vshll.u32 %v415_v33, 16  ;;  %v631_v4 = vrot.slane %v630_v31, 4  ;;  %v518_v15 = vor.u32 %v517_v24, %v514_v23  ;;  %v640_v46 = vrot.slane %v638_v34, 4  ;;  %v1829_v33 = vld [vmem:[%s2426_s3 + $0x10] ss:$0 sps:$4 sm:$0x33]  }
  0x2f   : > { %818 = vrot.lane.b32.xlu1 %v1653_v14, %s1857_s28  ;;  %v643_v47 = vrot.slane %v641_v35, 5  ;;  %v2109_v48 = vcombine.low %v1948_v19, %v2036_v53  ;;  %v526_v25 = vshrl.u32 %v2095_v18, 16  ;;  %v529_v26 = vshll.u32 %v2095_v18, 16  ;;  %v435_v19 = vld [vmem:[%s1916_s23 + $0x74] sm:$0x1]  ;;  %1780 = vmatprep.subr.msk.bf16.mxu0 %vm998_vm3, %v1829_v33 }
  0x30   : > { %v654_v49 = vrot.slane %v652_v39, 4  ;;  %v657_v50 = vrot.slane %v655_v40, 5  ;;  %v540_v51 = vshrl.u32 %v2102_v45, 16  ;;  %v543_v32 = vshll.u32 %v2102_v45, 16  ;;  %1781 = vmatprep.subr.msk.bf16.mxu1 %vm998_vm3, %v1829_v33 }
  0x31   : > { %v2118_v36 = vcombine.low %v1962_v30, %v2045_v57  ;;  %v523_v52 = vrot.slane %v521_v44, 5  ;;  %v2125_v55 = vsel %vm1978_vm2, %v631_v4, %v635_v43  ;;  %v519_v56 = vrot.slane %v518_v15, 4 }
  0x32   : > { %810 = vrot.lane.b32.xlu0 %v1649_v29, %s1857_s28  ;;  %v644_v59 = vor.u32 %v643_v47, %v640_v46  ;;  %v647_v60 = vshll.u32 %v433_v10, 16  ;;  %v528_v6 = vrot.slane %v526_v25, 4  ;;  %v531_v30 = vrot.slane %v529_v26, 5  ;;  %v437_v26 = vld [vmem:[%s1916_s23 + $0x7c] sm:$0x1] }
  0x33   : > { %835 = vrot.lane.b32.xlu1 %v2090_v37, %s1858_s6  ;;  %v542_v7 = vrot.slane %v540_v51, 4  ;;  %v545_v8 = vrot.slane %v543_v32, 5  ;;  %v658_v11 = vor.u32 %v657_v50, %v654_v49  ;;  %v661_v2 = vshll.u32 %v435_v19, 16 }
  0x34   : > { %v1638_v13 = vcombine.low %v2055_v1, %v2125_v55  ;;  %v645_v14 = vrot.slane %v644_v59, 4  ;;  %v649_v16 = vrot.slane %v647_v60, 5  ;;  %v535_v17 = vshll.u32 %v417_v63, 16  ;;  %v436_v1 = vld [vmem:[%s1916_s23 + $0x78] sm:$0xf] }
  0x35   : > { %v524_v9 = vsel %vm1978_vm2, %v519_v56, %v523_v52  ;;  %v532_v22 = vor.u32 %v531_v30, %v528_v6  ;;  %v546_v23 = vor.u32 %v545_v8, %v542_v7  ;;  %v549_v24 = vshll.u32 %v419_v12, 16 }
  0x36   : > { %827 = vrot.lane.b32.xlu0 %v2099_v42, %s1858_s6  ;;  %v659_v29 = vrot.slane %v658_v11, 4  ;;  %v663_v31 = vrot.slane %v661_v2, 5  ;;  %v2145_v34 = vcombine.low %v1991_v61, %v1921_v3  ;;  %v1634_v35 = vcombine.low %v2073_v62, %v524_v9 }
  0x37   : > { %837 = vrot.lane.b32.xlu1 %v2109_v48, %s1858_s6  ;;  %v650_v39 = vsel %vm1978_vm2, %v645_v14, %v649_v16  ;;  %v537_v40 = vrot.slane %v535_v17, 5  ;;  %v533_v43 = vrot.slane %v532_v22, 4  ;;  %v547_v44 = vrot.slane %v546_v23, 4 }
  0x38   : > { %v551_v4 = vrot.slane %v549_v24, 5  ;;  %v664_v3 = vsel %vm1978_vm2, %v659_v29, %v663_v31  ;;  %v669_v15 = vshll.u32 %v436_v1, 16  ;;  %v1646_v50 = vcombine.low %v2036_v53, %v2069_v20 }
  0x39   : > { %v1639_v62 = vcombine.low %v650_v39, %v664_v3  ;;  %v538_v46 = vsel %vm1978_vm2, %v533_v43, %v537_v40  ;;  %v675_v32 = vshll.u32 %v437_v26, 16  ;;  %v1642_v52 = vcombine.low %v2045_v57, %v2095_v18 }
  0x3a   : > { %829 = vrot.lane.b32.xlu0 %v2118_v36, %s1858_s6  ;;  %v552_v47 = vsel %vm1978_vm2, %v547_v44, %v551_v4  ;;  %v671_v25 = vrot.slane %v669_v15, 5  ;;  %v1647_v19 = vcombine.low %v2079_v28, %v436_v1  ;;  %v1643_v60 = vcombine.low %v2102_v45, %v1991_v61 }
  0x3b   : > { %853 = vrot.lane.b32.xlu1 %v2029_v21, %s1859_s7  ;;  %v2149_v21 = vcombine.low %v1854_v0, %v1927_v5  ;;  %v666_v5 = vshrl.u32 %v436_v1, 16  ;;  %v1635_v49 = vcombine.low %v538_v46, %v552_v47  ;;  %v677_v59 = vrot.slane %v675_v32, 5 }
  0x3c   : > { %v1654_v53 = vcombine.low %v2125_v55, %v650_v39  ;;  %v1650_v57 = vcombine.low %v524_v9, %v538_v46  ;;  %v1651_v30 = vcombine.low %v552_v47, %v2042_v54  ;;  %v2189_v61 = vcombine.low %v2069_v20, %v2079_v28 }
  0x3d   : > { %v668_v10 = vrot.slane %v666_v5, 4  ;;  %v2194_v41 = vcombine.low %v2095_v18, %v2102_v45  ;;  %v1656_v55 = vcombine.low %v436_v1, %v1854_v0 }
  0x3e   : > { %845 = vrot.lane.b32.xlu0 %v2014_v27, %s1859_s7  ;;  %v1000_v27 = vsel %vm998_vm3, %v1829_v33, 0 }
  0x3f   : > { %855 = vrot.lane.b32.xlu1 %v1638_v13, %s1859_s7  ;;  %1757 = vmatpush3.bf16.msra.mxu0 %v1000_v27  ;;  %v672_v51 = vor.u32 %v671_v25, %v668_v10 }
  0x40   : > { %1779 = vmatpush3.bf16.msra.mxu1 %v1000_v27 }
  0x41   : > { %v673_v56 = vrot.slane %v672_v51, 4 }
  0x42   : > { %847 = vrot.lane.b32.xlu0 %v1634_v35, %s1859_s7 }
  0x43   : > { %769 = vrot.lane.b32.xlu1 %v1638_v13, %s1856_s25  ;;  %v678_v63 = vsel %vm1978_vm2, %v673_v56, %v677_v59 }
  0x44   : > { %v1655_v6 = vcombine.low %v664_v3, %v678_v63  ;;  %v1657_v54 = vcombine.low %v678_v63, %v1988_v58 }
  0x46   : > { %761 = vrot.lane.b32.xlu0 %v1634_v35, %s1856_s25 }
  0x47   : > { %771 = vrot.lane.b32.xlu1 %v1639_v62, %s1856_s25 }
  0x4a   : > { %763 = vrot.lane.b32.xlu0 %v1635_v49, %s1856_s25 }
  0x4b   : > { %795 = vrot.lane.b32.xlu1 %v1646_v50, %s1855_s24 }
  0x4e   : > { %787 = vrot.lane.b32.xlu0 %v1642_v52, %s1855_s24 }
  0x4f   : > { %797 = vrot.lane.b32.xlu1 %v1647_v19, %s1855_s24 }
  0x52   : > { %789 = vrot.lane.b32.xlu0 %v1643_v60, %s1855_s24 }
  0x53   : > { %820 = vrot.lane.b32.xlu1 %v1654_v53, %s1857_s28 }
  0x56   : > { %812 = vrot.lane.b32.xlu0 %v1650_v57, %s1857_s28 }
  0x57   : > { %822 = vrot.lane.b32.xlu1 %v1655_v6, %s1857_s28 }
  0x5a   : > { %814 = vrot.lane.b32.xlu0 %v1651_v30, %s1857_s28 }
  0x5b   : > { %839 = vrot.lane.b32.xlu1 %v2189_v61, %s1858_s6 }
  0x5e   : > { %831 = vrot.lane.b32.xlu0 %v2194_v41, %s1858_s6 }
  0x5f   : > { %841 = vrot.lane.b32.xlu1 %v1656_v55, %s1858_s6 }
  0x62   : > { %833 = vrot.lane.b32.xlu0 %v2145_v34, %s1858_s6 }
  0x63   : > { %857 = vrot.lane.b32.xlu1 %v1639_v62, %s1859_s7 }
  0x66   : > { %849 = vrot.lane.b32.xlu0 %v1635_v49, %s1859_s7 }
  0x67   : > { %859 = vrot.lane.b32.xlu1 %v1657_v54, %s1859_s7 }
  0x6a   : > { %851 = vrot.lane.b32.xlu0 %v2048_v38, %s1859_s7 }
  0x86   : > { %v792_v0 = vpop.permute.xlu1 %791 }
  0x88   : > { %v784_v20 = vpop.permute.xlu0 %783 }
  0x8b   : > { %v794_v28 = vpop.permute.xlu1 %793 }
  0x8d   : > { %v786_v18 = vpop.permute.xlu0 %785 }
  0x93   : > { %v758_v7 = vpop.permute.xlu0 %757 }
  0x94   : > { %v864_v9 = vsel %vm861_vm4, %v2149_v21, %v758_v7 }
  0x95   : > { %v760_v45 = vpop.permute.xlu1 %759  ;;  %v888_v1 = vsel %vm886_vm6, %v864_v9, %v784_v20  ;;  %v2269_v9 = vld [vmem:[%s2427_s4] ss:$0 sm:$0xff] }
  0x96   : > { %v867_v21 = vsel %vm861_vm4, %v2099_v42, %v760_v45 }
  0x97   : > { %v890_v5 = vsel %vm886_vm6, %v867_v21, %v786_v18 }
  0x99   : > { %v768_v8 = vpop.permute.xlu1 %767 }
  0x9a   : > { %v879_v23 = vsel %vm861_vm4, %v2090_v37, %v768_v8 }
  0x9b   : > { %v898_v39 = vsel %vm886_vm6, %v879_v23, %v794_v28 }
  0x9c   : > { %v766_v11 = vpop.permute.xlu0 %765 }
  0x9d   : > { %v817_v2 = vpop.permute.xlu1 %816  ;;  %v876_v16 = vsel %vm861_vm4, %v2145_v34, %v766_v11 }
  0x9e   : > { %v896_v22 = vsel %vm886_vm6, %v876_v16, %v792_v0 }
  0x9f   : > { %v913_v24 = vsel %vm903_vm5, %v896_v22, %v817_v2 }
  0xa0   : > { %v809_v12 = vpop.permute.xlu0 %808 }
  0xa1   : > { %v819_v13 = vpop.permute.xlu1 %818  ;;  %v905_v35 = vsel %vm903_vm5, %v888_v1, %v809_v12 }
  0xa2   : > { %v915_v37 = vsel %vm903_vm5, %v898_v39, %v819_v13 }
  0xa4   : > { %v811_v14 = vpop.permute.xlu0 %810 }
  0xa5   : > { %v836_v58 = vpop.permute.xlu1 %835  ;;  %v907_v15 = vsel %vm903_vm5, %v890_v5, %v811_v14 }
  0xa6   : > { %v930_v31 = vsel %vm920_vm7, %v913_v24, %v836_v58 }
  0xa8   : > { %v828_v17 = vpop.permute.xlu0 %827 }
  0xa9   : > { %v838_v38 = vpop.permute.xlu1 %837  ;;  %v922_v40 = vsel %vm920_vm7, %v905_v35, %v828_v17 }
  0xaa   : > { %v932_v44 = vsel %vm920_vm7, %v915_v37, %v838_v38 }
  0xac   : > { %v830_v29 = vpop.permute.xlu0 %829 }
  0xad   : > { %v854_v33 = vpop.permute.xlu1 %853  ;;  %v924_v27 = vsel %vm920_vm7, %v907_v15, %v830_v29 }
  0xae   : > { %v947_v34 = vsel %vm937_vm8, %v930_v31, %v854_v33 }
  0xaf   : > { %1766 = vmatprep.mubr.msk.bf16.mxu1 %vm981_vm9, %v947_v34 }
  0xb0   : > { %v846_v43 = vpop.permute.xlu0 %845 }
  0xb1   : > { %v939_v4 = vsel %vm937_vm8, %v922_v40, %v846_v43  ;;  %v856_v3 = vpop.permute.xlu1 %855 }
  0xb2   : > { %1758 = vmatprep.mubr.msk.bf16.mxu0 %vm981_vm9, %v939_v4  ;;  %v949_v42 = vsel %vm937_vm8, %v932_v44, %v856_v3 }
  0xb3   : > { %1767 = vmatmul.mubr.msk.bf16.vlgmr.msra.gmra.mrb[0].mxu1 %vm981_vm9, %v949_v42 }
  0xb4   : > { %v848_v62 = vpop.permute.xlu0 %847 }
  0xb5   : > { %v941_v46 = vsel %vm937_vm8, %v924_v27, %v848_v62  ;;  %v770_v47 = vpop.permute.xlu1 %769 }
  0xb6   : > { %1759 = vmatmul.mubr.msk.bf16.vlgmr.msra.gmra.mrb[0].mxu0 %vm981_vm9, %v941_v46  ;;  %v882_v57 = vsel %vm861_vm4, %v2109_v48, %v770_v47 }
  0xb8   : > { %v762_v10 = vpop.permute.xlu0 %761 }
  0xb9   : > { %v772_v25 = vpop.permute.xlu1 %771  ;;  %v870_v54 = vsel %vm861_vm4, %v2118_v36, %v762_v10 }
  0xba   : > { %v885_v28 = vsel %vm861_vm4, %v2189_v61, %v772_v25 }
  0xbc   : > { %v764_v26 = vpop.permute.xlu0 %763 }
  0xbd   : > { %v796_v49 = vpop.permute.xlu1 %795  ;;  %v873_v2 = vsel %vm861_vm4, %v2194_v41, %v764_v26 }
  0xbe   : > { %v900_v6 = vsel %vm886_vm6, %v882_v57, %v796_v49 }
  0xc0   : > { %v788_v50 = vpop.permute.xlu0 %787 }
  0xc1   : > { %v798_v51 = vpop.permute.xlu1 %797  ;;  %v892_v18 = vsel %vm886_vm6, %v870_v54, %v788_v50 }
  0xc2   : > { %v902_v48 = vsel %vm886_vm6, %v885_v28, %v798_v51 }
  0xc4   : > { %v790_v32 = vpop.permute.xlu0 %789 }
  0xc5   : > { %v821_v52 = vpop.permute.xlu1 %820  ;;  %v894_v14 = vsel %vm886_vm6, %v873_v2, %v790_v32 }
  0xc6   : > { %v917_v30 = vsel %vm903_vm5, %v900_v6, %v821_v52 }
  0xc8   : > { %v813_v19 = vpop.permute.xlu0 %812 }
  0xc9   : > { %v823_v56 = vpop.permute.xlu1 %822  ;;  %v909_v7 = vsel %vm903_vm5, %v892_v18, %v813_v19 }
  0xca   : > { %v919_v8 = vsel %vm903_vm5, %v902_v48, %v823_v56 }
  0xcc   : > { %v815_v59 = vpop.permute.xlu0 %814 }
  0xcd   : > { %v840_v60 = vpop.permute.xlu1 %839  ;;  %v911_v16 = vsel %vm903_vm5, %v894_v14, %v815_v59 }
  0xce   : > { %v934_v0 = vsel %vm920_vm7, %v917_v30, %v840_v60 }
  0xd0   : > { %v832_v53 = vpop.permute.xlu0 %831 }
  0xd1   : > { %v842_v63 = vpop.permute.xlu1 %841  ;;  %v926_v36 = vsel %vm920_vm7, %v909_v7, %v832_v53 }
  0xd2   : > { %v936_v61 = vsel %vm920_vm7, %v919_v8, %v842_v63 }
  0xd4   : > { %v834_v55 = vpop.permute.xlu0 %833 }
  0xd5   : > { %v858_v20 = vpop.permute.xlu1 %857  ;;  %v928_v17 = vsel %vm920_vm7, %v911_v16, %v834_v55 }
  0xd6   : > { %v951_v45 = vsel %vm937_vm8, %v934_v0, %v858_v20 }
  0xd7   : > { %1770 = vmatprep.mubr.msk.bf16.mxu1 %vm981_vm9, %v951_v45 }
  0xd8   : > { %v850_v11 = vpop.permute.xlu0 %849 }
  0xd9   : > { %v943_v12 = vsel %vm937_vm8, %v926_v36, %v850_v11  ;;  %v860_v13 = vpop.permute.xlu1 %859 }
  0xda   : > { %1762 = vmatprep.mubr.msk.bf16.mxu0 %vm981_vm9, %v943_v12  ;;  %v953_v58 = vsel %vm937_vm8, %v936_v61, %v860_v13 }
  0xdb   : > { %1771 = vmatmul.mubr.msk.bf16.gmra.mrb[4].mxu1 %vm981_vm9, %v953_v58 }
  0xdc   : > { %v852_v38 = vpop.permute.xlu0 %851 }
  0xdd   : > { %v945_v41 = vsel %vm937_vm8, %v928_v17, %v852_v38 }
  0xde   : > { %1763 = vmatmul.mubr.msk.bf16.gmra.mrb[4].mxu0 %vm981_vm9, %v945_v41 }
 0x186   : > { %v1768_v22 = vpop.f32.mrb[0].mxu1 }
 0x187   : > { %v1077_v23 = vadd.f32 %v1768_v22, %v2269_v9  ;;  %v1068_v24 = vpop.f32.mrb[1].mxu1 }
 0x188   : > { %v1069_v29 = vadd.f32 %v2269_v9, %v1068_v24  ;;  %v1769_v31 = vpop.f32.mrb[2].mxu1 }
 0x189   : > { %v1760_v33 = vpop.f32.mrb[0].mxu0  ;;  %v1109_v1 = vmax.f32 %v1077_v23, 0.0  ;;  %v1080_v34 = vadd.f32 %v1769_v31, %v2269_v9  ;;  %v1071_v21 = vpop.f32.mrb[3].mxu1 }
 0x18a   : > { %v1045_v35 = vadd.f32 %v1760_v33, %v2269_v9  ;;  %v1036_v39 = vpop.f32.mrb[1].mxu0  ;;  %v1107_v37 = vmax.f32 %v1069_v29, 0.0  ;;  %v2276_v40 = vadd.f32 %v2269_v9, %v1071_v21 }
 0x18b   : > { %v1735_v43 = vpack.c.bf16 %v1109_v1, %v1109_v1  ;;  %v1037_v44 = vadd.f32 %v2269_v9, %v1036_v39  ;;  %v1761_v4 = vpop.f32.mrb[2].mxu0  ;;  %v1110_v3 = vmax.f32 %v1080_v34, 0.0 }
 0x18c   : > { %v1101_v5 = vmax.f32 %v1045_v35, 0.0  ;;  %v1733_v42 = vpack.c.bf16 %v1107_v37, %v1107_v37  ;;  %v1048_v15 = vadd.f32 %v1761_v4, %v2269_v9  ;;  %v1039_v27 = vpop.f32.mrb[3].mxu0  ;;  %v1108_v62 = vmax.f32 %v2276_v40, 0.0 }
 0x18d   : > { %v1234_v46 = vshrl.u32 %v1735_v43, 16  ;;  %v1237_v47 = vshll.u32 %v1735_v43, 16  ;;  %v1099_v10 = vmax.f32 %v1037_v44, 0.0  ;;  %v1736_v25 = vpack.c.bf16 %v1110_v3, %v1110_v3 }
 0x18e   : > { %v1727_v26 = vpack.c.bf16 %v1101_v5, %v1101_v5  ;;  %v1220_v49 = vshrl.u32 %v1733_v42, 16  ;;  %v1223_v50 = vshll.u32 %v1733_v42, 16  ;;  %v1102_v51 = vmax.f32 %v1048_v15, 0.0 }
 0x18f   : > { %v1236_v32 = vrot.slane %v1234_v46, 7  ;;  %v1725_v52 = vpack.c.bf16 %v1099_v10, %v1099_v10  ;;  %v1241_v19 = vshrl.u32 %v1736_v25, 16  ;;  %v1244_v56 = vshll.u32 %v1736_v25, 16 }
 0x190   : > { %v1178_v59 = vshrl.u32 %v1727_v26, 16  ;;  %v1181_v60 = vshll.u32 %v1727_v26, 16  ;;  %v1222_v63 = vrot.slane %v1220_v49, 7  ;;  %v1728_v57 = vpack.c.bf16 %v1102_v51, %v1102_v51 }
 0x191   : > { %v1239_v30 = vor.u32 %v1237_v47, %v1236_v32  ;;  %v1164_v55 = vshrl.u32 %v1725_v52, 16  ;;  %v1167_v54 = vshll.u32 %v1725_v52, 16  ;;  %v1243_v0 = vrot.slane %v1241_v19, 7 }
 0x192   : > { %v1180_v20 = vrot.slane %v1178_v59, 7  ;;  %v1225_v28 = vor.u32 %v1223_v50, %v1222_v63  ;;  %v1185_v18 = vshrl.u32 %v1728_v57, 16  ;;  %v1188_v45 = vshll.u32 %v1728_v57, 16 }
 0x193   : > { %v1304_v48 = vsel %vm2283_vm14, 0, %v1239_v30  ;;  %v1166_v7 = vrot.slane %v1164_v55, 7  ;;  %v1246_v8 = vor.u32 %v1244_v56, %v1243_v0  ;;  %v1040_v36 = vadd.f32 %v2269_v9, %v1039_v27 }
 0x194   : > { %v1183_v11 = vor.u32 %v1181_v60, %v1180_v20  ;;  %v1323_v2 = vsel %vm2289_vm15, %v1304_v48, 0  ;;  %v1302_v61 = vsel %vm2283_vm14, 0, %v1225_v28  ;;  %v1187_v12 = vrot.slane %v1185_v18, 7 }
 0x195   : > { %v1706_v13 = vcombine.low %v1323_v2, %v1323_v2  ;;  %v1707_v14 = vcombine.high %v1323_v2, %v1323_v2  ;;  %v1169_v58 = vor.u32 %v1167_v54, %v1166_v7  ;;  %v1321_v16 = vsel %vm2289_vm15, %v1302_v61, 0 }
 0x196   : > { %v1296_v17 = vsel %vm2283_vm14, 0, %v1183_v11  ;;  %v1702_v38 = vcombine.low %v1321_v16, %v1321_v16  ;;  %v1703_v41 = vcombine.high %v1321_v16, %v1321_v16  ;;  %v1190_v22 = vor.u32 %v1188_v45, %v1187_v12 }
 0x197   : > { %v1315_v23 = vsel %vm2289_vm15, %v1296_v17, 0  ;;  %1461 = vst [vmem:[%s2301_s14 + $0x50] sm:$0xf] %v1706_v13  ;;  %1462 = vst [vmem:[%s2301_s14 + $0x54] sm:$0x1] %v1707_v14  ;;  %v1294_v24 = vsel %vm2283_vm14, 0, %v1169_v58  ;;  %v1734_v15 = vpack.c.bf16 %v1108_v62, %v1108_v62 }
 0x198   : > { %v1305_v29 = vsel %vm2283_vm14, 0, %v1246_v8  ;;  %v1100_v31 = vmax.f32 %v1040_v36, 0.0  ;;  %v1690_v33 = vcombine.low %v1315_v23, %v1315_v23  ;;  %v1691_v1 = vcombine.high %v1315_v23, %v1315_v23  ;;  %1457 = vst [vmem:[%s2301_s14 + $0x40] sm:$0xf] %v1702_v38  ;;  %1458 = vst [vmem:[%s2301_s14 + $0x44] sm:$0x1] %v1703_v41 }
 0x199   : > { %v1313_v34 = vsel %vm2289_vm15, %v1294_v24, 0  ;;  %v1297_v21 = vsel %vm2283_vm14, 0, %v1190_v22  ;;  %v1324_v43 = vsel %vm2289_vm15, %v1305_v29, 0  ;;  %v1227_v46 = vshrl.u32 %v1734_v15, 16 }
 0x19a   : > { %v1686_v35 = vcombine.low %v1313_v34, %v1313_v34  ;;  %v1687_v39 = vcombine.high %v1313_v34, %v1313_v34  ;;  %v1316_v37 = vsel %vm2289_vm15, %v1297_v21, 0  ;;  %1445 = vst [vmem:[%s2301_s14 + $0x10] sm:$0xf] %v1690_v33  ;;  %1446 = vst [vmem:[%s2301_s14 + $0x14] sm:$0x1] %v1691_v1  ;;  %v1708_v3 = vcombine.low %v1324_v43, %v1324_v43 }
 0x19b   : > { %v1692_v44 = vcombine.low %v1316_v37, %v1316_v37  ;;  %v1693_v4 = vcombine.high %v1316_v37, %v1316_v37  ;;  %v1709_v5 = vcombine.high %v1324_v43, %v1324_v43  ;;  %v1726_v42 = vpack.c.bf16 %v1100_v31, %v1100_v31 }
 0x19c   : > { %1441 = vst [vmem:[%s2301_s14] sm:$0xf] %v1686_v35  ;;  %1442 = vst [vmem:[%s2301_s14 + $0x4] sm:$0x1] %v1687_v39  ;;  %v1229_v25 = vrot.slane %v1227_v46, 7  ;;  %v1230_v26 = vshll.u32 %v1734_v15, 16 }
 0x19d   : > { %1447 = vst [vmem:[%s2301_s14 + $0x18] sm:$0xf] %v1692_v44  ;;  %1448 = vst [vmem:[%s2301_s14 + $0x1c] sm:$0x1] %v1693_v4  ;;  %v1171_v27 = vshrl.u32 %v1726_v42, 16  ;;  %v1174_v10 = vshll.u32 %v1726_v42, 16 }
 0x19e   : > { %1463 = vst [vmem:[%s2301_s14 + $0x58] sm:$0xf] %v1708_v3  ;;  %1464 = vst [vmem:[%s2301_s14 + $0x5c] sm:$0x1] %v1709_v5  ;;  %v1232_v50 = vor.u32 %v1230_v26, %v1229_v25 }
 0x19f   : > { %v1173_v47 = vrot.slane %v1171_v27, 7 }
 0x1a0   : > { %v1303_v62 = vsel %vm2283_vm14, 0, %v1232_v50 }
 0x1a1   : > { %v1176_v49 = vor.u32 %v1174_v10, %v1173_v47  ;;  %v1322_v32 = vsel %vm2289_vm15, %v1303_v62, 0 }
 0x1a2   : > { %v1704_v56 = vcombine.low %v1322_v32, %v1322_v32  ;;  %v1705_v59 = vcombine.high %v1322_v32, %v1322_v32 }
 0x1a3   : > { %v1295_v40 = vsel %vm2283_vm14, 0, %v1176_v49 }
 0x1a4   : > { %v1314_v51 = vsel %vm2289_vm15, %v1295_v40, 0  ;;  %1459 = vst [vmem:[%s2301_s14 + $0x48] sm:$0xf] %v1704_v56  ;;  %1460 = vst [vmem:[%s2301_s14 + $0x4c] sm:$0x1] %v1705_v59 }
 0x1a5   : > { %v1688_v52 = vcombine.low %v1314_v51, %v1314_v51  ;;  %v1689_v19 = vcombine.high %v1314_v51, %v1314_v51 }
 0x1a7   : > { %1443 = vst [vmem:[%s2301_s14 + $0x8] sm:$0xf] %v1688_v52  ;;  %1444 = vst [vmem:[%s2301_s14 + $0xc] sm:$0x1] %v1689_v19 }
 0x1ae   : > { %v1772_v60 = vpop.f32.mrb[4].mxu1 }
 0x1af   : > { %v1093_v63 = vadd.f32 %v1772_v60, %v2269_v9  ;;  %v1084_v57 = vpop.f32.mrb[5].mxu1 }
 0x1b0   : > { %v1085_v30 = vadd.f32 %v2269_v9, %v1084_v57  ;;  %v1773_v55 = vpop.f32.mrb[6].mxu1 }
 0x1b1   : > { %v1764_v54 = vpop.f32.mrb[4].mxu0  ;;  %v1113_v0 = vmax.f32 %v1093_v63, 0.0  ;;  %v1096_v20 = vadd.f32 %v1773_v55, %v2269_v9  ;;  %v1087_v28 = vpop.f32.mrb[7].mxu1 }
 0x1b2   : > { %v1061_v18 = vadd.f32 %v1764_v54, %v2269_v9  ;;  %v1052_v45 = vpop.f32.mrb[5].mxu0  ;;  %v1111_v48 = vmax.f32 %v1085_v30, 0.0  ;;  %v2357_v7 = vadd.f32 %v2269_v9, %v1087_v28 }
 0x1b3   : > { %v1739_v8 = vpack.c.bf16 %v1113_v0, %v1113_v0  ;;  %v1053_v36 = vadd.f32 %v2269_v9, %v1052_v45  ;;  %v1765_v11 = vpop.f32.mrb[6].mxu0  ;;  %v1114_v2 = vmax.f32 %v1096_v20, 0.0 }
 0x1b4   : > { %v1105_v61 = vmax.f32 %v1061_v18, 0.0  ;;  %v1737_v12 = vpack.c.bf16 %v1111_v48, %v1111_v48  ;;  %v1064_v13 = vadd.f32 %v1765_v11, %v2269_v9  ;;  %v1055_v14 = vpop.f32.mrb[7].mxu0  ;;  %v1112_v58 = vmax.f32 %v2357_v7, 0.0 }
 0x1b5   : > { %v1262_v16 = vshrl.u32 %v1739_v8, 16  ;;  %v1265_v17 = vshll.u32 %v1739_v8, 16  ;;  %v1103_v38 = vmax.f32 %v1053_v36, 0.0  ;;  %v1740_v41 = vpack.c.bf16 %v1114_v2, %v1114_v2 }
 0x1b6   : > { %v1731_v22 = vpack.c.bf16 %v1105_v61, %v1105_v61  ;;  %v1248_v23 = vshrl.u32 %v1737_v12, 16  ;;  %v1251_v24 = vshll.u32 %v1737_v12, 16  ;;  %v1106_v29 = vmax.f32 %v1064_v13, 0.0 }
 0x1b7   : > { %v1264_v31 = vrot.slane %v1262_v16, 7  ;;  %v1729_v33 = vpack.c.bf16 %v1103_v38, %v1103_v38  ;;  %v1269_v1 = vshrl.u32 %v1740_v41, 16  ;;  %v1272_v34 = vshll.u32 %v1740_v41, 16 }
 0x1b8   : > { %v1206_v21 = vshrl.u32 %v1731_v22, 16  ;;  %v1209_v35 = vshll.u32 %v1731_v22, 16  ;;  %v1250_v39 = vrot.slane %v1248_v23, 7  ;;  %v1732_v37 = vpack.c.bf16 %v1106_v29, %v1106_v29 }
 0x1b9   : > { %v1267_v43 = vor.u32 %v1265_v17, %v1264_v31  ;;  %v1192_v44 = vshrl.u32 %v1729_v33, 16  ;;  %v1195_v4 = vshll.u32 %v1729_v33, 16  ;;  %v1271_v3 = vrot.slane %v1269_v1, 7 }
 0x1ba   : > { %v1208_v5 = vrot.slane %v1206_v21, 7  ;;  %v1253_v42 = vor.u32 %v1251_v24, %v1250_v39  ;;  %v1213_v15 = vshrl.u32 %v1732_v37, 16  ;;  %v1216_v27 = vshll.u32 %v1732_v37, 16 }
 0x1bb   : > { %v1308_v46 = vsel %vm2283_vm14, 0, %v1267_v43  ;;  %v1194_v47 = vrot.slane %v1192_v44, 7  ;;  %v1274_v10 = vor.u32 %v1272_v34, %v1271_v3  ;;  %v1056_v25 = vadd.f32 %v2269_v9, %v1055_v14 }
 0x1bc   : > { %v1211_v26 = vor.u32 %v1209_v35, %v1208_v5  ;;  %v1327_v49 = vsel %vm2289_vm15, %v1308_v46, 0  ;;  %v1306_v50 = vsel %vm2283_vm14, 0, %v1253_v42  ;;  %v1215_v40 = vrot.slane %v1213_v15, 7 }
 0x1bd   : > { %v1714_v62 = vcombine.low %v1327_v49, %v1327_v49  ;;  %v1715_v51 = vcombine.high %v1327_v49, %v1327_v49  ;;  %v1197_v32 = vor.u32 %v1195_v4, %v1194_v47  ;;  %v1325_v52 = vsel %vm2289_vm15, %v1306_v50, 0 }
 0x1be   : > { %v1300_v19 = vsel %vm2283_vm14, 0, %v1211_v26  ;;  %v1710_v9 = vcombine.low %v1325_v52, %v1325_v52  ;;  %v1711_v56 = vcombine.high %v1325_v52, %v1325_v52  ;;  %v1218_v59 = vor.u32 %v1216_v27, %v1215_v40 }
 0x1bf   : > { %v1319_v60 = vsel %vm2289_vm15, %v1300_v19, 0  ;;  %1469 = vst [vmem:[%s2301_s14 + $0x70] sm:$0xf] %v1714_v62  ;;  %1470 = vst [vmem:[%s2301_s14 + $0x74] sm:$0x1] %v1715_v51  ;;  %v1298_v63 = vsel %vm2283_vm14, 0, %v1197_v32  ;;  %v1738_v12 = vpack.c.bf16 %v1112_v58, %v1112_v58 }
 0x1c0   : > { %v1309_v57 = vsel %vm2283_vm14, 0, %v1274_v10  ;;  %v1104_v30 = vmax.f32 %v1056_v25, 0.0  ;;  %v1698_v55 = vcombine.low %v1319_v60, %v1319_v60  ;;  %v1699_v54 = vcombine.high %v1319_v60, %v1319_v60  ;;  %1465 = vst [vmem:[%s2301_s14 + $0x60] sm:$0xf] %v1710_v9  ;;  %1466 = vst [vmem:[%s2301_s14 + $0x64] sm:$0x1] %v1711_v56 }
 0x1c1   : > { %v1317_v0 = vsel %vm2289_vm15, %v1298_v63, 0  ;;  %v1301_v20 = vsel %vm2283_vm14, 0, %v1218_v59  ;;  %v1328_v48 = vsel %vm2289_vm15, %v1309_v57, 0  ;;  %v1255_v14 = vshrl.u32 %v1738_v12, 16 }
 0x1c2   : > { %v1694_v28 = vcombine.low %v1317_v0, %v1317_v0  ;;  %v1695_v18 = vcombine.high %v1317_v0, %v1317_v0  ;;  %v1320_v45 = vsel %vm2289_vm15, %v1301_v20, 0  ;;  %1453 = vst [vmem:[%s2301_s14 + $0x30] sm:$0xf] %v1698_v55  ;;  %1454 = vst [vmem:[%s2301_s14 + $0x34] sm:$0x1] %v1699_v54  ;;  %v1716_v11 = vcombine.low %v1328_v48, %v1328_v48 }
 0x1c3   : > { %v1700_v8 = vcombine.low %v1320_v45, %v1320_v45  ;;  %v1701_v36 = vcombine.high %v1320_v45, %v1320_v45  ;;  %v1717_v2 = vcombine.high %v1328_v48, %v1328_v48  ;;  %v1730_v61 = vpack.c.bf16 %v1104_v30, %v1104_v30 }
 0x1c4   : > { %1449 = vst [vmem:[%s2301_s14 + $0x20] sm:$0xf] %v1694_v28  ;;  %1450 = vst [vmem:[%s2301_s14 + $0x24] sm:$0x1] %v1695_v18  ;;  %v1257_v38 = vrot.slane %v1255_v14, 7  ;;  %v1258_v41 = vshll.u32 %v1738_v12, 16 }
 0x1c5   : > { %1455 = vst [vmem:[%s2301_s14 + $0x38] sm:$0xf] %v1700_v8  ;;  %1456 = vst [vmem:[%s2301_s14 + $0x3c] sm:$0x1] %v1701_v36  ;;  %v1199_v13 = vshrl.u32 %v1730_v61, 16  ;;  %v1202_v17 = vshll.u32 %v1730_v61, 16 }
 0x1c6   : > { %1471 = vst [vmem:[%s2301_s14 + $0x78] sm:$0xf] %v1716_v11  ;;  %1472 = vst [vmem:[%s2301_s14 + $0x7c] sm:$0x1] %v1717_v2  ;;  %v1260_v23 = vor.u32 %v1258_v41, %v1257_v38 }
 0x1c7   : > { %v1201_v16 = vrot.slane %v1199_v13, 7 }
 0x1c8   : > { %v1307_v58 = vsel %vm2283_vm14, 0, %v1260_v23 }
 0x1c9   : > { %v1204_v22 = vor.u32 %v1202_v17, %v1201_v16  ;;  %v1326_v29 = vsel %vm2289_vm15, %v1307_v58, 0 }
 0x1ca   : > { %v1712_v1 = vcombine.low %v1326_v29, %v1326_v29  ;;  %v1713_v34 = vcombine.high %v1326_v29, %v1326_v29 }
 0x1cb   : > { %v1299_v7 = vsel %vm2283_vm14, 0, %v1204_v22 }
 0x1cc   : > { %v1318_v24 = vsel %vm2289_vm15, %v1299_v7, 0  ;;  %1467 = vst [vmem:[%s2301_s14 + $0x68] sm:$0xf] %v1712_v1  ;;  %1468 = vst [vmem:[%s2301_s14 + $0x6c] sm:$0x1] %v1713_v34 }
 0x1cd   : > { %v1696_v31 = vcombine.low %v1318_v24, %v1318_v24  ;;  %v1697_v33 = vcombine.high %v1318_v24, %v1318_v24 }
 0x1cf   : > { %1451 = vst [vmem:[%s2301_s14 + $0x28] sm:$0xf] %v1696_v31  ;;  %1452 = vst [vmem:[%s2301_s14 + $0x2c] sm:$0x1] %v1697_v33 }
 0x1d0 PF: > { %s15_s20 = sadd.s32 1, %s1852_s20   ;;  %s2435_s18 = smov %s1848_s19 }
 0x1d1   : > { %p12_p5 = scmp.ge.s32.totalorder %s15_s20, 4   ;;  %s2436_s19 = smov %s2438_s1 }
 0x1d3   :  { %14 = sbr.rel (!%p12_p5) target bundleno = 2 (0x2), region = 76 }

// kernel: hu_model_forward.5
= control target key start
LH: loop header
LB: loop body
LE: loop exit
PB: predicated region body
PF: predicated region fallthrough
CT: control target
= control target key end

     0   :  { %s2017_s18 = smov 0   ;;  %s2019_s19 = smov 0   ;;  %s2465_s0 = inlined_call_operand.vmem [shape: bf16[2,16,10,128], index: 0, kind: input, shape index: {}, may-alias: {0,1,2}]   ;;  %s2466_s1 = inlined_call_operand.vmem [shape: bf16[2,16,10,128], index: 1, kind: input, shape index: {}, may-alias: {0,1,2}]   ;;  %s2467_s2 = inlined_call_operand.vmem [shape: bf16[2,16,10,128], index: 2, kind: input, shape index: {}, may-alias: {0,1,2}]   ;;  %s2468_s3 = inlined_call_operand.vmem [shape: bf16[576,64], index: 3, kind: input, shape index: {}]   ;;  %s2469_s4 = inlined_call_operand.vmem [shape: f32[1,64], index: 4, kind: input, shape index: {}]   ;;  %s2470_s5 = inlined_call_operand.vmem [shape: bf16[2,8,10,64], index: 5, kind: output, shape index: {}]  }
   0x1   :  { %s2021_s20 = smov 0  }
   0x2 LB: > { %s27_s1 = sadd.s32 1, %s1979_s19  ;;  %p1667_p0 = scmp.ge.s32.totalorder %s1983_s20, 1  ;;  %s1983_s20 = sphi %s2021_s20, %s15_s20   ;;  %s1979_s19 = sphi %s2019_s19, %s2478_s19   ;;  %s1975_s18 = sphi %s2017_s18, %s2477_s18  }
   0x3   : > { %p29_p1 = scmp.ge.s32.totalorder %s27_s1, 2  ;;  %p273_p2 = scmp.lt.s32.totalorder %s1983_s20, 3 }
   0x5   : > { %s2480_s1 = smov (%p29_p1, %s27_s1), 0  ;;  %p274_p3 = pnand %p1667_p0, %p273_p2 }
   0x6   : > { %p338_p4 = scmp.lt.s32.totalorder (!%p274_p3), %s1975_s18, 1  ;;  %vm434_vm0 = vsmask.f32 (!%p274_p3), 3328  ;;  %vm435_vm1 = vsmask.f32 (!%p274_p3), 7440  ;;  %v1985_v0 = vmov (!%p274_p3), 0  }
   0x7   : > { %277 = sbr.rel (%p274_p3) target bundleno = 426 (0x1aa), region = 40  ;;  %v440_v1 = vrot.slane (!%p274_p3), %v1985_v0, 4  ;;  %v2039_v2 = vrot.slane (!%p274_p3), %v1985_v0, 5  ;;  %v1921_v3 = vld [vmem:[%s2468_s3 + $0xc0] sm:$0xff] (!%p274_p3)   ;;  %v1925_v16 = vld [vmem:[%s2468_s3 + $0xc8] sm:$0xff] (!%p274_p3)   ;;  %s1986_s9 = smov (!%p274_p3), 64   ;;  %vm2091_vm2 = vmor (!%p274_p3), %vm434_vm0, %vm435_vm1 }
   0x8   : > { %v1922_v4 = vld [vmem:[%s2468_s3 + $0x80] sm:$0xff] (!%p274_p3)   ;;  %1816 = vmatprep.subr.bf16.mxu1 (!%p274_p3), %v1921_v3  ;;  %v1926_v29 = vld [vmem:[%s2468_s3 + $0x88] sm:$0xff] (!%p274_p3)   ;;  %v1929_v51 = vld [vmem:[%s2468_s3 + $0xd0] sm:$0xff] (!%p274_p3)   ;;  %vm782_vm3 = vcmask (!%p274_p3), 523264   ;;  %vm1429_vm4 = vcmask (!%p274_p3), 1040384   ;;  %vm1440_vm6 = vcmask (!%p274_p3), 1044480  }
   0x9   : > { %v1923_v5 = vld [vmem:[%s2468_s3 + $0x40] sm:$0xff] (!%p274_p3)   ;;  %1817 = vmatpush3.bf16.msra.mxu1 (!%p274_p3), %v1922_v4  ;;  %v444_v10 = vor.u32 (!%p274_p3), %v2039_v2, %v440_v1  ;;  %v1927_v36 = vld [vmem:[%s2468_s3 + $0x48] sm:$0xff] (!%p274_p3)   ;;  %v1930_v57 = vld [vmem:[%s2468_s3 + $0x90] sm:$0xff] (!%p274_p3)   ;;  %vm1430_vm5 = vsmask.f32 (!%p274_p3), 256  ;;  %vm1507_vm8 = vcmask (!%p274_p3), 519168  }
   0xa   : > { %v1924_v6 = vld [vmem:[%s2468_s3] sm:$0xff] (!%p274_p3)   ;;  %1776 = vmatprep.subr.bf16.mxu0 (!%p274_p3), %v1923_v5  ;;  %1818 = vmatprep.subr.bf16.mxu1 (!%p274_p3), %v1925_v16  ;;  %v1928_v41 = vld [vmem:[%s2468_s3 + $0x8] sm:$0xff] (!%p274_p3)   ;;  %v1931_v63 = vld [vmem:[%s2468_s3 + $0x50] sm:$0xff] (!%p274_p3)   ;;  %vm1441_vm7 = vsmask.f32 (!%p274_p3), 4352  ;;  %vm1509_vm9 = vcmask (!%p274_p3), 516096  }
   0xb   : > { %1777 = vmatpush3.bf16.msra.mxu0 (!%p274_p3), %v1924_v6  ;;  %v445_v25 = vrot.slane (!%p274_p3), %v444_v10, 4  ;;  %v1932_v6 = vld [vmem:[%s2468_s3 + $0x10] sm:$0xff] (!%p274_p3)   ;;  %v1956_v30 = vld [vmem:[%s2468_s3 + $0x108] sm:$0xff] (!%p274_p3)   ;;  %vm2375_vm10 = vmand (!%p274_p3), %vm1429_vm4, %vm1430_vm5 }
   0xc   : > { %1778 = vmatprep.subr.bf16.mxu0 (!%p274_p3), %v1927_v36  ;;  %vm2382_vm11 = vmand (!%p274_p3), %vm1440_vm6, %vm1441_vm7 }
   0xd   : > { %1819 = vmatpush3.bf16.msra.mxu1 (!%p274_p3), %v1926_v29  ;;  %v450_v46 = vsel (!%p274_p3), %vm2091_vm2, %v445_v25, %v2039_v2 }
   0xe   : > { %s2482_s18 = smov (!%p338_p4, %s1975_s18), 1  ;;  %1820 = vmatprep.subr.bf16.mxu1 %v1929_v51 }
   0xf   : > { %s1765_s24 = sshll.u32 %s2482_s18, 7  ;;  %1779 = vmatpush3.bf16.msra.mxu0 %v1928_v41  ;;  %s1767_s8 = sshll.u32 %s2482_s18, 6 }
  0x10   : > { %s2054_s29 = scalar_lea.vmem %s2465_s0, %s1765_s24  ;;  %1780 = vmatprep.subr.bf16.mxu0 %v1931_v63  ;;  %v1939_v63 = vld [vmem:[%s2468_s3 + $0x60] sm:$0xff]   ;;  %s2391_s11 = scalar_lea.vmem %s2470_s5, %s1767_s8 }
  0x11   : > { %v2060_v7 = vld [vmem:[%s2054_s29 + $0x8] sm:$0xf]  ;;  %v2063_v8 = vld [vmem:[%s2054_s29 + $0x18] sm:$0xf]  ;;  %v405_v9 = vld [vmem:[%s2054_s29 + $0xc] sm:$0x1]  ;;  %1821 = vmatpush3.bf16.msra.mxu1 %v1930_v57 }
  0x12   : > { %v466_v11 = vshrl.u32 %v2063_v8, 16  ;;  %v469_v12 = vshll.u32 %v2063_v8, 16  ;;  %v1690_v13 = vcombine.low %v2060_v7, %v2063_v8  ;;  %v452_v14 = vshrl.u32 %v2060_v7, 16  ;;  %v409_v15 = vld [vmem:[%s2054_s29 + $0x1c] sm:$0x1] }
  0x13   : > { %v455_v17 = vshll.u32 %v2060_v7, 16  ;;  %v2078_v18 = vld [vmem:[%s2054_s29 + $0x28] sm:$0xf]  ;;  %v413_v19 = vld [vmem:[%s2054_s29 + $0x2c] sm:$0x1]  ;;  %v461_v21 = vshll.u32 %v405_v9, 16  ;;  %v1674_v16 = vcombine.low %v1985_v0, %v2060_v7  ;;  %1781 = vmatpush3.bf16.msra.mxu0 %v1932_v6 }
  0x14   : > { %761 = vrot.lane.b32.xlu0 %v1690_v13, %s1986_s9  ;;  %v454_v20 = vrot.slane %v452_v14, 4  ;;  %v468_v22 = vrot.slane %v466_v11, 4  ;;  %v471_v23 = vrot.slane %v469_v12, 5  ;;  %v2083_v24 = vld [vmem:[%s2054_s29 + $0x38] sm:$0xf]  ;;  %v475_v27 = vshll.u32 %v409_v15, 16 }
  0x15   : > { %v457_v26 = vrot.slane %v455_v17, 5  ;;  %v480_v28 = vshrl.u32 %v2078_v18, 16  ;;  %v463_v31 = vrot.slane %v461_v21, 5  ;;  %v483_v33 = vshll.u32 %v2078_v18, 16  ;;  %v417_v35 = vld [vmem:[%s2054_s29 + $0x3c] sm:$0x1] }
  0x16   : > { %v472_v32 = vor.u32 %v471_v23, %v468_v22  ;;  %v489_v34 = vshll.u32 %v413_v19, 16  ;;  %v477_v38 = vrot.slane %v475_v27, 5  ;;  %v494_v40 = vshrl.u32 %v2083_v24, 16  ;;  %v2106_v45 = vld [vmem:[%s2054_s29 + $0x48] sm:$0xf] }
  0x17   : > { %v458_v37 = vor.u32 %v457_v26, %v454_v20  ;;  %v482_v39 = vrot.slane %v480_v28, 4  ;;  %v485_v43 = vrot.slane %v483_v33, 5  ;;  %v497_v44 = vshll.u32 %v2083_v24, 16  ;;  %v421_v50 = vld [vmem:[%s2054_s29 + $0x4c] sm:$0x1]  ;;  %v1933_v33 = vld [vmem:[%s2468_s3 + $0xd8] sm:$0xff]  }
  0x18   : > { %v473_v42 = vrot.slane %v472_v32, 4  ;;  %v496_v48 = vrot.slane %v494_v40, 4  ;;  %v503_v49 = vshll.u32 %v417_v35, 16  ;;  %v491_v54 = vrot.slane %v489_v34, 5  ;;  %v2118_v56 = vld [vmem:[%s2054_s29 + $0x58] sm:$0xf]  ;;  %1822 = vmatprep.subr.bf16.mxu1 %v1933_v33 }
  0x19   : > { %v459_v47 = vrot.slane %v458_v37, 4  ;;  %v486_v53 = vor.u32 %v485_v43, %v482_v39  ;;  %v499_v55 = vrot.slane %v497_v44, 5  ;;  %v508_v60 = vshrl.u32 %v2106_v45, 16  ;;  %v425_v62 = vld [vmem:[%s2054_s29 + $0x5c] sm:$0x1]  ;;  %v1941_v6 = vld [vmem:[%s2468_s3 + $0xe8] sm:$0xff]  }
  0x1a   : > { %v478_v52 = vsel %vm2091_vm2, %v473_v42, %v477_v38  ;;  %v505_v59 = vrot.slane %v503_v49, 5  ;;  %v511_v61 = vshll.u32 %v2106_v45, 16  ;;  %v2132_v5 = vld [vmem:[%s2054_s29 + $0x68] sm:$0xf]  ;;  %v517_v11 = vshll.u32 %v421_v50, 16  ;;  %v1934_v38 = vld [vmem:[%s2468_s3 + $0x98] sm:$0xff]  }
  0x1b   : > { %v464_v58 = vsel %vm2091_vm2, %v459_v47, %v463_v31  ;;  %v487_v1 = vrot.slane %v486_v53, 4  ;;  %v500_v4 = vor.u32 %v499_v55, %v496_v48  ;;  %v510_v9 = vrot.slane %v508_v60, 4  ;;  %v429_v13 = vld [vmem:[%s2054_s29 + $0x6c] sm:$0x1]  ;;  %v2140_v14 = vld [vmem:[%s2054_s29 + $0x78] sm:$0xf]  ;;  %1823 = vmatpush3.bf16.msra.mxu1 %v1934_v38 }
  0x1c   : > { %v1694_v2 = vcombine.low %v464_v58, %v478_v52  ;;  %v1678_v3 = vcombine.low %v450_v46, %v464_v58  ;;  %v513_v10 = vrot.slane %v511_v61, 5  ;;  %v522_v12 = vshrl.u32 %v2118_v56, 16  ;;  %v433_v32 = vld [vmem:[%s2054_s29 + $0x7c] sm:$0x1]  ;;  %v1937_v58 = vld [vmem:[%s2468_s3 + $0xe0] sm:$0xff]  }
  0x1d   : > { %v492_v15 = vsel %vm2091_vm2, %v487_v1, %v491_v54  ;;  %v501_v17 = vrot.slane %v500_v4, 4  ;;  %v525_v19 = vshll.u32 %v2118_v56, 16  ;;  %v519_v22 = vrot.slane %v517_v11, 5  ;;  %v1935_v43 = vld [vmem:[%s2468_s3 + $0x58] sm:$0xff]   ;;  %1824 = vmatprep.subr.bf16.mxu1 %v1937_v58  ;;  %v1940_v1 = vld [vmem:[%s2468_s3 + $0x20] sm:$0xff]   ;;  %v1944_v11 = vld [vmem:[%s2468_s3 + $0x28] sm:$0xff]  }
  0x1e   : > { %774 = vrot.lane.b32.xlu1 %v1694_v2, %s1986_s9  ;;  %715 = vrot.lane.b32.xlu0 %v1678_v3, %s1986_s9  ;;  %v1679_v20 = vcombine.low %v478_v52, %v492_v15  ;;  %v514_v21 = vor.u32 %v513_v10, %v510_v9  ;;  %v524_v23 = vrot.slane %v522_v12, 4  ;;  %v1691_v25 = vcombine.low %v2078_v18, %v2083_v24  ;;  %v1936_v47 = vld [vmem:[%s2468_s3 + $0x18] sm:$0xff]   ;;  %v1942_v9 = vld [vmem:[%s2468_s3 + $0xa8] sm:$0xff]  }
  0x1f   : > { %v506_v26 = vsel %vm2091_vm2, %v501_v17, %v505_v59  ;;  %v527_v27 = vrot.slane %v525_v19, 5  ;;  %v531_v28 = vshll.u32 %v425_v62, 16  ;;  %v536_v0 = vshrl.u32 %v2132_v5, 16  ;;  %1782 = vmatprep.subr.bf16.mxu0 %v1935_v43  ;;  %v1938_v62 = vld [vmem:[%s2468_s3 + $0xa0] sm:$0xff]   ;;  %v1943_v10 = vld [vmem:[%s2468_s3 + $0x68] sm:$0xff]   ;;  %v1945_v12 = vld [vmem:[%s2468_s3 + $0xf0] sm:$0xff]  }
  0x20   : > { %v1695_v29 = vcombine.low %v492_v15, %v506_v26  ;;  %v515_v31 = vrot.slane %v514_v21, 4  ;;  %v539_v7 = vshll.u32 %v2132_v5, 16  ;;  %v545_v36 = vshll.u32 %v429_v13, 16  ;;  %1783 = vmatpush3.bf16.msra.mxu0 %v1936_v47  ;;  %1825 = vmatpush3.bf16.msra.mxu1 %v1938_v62  ;;  %v1946_v13 = vld [vmem:[%s2468_s3 + $0xb0] sm:$0xff]   ;;  %v1949_v17 = vld [vmem:[%s2468_s3 + $0xf8] sm:$0xff]  }
  0x21   : > { %v528_v34 = vor.u32 %v527_v27, %v524_v23  ;;  %v533_v35 = vrot.slane %v531_v28, 5  ;;  %v662_v37 = vshrl.u32 %v2140_v14, 16  ;;  %v538_v40 = vrot.slane %v536_v0, 4  ;;  %1784 = vmatprep.subr.bf16.mxu0 %v1939_v63  ;;  %1826 = vmatprep.subr.bf16.mxu1 %v1941_v6  ;;  %v1950_v19 = vld [vmem:[%s2468_s3 + $0xb8] sm:$0xff]   ;;  %v403_v21 = vld [vmem:[%s2054_s29 + $0x4] sm:$0x1] }
  0x22   : > { %695 = vrot.lane.b32.xlu1 %v1674_v16, %s1986_s9  ;;  %717 = vrot.lane.b32.xlu0 %v1679_v20, %s1986_s9  ;;  %v520_v39 = vsel %vm2091_vm2, %v515_v31, %v519_v22  ;;  %v541_v41 = vrot.slane %v539_v7, 5  ;;  %v665_v42 = vshll.u32 %v2140_v14, 16  ;;  %v1675_v50 = vcombine.low %v2063_v8, %v2078_v18  ;;  %v1948_v16 = vld [vmem:[%s2468_s3 + $0x30] sm:$0xff]   ;;  %v2250_v20 = vld [vmem:[%s2054_s29] sm:$0xf] }
  0x23   : > { %v529_v44 = vrot.slane %v528_v34, 4  ;;  %v664_v46 = vrot.slane %v662_v37, 4  ;;  %v1680_v51 = vcombine.low %v506_v26, %v520_v39  ;;  %v671_v52 = vshll.u32 %v433_v32, 16  ;;  %v2254_v22 = vld [vmem:[%s2054_s29 + $0x10] sm:$0xf]  ;;  %v2264_v34 = vld [vmem:[%s2468_s3 + $0x100] sm:$0xff]  }
  0x24   : > { %v542_v48 = vor.u32 %v541_v41, %v538_v40  ;;  %v667_v49 = vrot.slane %v665_v42, 5  ;;  %v547_v55 = vrot.slane %v545_v36, 5  ;;  %v1692_v8 = vcombine.low %v2106_v45, %v2118_v56  ;;  %1785 = vmatpush3.bf16.msra.mxu0 %v1940_v1  ;;  %1827 = vmatpush3.bf16.msra.mxu1 %v1942_v9  ;;  %v407_v23 = vld [vmem:[%s2054_s29 + $0x14] sm:$0x1]  ;;  %v2267_v37 = vld [vmem:[%s2054_s29 + $0x20] sm:$0xf] }
  0x25   : > { %v534_v53 = vsel %vm2091_vm2, %v529_v44, %v533_v35  ;;  %v673_v59 = vrot.slane %v671_v52, 5  ;;  %v1676_v2 = vcombine.low %v2083_v24, %v2106_v45  ;;  %v1693_v24 = vcombine.low %v2132_v5, %v2140_v14  ;;  %1786 = vmatprep.subr.bf16.mxu0 %v1943_v10  ;;  %1828 = vmatprep.subr.bf16.mxu1 %v1945_v12  ;;  %v1947_v14 = vld [vmem:[%s2468_s3 + $0x70] sm:$0xff]   ;;  %v411_v43 = vld [vmem:[%s2054_s29 + $0x24] sm:$0x1]  ;;  %v2281_v58 = vld [vmem:[%s2054_s29 + $0x40] sm:$0xf] }
  0x26   : > { %763 = vrot.lane.b32.xlu1 %v1691_v25, %s1986_s9  ;;  %776 = vrot.lane.b32.xlu0 %v1695_v29, %s1986_s9  ;;  %v543_v54 = vrot.slane %v542_v48, 4  ;;  %v668_v57 = vor.u32 %v667_v49, %v664_v46  ;;  %v1696_v18 = vcombine.low %v520_v39, %v534_v53  ;;  %v1677_v15 = vcombine.low %v2118_v56, %v2132_v5  ;;  %v1951_v56 = vld [vmem:[%s2468_s3 + $0x78] sm:$0xff]   ;;  %v2270_v38 = vld [vmem:[%s2054_s29 + $0x30] sm:$0xf] }
  0x27   : > { %v1952_v5 = vld [vmem:[%s2468_s3 + $0x38] sm:$0xff]   ;;  %v550_v25 = vshrl.u32 %v2250_v20, 16  ;;  %v553_v26 = vshll.u32 %v2250_v20, 16  ;;  %v559_v27 = vshll.u32 %v403_v21, 16  ;;  %v564_v28 = vshrl.u32 %v2254_v22, 16 }
  0x28   : > { %v548_v60 = vsel %vm2091_vm2, %v543_v54, %v547_v55  ;;  %v669_v61 = vrot.slane %v668_v57, 4  ;;  %1787 = vmatpush3.bf16.msra.mxu0 %v1944_v11  ;;  %1829 = vmatpush3.bf16.msra.mxu1 %v1946_v13  ;;  %v567_v29 = vshll.u32 %v2254_v22, 16  ;;  %v573_v31 = vshll.u32 %v407_v23, 16  ;;  %v415_v47 = vld [vmem:[%s2054_s29 + $0x34] sm:$0x1] }
  0x29   : > { %v1681_v3 = vcombine.low %v534_v53, %v548_v60  ;;  %1788 = vmatprep.subr.bf16.mxu0 %v1947_v14  ;;  %1830 = vmatprep.subr.bf16.mxu1 %v1949_v17  ;;  %v552_v0 = vrot.slane %v550_v25, 4  ;;  %v555_v7 = vrot.slane %v553_v26, 5  ;;  %v561_v32 = vrot.slane %v559_v27, 5  ;;  %v419_v62 = vld [vmem:[%s2054_s29 + $0x44] sm:$0x1] }
  0x2a   : > { %697 = vrot.lane.b32.xlu1 %v1675_v50, %s1986_s9  ;;  %719 = vrot.lane.b32.xlu0 %v1680_v51, %s1986_s9  ;;  %v674_v4 = vsel %vm2091_vm2, %v669_v61, %v673_v59  ;;  %v566_v33 = vrot.slane %v564_v28, 4  ;;  %v569_v35 = vrot.slane %v567_v29, 5  ;;  %v575_v36 = vrot.slane %v573_v31, 5  ;;  %v2286_v59 = vld [vmem:[%s2054_s29 + $0x50] sm:$0xf] }
  0x2b   : > { %v1697_v45 = vcombine.low %v548_v60, %v674_v4  ;;  %v556_v39 = vor.u32 %v555_v7, %v552_v0  ;;  %v578_v40 = vshrl.u32 %v2267_v37, 16  ;;  %v581_v41 = vshll.u32 %v2267_v37, 16  ;;  %v423_v4 = vld [vmem:[%s2054_s29 + $0x54] sm:$0x1]  ;;  %v2297_v13 = vld [vmem:[%s2054_s29 + $0x60] sm:$0xf] }
  0x2c   : > { %1789 = vmatpush3.bf16.msra.mxu0 %v1948_v16  ;;  %1831 = vmatpush3.bf16.msra.mxu1 %v1950_v19  ;;  %v592_v42 = vshrl.u32 %v2270_v38, 16  ;;  %v570_v44 = vor.u32 %v569_v35, %v566_v33  ;;  %v595_v46 = vshll.u32 %v2270_v38, 16  ;;  %v587_v48 = vshll.u32 %v411_v43, 16  ;;  %v2302_v19 = vld [vmem:[%s2054_s29 + $0x70] sm:$0xf] }
  0x2d   : > { %1790 = vmatprep.subr.bf16.mxu0 %v1951_v56  ;;  %1880 = vmatprep.subr.bf16.mxu1 %v2264_v34  ;;  %v557_v49 = vrot.slane %v556_v39, 4  ;;  %v580_v50 = vrot.slane %v578_v40, 4  ;;  %v583_v51 = vrot.slane %v581_v41, 5  ;;  %v601_v57 = vshll.u32 %v415_v47, 16  ;;  %v427_v56 = vld [vmem:[%s2054_s29 + $0x64] sm:$0x1] }
  0x2e   : > { %765 = vrot.lane.b32.xlu1 %v1692_v8, %s1986_s9  ;;  %778 = vrot.lane.b32.xlu0 %v1696_v18, %s1986_s9  ;;  %v594_v52 = vrot.slane %v592_v42, 4  ;;  %v571_v53 = vrot.slane %v570_v44, 4  ;;  %v597_v54 = vrot.slane %v595_v46, 5  ;;  %v589_v55 = vrot.slane %v587_v48, 5  ;;  %v431_v26 = vld [vmem:[%s2054_s29 + $0x74] sm:$0x1] }
  0x2f   : > { %v562_v8 = vsel %vm2091_vm2, %v557_v49, %v561_v32  ;;  %v584_v18 = vor.u32 %v583_v51, %v580_v50  ;;  %v606_v60 = vshrl.u32 %v2281_v58, 16  ;;  %v609_v61 = vshll.u32 %v2281_v58, 16 }
  0x30   : > { %1791 = vmatpush3.bf16.msra.mxu0 %v1952_v5  ;;  %v576_v63 = vsel %vm2091_vm2, %v571_v53, %v575_v36  ;;  %v598_v1 = vor.u32 %v597_v54, %v594_v52  ;;  %v623_v12 = vshll.u32 %v2286_v59, 16  ;;  %v615_v16 = vshll.u32 %v419_v62, 16 }
  0x31   : > { %1864 = vmatprep.subr.bf16.mxu0 %v2264_v34  ;;  %v1686_v6 = vcombine.low %v562_v8, %v576_v63  ;;  %v585_v9 = vrot.slane %v584_v18, 4  ;;  %v608_v10 = vrot.slane %v606_v60, 4  ;;  %v629_v17 = vshll.u32 %v423_v4, 16 }
  0x32   : > { %699 = vrot.lane.b32.xlu1 %v1676_v2, %s1986_s9  ;;  %721 = vrot.lane.b32.xlu0 %v1681_v3, %s1986_s9  ;;  %v603_v2 = vrot.slane %v601_v57, 5  ;;  %v620_v3 = vshrl.u32 %v2286_v59, 16  ;;  %v625_v21 = vrot.slane %v623_v12, 5  ;;  %v634_v23 = vshrl.u32 %v2297_v13, 16 }
  0x33   : > { %v590_v14 = vsel %vm2091_vm2, %v585_v9, %v589_v55  ;;  %v637_v25 = vshll.u32 %v2297_v13, 16  ;;  %v617_v29 = vrot.slane %v615_v16, 5  ;;  %v631_v31 = vrot.slane %v629_v17, 5  ;;  %v1960_v9 = vld [vmem:[%s2468_s3 + $0x118] sm:$0xff]  }
  0x34   : > { %v622_v11 = vrot.slane %v620_v3, 4  ;;  %v636_v7 = vrot.slane %v634_v23, 4  ;;  %v648_v33 = vshrl.u32 %v2302_v19, 16  ;;  %v651_v36 = vshll.u32 %v2302_v19, 16 }
  0x35   : > { %v639_v32 = vrot.slane %v637_v25, 5  ;;  %v643_v39 = vshll.u32 %v427_v56, 16  ;;  %v657_v43 = vshll.u32 %v431_v26, 16  ;;  %v1682_v8 = vcombine.low %v2250_v20, %v2254_v22 }
  0x36   : > { %767 = vrot.lane.b32.xlu1 %v1693_v24, %s1986_s9  ;;  %780 = vrot.lane.b32.xlu0 %v1697_v45, %s1986_s9  ;;  %v611_v24 = vrot.slane %v609_v61, 5  ;;  %v599_v45 = vrot.slane %v598_v1, 4  ;;  %v626_v0 = vor.u32 %v625_v21, %v622_v11  ;;  %v650_v41 = vrot.slane %v648_v33, 4 }
  0x37   : > { %v640_v42 = vor.u32 %v639_v32, %v636_v7  ;;  %v653_v44 = vrot.slane %v651_v36, 5  ;;  %v645_v46 = vrot.slane %v643_v39, 5  ;;  %v659_v51 = vrot.slane %v657_v43, 5 }
  0x38   : > { %v604_v5 = vsel %vm2091_vm2, %v599_v45, %v603_v2  ;;  %v627_v40 = vrot.slane %v626_v0, 4  ;;  %v1683_v63 = vcombine.low %v2267_v37, %v2270_v38  ;;  %v1958_v37 = vld [vmem:[%s2468_s3 + $0x110] sm:$0xff]   ;;  %v1685_v12 = vcombine.low %v2297_v13, %v2302_v19  ;;  %v1698_v0 = vld [vmem:[%s2469_s4] ss:$0 sm:$0xff] }
  0x39   : > { %v1687_v27 = vcombine.low %v590_v14, %v604_v5  ;;  %v641_v48 = vrot.slane %v640_v42, 4  ;;  %v654_v50 = vor.u32 %v653_v44, %v650_v41 }
  0x3a   : > { %701 = vrot.lane.b32.xlu1 %v1677_v15, %s1986_s9  ;;  %v612_v15 = vor.u32 %v611_v24, %v608_v10  ;;  %v632_v47 = vsel %vm2091_vm2, %v627_v40, %v631_v31 }
  0x3b   : > { %v646_v52 = vsel %vm2091_vm2, %v641_v48, %v645_v46  ;;  %v655_v53 = vrot.slane %v654_v50, 4 }
  0x3c   : > { %v613_v28 = vrot.slane %v612_v15, 4 }
  0x3d   : > { %v660_v54 = vsel %vm2091_vm2, %v655_v53, %v659_v51 }
  0x3e   : > { %v618_v35 = vsel %vm2091_vm2, %v613_v28, %v617_v29  ;;  %v2320_v55 = vcombine.low %v646_v52, %v660_v54 }
  0x3f   : > { %v1688_v49 = vcombine.low %v618_v35, %v632_v47 }
  0x86   : > { %v762_v57 = vpop.permute.xlu0 %761 }
  0x90   : > { %v2324_v18 = vpop.permute.xlu1 %774  ;;  %v716_v60 = vpop.permute.xlu0 %715 }
  0x91   : > { %v821_v61 = vsel %vm782_vm3, %v762_v57, %v2324_v18  ;;  %v800_v62 = vsel %vm782_vm3, %v716_v60, %v1682_v8 }
  0x92   : > { %1235 = vmatprep.mubr.bf16.mxu1 %v821_v61  ;;  %1170 = vmatprep.mubr.bf16.mxu0 %v800_v62 }
  0x93   : > { %1236 = vmatmul.mubr.bf16.vlgmr.msra.gmra.mrb[0].mxu1 %v1686_v6  ;;  %v1684_v6 = vcombine.low %v2281_v58, %v2286_v59 }
  0x94   : > { %v696_v20 = vpop.permute.xlu1 %695  ;;  %v718_v22 = vpop.permute.xlu0 %717  ;;  %1884 = vmatpush3.bf16.msra.mxu1 %v2264_v34 }
  0x95   : > { %v785_v1 = vsel %vm782_vm3, %v696_v20, %v716_v60  ;;  %v803_v2 = vsel %vm782_vm3, %v718_v22, %v1683_v63  ;;  %1881 = vmatprep.subr.bf16.mxu1 %v1956_v30 }
  0x96   : > { %1171 = vmatmul.mubr.bf16.vlgmr.msra.gmra.mrb[0].mxu0 %v785_v1 }
  0x97   : > { %1865 = vmatpush3.bf16.msra.mxu0 %v2264_v34  ;;  %1178 = vmatprep.mubr.bf16.mxu0 %v803_v2 }
  0x98   : > { %v764_v38 = vpop.permute.xlu1 %763  ;;  %v777_v3 = vpop.permute.xlu0 %776  ;;  %1866 = vmatprep.subr.bf16.mxu0 %v1956_v30  ;;  %1885 = vmatpush3.bf16.msra.mxu1 %v1956_v30 }
  0x99   : > { %v825_v4 = vsel %vm782_vm3, %v764_v38, %v777_v3  ;;  %1882 = vmatprep.subr.bf16.mxu1 %v1958_v37 }
  0x9a   : > { %1243 = vmatprep.mubr.bf16.mxu1 %v825_v4 }
  0x9b   : > { %1244 = vmatmul.mubr.bf16.gmra.mrb[4].mxu1 %v1687_v27  ;;  %1867 = vmatpush3.bf16.msra.mxu0 %v1956_v30 }
  0x9c   : > { %v698_v10 = vpop.permute.xlu1 %697  ;;  %v720_v34 = vpop.permute.xlu0 %719  ;;  %1868 = vmatprep.subr.bf16.mxu0 %v1958_v37  ;;  %1886 = vmatpush3.bf16.msra.mxu1 %v1958_v37 }
  0x9d   : > { %v789_v24 = vsel %vm782_vm3, %v698_v10, %v718_v22  ;;  %v806_v45 = vsel %vm782_vm3, %v720_v34, %v1684_v6  ;;  %1883 = vmatprep.subr.bf16.mxu1 %v1960_v9 }
  0x9e   : > { %1179 = vmatmul.mubr.bf16.gmra.mrb[4].mxu0 %v789_v24 }
  0x9f   : > { %1186 = vmatprep.mubr.bf16.mxu0 %v806_v45  ;;  %1869 = vmatpush3.bf16.msra.mxu0 %v1958_v37 }
  0xa0   : > { %v766_v58 = vpop.permute.xlu1 %765  ;;  %v779_v59 = vpop.permute.xlu0 %778  ;;  %1870 = vmatprep.subr.bf16.mxu0 %v1960_v9  ;;  %1887 = vmatpush3.bf16.msra.mxu1 %v1960_v9 }
  0xa1   : > { %v829_v11 = vsel %vm782_vm3, %v766_v58, %v779_v59 }
  0xa2   : > { %1251 = vmatprep.mubr.bf16.mxu1 %v829_v11 }
  0xa3   : > { %1252 = vmatmul.mubr.bf16.gmra.mrb[8].mxu1 %v1688_v49  ;;  %1871 = vmatpush3.bf16.msra.mxu0 %v1960_v9 }
  0xa4   : > { %v700_v14 = vpop.permute.xlu1 %699  ;;  %v722_v15 = vpop.permute.xlu0 %721 }
  0xa5   : > { %v793_v16 = vsel %vm782_vm3, %v700_v14, %v720_v34  ;;  %v809_v17 = vsel %vm782_vm3, %v722_v15, %v1685_v12 }
  0xa6   : > { %1187 = vmatmul.mubr.bf16.gmra.mrb[8].mxu0 %v793_v16 }
  0xa7   : > { %1194 = vmatprep.mubr.bf16.mxu0 %v809_v17 }
  0xa8   : > { %v768_v56 = vpop.permute.xlu1 %767  ;;  %v781_v5 = vpop.permute.xlu0 %780 }
  0xa9   : > { %v833_v21 = vsel %vm782_vm3, %v768_v56, %v781_v5 }
  0xaa   : > { %1259 = vmatprep.mubr.bf16.mxu1 %v833_v21 }
  0xab   : > { %1260 = vmatmul.mubr.bf16.gmra.mrb[12].mxu1 %v2320_v55 }
  0xac   : > { %v702_v23 = vpop.permute.xlu1 %701  ;;  %1876 = vmatprep.mubr.msk.bf16.mxu1 %vm782_vm3, %v779_v59 }
  0xad   : > { %v797_v13 = vsel %vm782_vm3, %v702_v23, %v722_v15 }
  0xae   : > { %1195 = vmatmul.mubr.bf16.gmra.mrb[12].mxu0 %v797_v13 }
  0xaf   : > { %1872 = vmatprep.mubr.msk.bf16.mxu0 %vm782_vm3, %v2324_v18 }
  0xb3   : > { %1877 = vmatmul.mubr.msk.bf16.vlgmr.msra.gmra.mrb[16].mxu1 %vm782_vm3, %v781_v5 }
  0xb6   : > { %1873 = vmatmul.mubr.msk.bf16.vlgmr.msra.gmra.mrb[16].mxu0 %vm782_vm3, %v777_v3 }
 0x166   : > { %v1832_v19 = vpop.f32.mrb[0].mxu1 }
 0x167   : > { %v1833_v25 = vpop.f32.mrb[1].mxu1 }
 0x168   : > { %v1834_v26 = vadd.f32 %v1833_v25, %v1832_v19  ;;  %v1835_v27 = vpop.f32.mrb[2].mxu1 }
 0x169   : > { %v1792_v28 = vpop.f32.mrb[0].mxu0  ;;  %v1836_v29 = vpop.f32.mrb[3].mxu1 }
 0x16a   : > { %v1837_v31 = vadd.f32 %v1836_v29, %v1835_v27  ;;  %v1793_v7 = vpop.f32.mrb[1].mxu0 }
 0x16b   : > { %v1794_v32 = vadd.f32 %v1793_v7, %v1792_v28  ;;  %v1795_v33 = vpop.f32.mrb[2].mxu0 }
 0x16c   : > { %v1796_v35 = vpop.f32.mrb[3].mxu0 }
 0x16d   : > { %v1173_v36 = vadd.f32 %v1794_v32, %v1698_v0  ;;  %v1797_v39 = vadd.f32 %v1796_v35, %v1795_v33 }
 0x16e   : > { %v1838_v40 = vpop.f32.mrb[4].mxu1 }
 0x16f   : > { %v1176_v41 = vadd.f32 %v1797_v39, %v1698_v0  ;;  %v1839_v42 = vpop.f32.mrb[5].mxu1  ;;  %v2365_v43 = vadd.f32 %v1834_v26, %v1173_v36 }
 0x170   : > { %v1840_v44 = vadd.f32 %v1839_v42, %v1838_v40  ;;  %v1841_v46 = vpop.f32.mrb[6].mxu1 }
 0x171   : > { %v1798_v47 = vpop.f32.mrb[4].mxu0  ;;  %v1842_v48 = vpop.f32.mrb[7].mxu1  ;;  %v2367_v49 = vadd.f32 %v1837_v31, %v1176_v41 }
 0x172   : > { %v1843_v50 = vadd.f32 %v1842_v48, %v1841_v46  ;;  %v1799_v51 = vpop.f32.mrb[5].mxu0 }
 0x173   : > { %v1800_v52 = vadd.f32 %v1799_v51, %v1798_v47  ;;  %v1801_v53 = vpop.f32.mrb[6].mxu0 }
 0x174   : > { %v1802_v54 = vpop.f32.mrb[7].mxu0 }
 0x175   : > { %v1181_v55 = vadd.f32 %v1800_v52, %v1698_v0  ;;  %v1803_v57 = vadd.f32 %v1802_v54, %v1801_v53 }
 0x176   : > { %v1844_v8 = vpop.f32.mrb[8].mxu1 }
 0x177   : > { %v1184_v18 = vadd.f32 %v1803_v57, %v1698_v0  ;;  %v1845_v60 = vpop.f32.mrb[9].mxu1  ;;  %v1246_v61 = vadd.f32 %v1840_v44, %v1181_v55 }
 0x178   : > { %v1846_v62 = vadd.f32 %v1845_v60, %v1844_v8  ;;  %v1847_v63 = vpop.f32.mrb[10].mxu1 }
 0x179   : > { %v1804_v30 = vpop.f32.mrb[8].mxu0  ;;  %v1848_v20 = vpop.f32.mrb[11].mxu1  ;;  %v1249_v22 = vadd.f32 %v1843_v50, %v1184_v18 }
 0x17a   : > { %v1849_v1 = vadd.f32 %v1848_v20, %v1847_v63  ;;  %v1805_v2 = vpop.f32.mrb[9].mxu0 }
 0x17b   : > { %v1806_v37 = vadd.f32 %v1805_v2, %v1804_v30  ;;  %v1807_v38 = vpop.f32.mrb[10].mxu0 }
 0x17c   : > { %v1808_v3 = vpop.f32.mrb[11].mxu0 }
 0x17d   : > { %v1189_v4 = vadd.f32 %v1806_v37, %v1698_v0  ;;  %v1809_v6 = vadd.f32 %v1808_v3, %v1807_v38 }
 0x17e   : > { %v1850_v9 = vpop.f32.mrb[12].mxu1 }
 0x17f   : > { %v1192_v10 = vadd.f32 %v1809_v6, %v1698_v0  ;;  %v1851_v34 = vpop.f32.mrb[13].mxu1  ;;  %v1254_v24 = vadd.f32 %v1846_v62, %v1189_v4 }
 0x180   : > { %v1852_v45 = vadd.f32 %v1851_v34, %v1850_v9  ;;  %v1853_v58 = vpop.f32.mrb[14].mxu1 }
 0x181   : > { %v1810_v59 = vpop.f32.mrb[12].mxu0  ;;  %v1854_v11 = vpop.f32.mrb[15].mxu1  ;;  %v1257_v12 = vadd.f32 %v1849_v1, %v1192_v10 }
 0x182   : > { %v1855_v14 = vadd.f32 %v1854_v11, %v1853_v58  ;;  %v1811_v15 = vpop.f32.mrb[13].mxu0 }
 0x183   : > { %v1812_v16 = vadd.f32 %v1811_v15, %v1810_v59  ;;  %v1813_v17 = vpop.f32.mrb[14].mxu0 }
 0x184   : > { %v1814_v56 = vpop.f32.mrb[15].mxu0 }
 0x185   : > { %v1197_v5 = vadd.f32 %v1812_v16, %v1698_v0  ;;  %v1815_v21 = vadd.f32 %v1814_v56, %v1813_v17 }
 0x186   : > { %v1878_v23 = vpop.f32.mrb[16].mxu1 }
 0x187   : > { %v1200_v13 = vadd.f32 %v1815_v21, %v1698_v0  ;;  %v1262_v19 = vadd.f32 %v1852_v45, %v1197_v5  ;;  %v1318_v25 = vpop.f32.mrb[17].mxu1 }
 0x188   : > { %v1319_v26 = vadd.f32 %v1318_v25, %v1254_v24  ;;  %v1879_v27 = vpop.f32.mrb[18].mxu1 }
 0x189   : > { %v1327_v28 = vadd.f32 %v1878_v23, %v1262_v19  ;;  %v1265_v29 = vadd.f32 %v1855_v14, %v1200_v13  ;;  %v1874_v31 = vpop.f32.mrb[16].mxu0  ;;  %v1321_v7 = vpop.f32.mrb[19].mxu1 }
 0x18a   : > { %v1337_v32 = vmax.f32 %v1319_v26, 0.0  ;;  %v1311_v33 = vadd.f32 %v1874_v31, %v1246_v61  ;;  %v1322_v35 = vadd.f32 %v1321_v7, %v1257_v12  ;;  %v1302_v36 = vpop.f32.mrb[17].mxu0 }
 0x18b   : > { %v1339_v39 = vmax.f32 %v1327_v28, 0.0  ;;  %v1330_v40 = vadd.f32 %v1879_v27, %v1265_v29  ;;  %v1303_v0 = vadd.f32 %v1302_v36, %v2365_v43  ;;  %v1875_v41 = vpop.f32.mrb[18].mxu0 }
 0x18c   : > { %v1772_v42 = vpack.c.bf16 %v1337_v32, %v1337_v32  ;;  %v1335_v44 = vmax.f32 %v1311_v33, 0.0  ;;  %v1338_v46 = vmax.f32 %v1322_v35, 0.0  ;;  %v1314_v47 = vadd.f32 %v1875_v41, %v1249_v22  ;;  %v1305_v48 = vpop.f32.mrb[19].mxu0 }
 0x18d   : > { %v1774_v50 = vpack.c.bf16 %v1339_v39, %v1339_v39  ;;  %v1340_v51 = vmax.f32 %v1330_v40, 0.0  ;;  %v1333_v52 = vmax.f32 %v1303_v0, 0.0  ;;  %v2371_v53 = vadd.f32 %v1305_v48, %v2367_v49 }
 0x18e   : > { %v1394_v54 = vshrl.u32 %v1772_v42, 16  ;;  %v1397_v55 = vshll.u32 %v1772_v42, 16  ;;  %v1770_v57 = vpack.c.bf16 %v1335_v44, %v1335_v44  ;;  %v1773_v8 = vpack.c.bf16 %v1338_v46, %v1338_v46 }
 0x18f   : > { %v1408_v43 = vshrl.u32 %v1774_v50, 16  ;;  %v1411_v18 = vshll.u32 %v1774_v50, 16  ;;  %v1775_v60 = vpack.c.bf16 %v1340_v51, %v1340_v51  ;;  %v1768_v61 = vpack.c.bf16 %v1333_v52, %v1333_v52 }
 0x190   : > { %v1396_v62 = vrot.slane %v1394_v54, 7  ;;  %v1380_v63 = vshrl.u32 %v1770_v57, 16  ;;  %v1383_v30 = vshll.u32 %v1770_v57, 16  ;;  %v1401_v20 = vshrl.u32 %v1773_v8, 16 }
 0x191   : > { %v1410_v22 = vrot.slane %v1408_v43, 7  ;;  %v1415_v49 = vshrl.u32 %v1775_v60, 16  ;;  %v1418_v2 = vshll.u32 %v1775_v60, 16  ;;  %v1404_v37 = vshll.u32 %v1773_v8, 16 }
 0x192   : > { %v1399_v3 = vor.u32 %v1397_v55, %v1396_v62  ;;  %v1382_v4 = vrot.slane %v1380_v63, 7  ;;  %v1403_v6 = vrot.slane %v1401_v20, 7  ;;  %v1366_v9 = vshrl.u32 %v1768_v61, 16 }
 0x193   : > { %v1413_v10 = vor.u32 %v1411_v18, %v1410_v22  ;;  %v1417_v34 = vrot.slane %v1415_v49, 7  ;;  %v1369_v24 = vshll.u32 %v1768_v61, 16  ;;  %v1336_v45 = vmax.f32 %v1314_v47, 0.0 }
 0x194   : > { %v1436_v58 = vsel %vm2375_vm10, 0, %v1399_v3  ;;  %v1385_v59 = vor.u32 %v1383_v30, %v1382_v4  ;;  %v1406_v11 = vor.u32 %v1404_v37, %v1403_v6  ;;  %v1368_v12 = vrot.slane %v1366_v9, 7 }
 0x195   : > { %v1438_v14 = vsel %vm2375_vm10, 0, %v1413_v10  ;;  %v1447_v15 = vsel %vm2382_vm11, %v1436_v58, 0  ;;  %v1420_v16 = vor.u32 %v1418_v2, %v1417_v34  ;;  %v1771_v17 = vpack.c.bf16 %v1336_v45, %v1336_v45 }
 0x196   : > { %v1449_v56 = vsel %vm2382_vm11, %v1438_v14, 0  ;;  %v1755_v5 = vcombine.low %v1447_v15, %v1447_v15  ;;  %v1756_v21 = vcombine.high %v1447_v15, %v1447_v15  ;;  %v1434_v23 = vsel %vm2375_vm10, 0, %v1385_v59 }
 0x197   : > { %v1759_v13 = vcombine.low %v1449_v56, %v1449_v56  ;;  %v1760_v19 = vcombine.high %v1449_v56, %v1449_v56  ;;  %v1439_v25 = vsel %vm2375_vm10, 0, %v1420_v16  ;;  %v1445_v26 = vsel %vm2382_vm11, %v1434_v23, 0 }
 0x198   : > { %1517 = vst.msk [vmem:[%s2391_s11 + $0x20] sm:$0xf] %vm1507_vm8, %v1755_v5  ;;  %v1450_v27 = vsel %vm2382_vm11, %v1439_v25, 0  ;;  %v1751_v28 = vcombine.low %v1445_v26, %v1445_v26  ;;  %v1752_v29 = vcombine.high %v1445_v26, %v1445_v26  ;;  %v1437_v31 = vsel %vm2375_vm10, 0, %v1406_v11 }
 0x199   : > { %1518 = vst.msk [vmem:[%s2391_s11 + $0x24] sm:$0x1] %vm1509_vm9, %v1756_v21  ;;  %1522 = vst.msk [vmem:[%s2391_s11 + $0x34] sm:$0x1] %vm1509_vm9, %v1760_v19  ;;  %v1761_v7 = vcombine.low %v1450_v27, %v1450_v27  ;;  %v1762_v32 = vcombine.high %v1450_v27, %v1450_v27  ;;  %v1448_v33 = vsel %vm2382_vm11, %v1437_v31, 0  ;;  %v1371_v35 = vor.u32 %v1369_v24, %v1368_v12 }
 0x19a   : > { %1521 = vst.msk [vmem:[%s2391_s11 + $0x30] sm:$0xf] %vm1507_vm8, %v1759_v13  ;;  %1513 = vst.msk [vmem:[%s2391_s11 + $0x10] sm:$0xf] %vm1507_vm8, %v1751_v28  ;;  %v1757_v36 = vcombine.low %v1448_v33, %v1448_v33  ;;  %v1758_v39 = vcombine.high %v1448_v33, %v1448_v33  ;;  %v1387_v40 = vshrl.u32 %v1771_v17, 16  ;;  %v1334_v41 = vmax.f32 %v2371_v53, 0.0 }
 0x19b   : > { %1514 = vst.msk [vmem:[%s2391_s11 + $0x14] sm:$0x1] %vm1509_vm9, %v1752_v29  ;;  %1524 = vst.msk [vmem:[%s2391_s11 + $0x3c] sm:$0x1] %vm1509_vm9, %v1762_v32  ;;  %v1432_v0 = vsel %vm2375_vm10, 0, %v1371_v35  ;;  %v1390_v46 = vshll.u32 %v1771_v17, 16 }
 0x19c   : > { %1523 = vst.msk [vmem:[%s2391_s11 + $0x38] sm:$0xf] %vm1507_vm8, %v1761_v7  ;;  %1519 = vst.msk [vmem:[%s2391_s11 + $0x28] sm:$0xf] %vm1507_vm8, %v1757_v36  ;;  %v1443_v42 = vsel %vm2382_vm11, %v1432_v0, 0  ;;  %v1389_v44 = vrot.slane %v1387_v40, 7  ;;  %v1769_v50 = vpack.c.bf16 %v1334_v41, %v1334_v41 }
 0x19d   : > { %1520 = vst.msk [vmem:[%s2391_s11 + $0x2c] sm:$0x1] %vm1509_vm9, %v1758_v39  ;;  %v1747_v47 = vcombine.low %v1443_v42, %v1443_v42  ;;  %v1748_v48 = vcombine.high %v1443_v42, %v1443_v42 }
 0x19e   : > { %v1392_v51 = vor.u32 %v1390_v46, %v1389_v44  ;;  %v1373_v52 = vshrl.u32 %v1769_v50, 16  ;;  %v1376_v57 = vshll.u32 %v1769_v50, 16 }
 0x19f   : > { %1508 = vst.msk [vmem:[%s2391_s11] sm:$0xf] %vm1507_vm8, %v1747_v47 }
 0x1a0   : > { %1510 = vst.msk [vmem:[%s2391_s11 + $0x4] sm:$0x1] %vm1509_vm9, %v1748_v48  ;;  %v1435_v53 = vsel %vm2375_vm10, 0, %v1392_v51  ;;  %v1375_v55 = vrot.slane %v1373_v52, 7 }
 0x1a1   : > { %v1446_v54 = vsel %vm2382_vm11, %v1435_v53, 0 }
 0x1a2   : > { %v1753_v8 = vcombine.low %v1446_v54, %v1446_v54  ;;  %v1754_v43 = vcombine.high %v1446_v54, %v1446_v54  ;;  %v1378_v18 = vor.u32 %v1376_v57, %v1375_v55 }
 0x1a4   : > { %1515 = vst.msk [vmem:[%s2391_s11 + $0x18] sm:$0xf] %vm1507_vm8, %v1753_v8  ;;  %v1433_v60 = vsel %vm2375_vm10, 0, %v1378_v18 }
 0x1a5   : > { %1516 = vst.msk [vmem:[%s2391_s11 + $0x1c] sm:$0x1] %vm1509_vm9, %v1754_v43  ;;  %v1444_v61 = vsel %vm2382_vm11, %v1433_v60, 0 }
 0x1a6   : > { %v1749_v62 = vcombine.low %v1444_v61, %v1444_v61  ;;  %v1750_v63 = vcombine.high %v1444_v61, %v1444_v61 }
 0x1a8   : > { %1511 = vst.msk [vmem:[%s2391_s11 + $0x8] sm:$0xf] %vm1507_vm8, %v1749_v62 }
 0x1a9   : > { %1512 = vst.msk [vmem:[%s2391_s11 + $0xc] sm:$0x1] %vm1509_vm9, %v1750_v63 }
 0x1aa PF: > { %s15_s20 = sadd.s32 1, %s1983_s20   ;;  %s2477_s18 = smov %s1979_s19 }
 0x1ab   : > { %p12_p5 = scmp.ge.s32.totalorder %s15_s20, 4   ;;  %s2478_s19 = smov %s2480_s1 }
 0x1ad   :  { %14 = sbr.rel (!%p12_p5) target bundleno = 2 (0x2), region = 76 }

// kernel: hu_model_forward.6
= control target key start
LH: loop header
LB: loop body
LE: loop exit
PB: predicated region body
PF: predicated region fallthrough
CT: control target
= control target key end

     0   :  { %s1620_s18 = smov 0   ;;  %s1622_s19 = smov 0   ;;  %s1879_s0 = inlined_call_operand.vmem [shape: bf16[2,8,5,128], index: 0, kind: input, shape index: {}, may-alias: {0,1,2}]   ;;  %s1880_s1 = inlined_call_operand.vmem [shape: bf16[2,8,5,128], index: 1, kind: input, shape index: {}, may-alias: {0,1,2}]   ;;  %s1881_s2 = inlined_call_operand.vmem [shape: bf16[2,8,5,128], index: 2, kind: input, shape index: {}, may-alias: {0,1,2}]   ;;  %s1882_s3 = inlined_call_operand.vmem [shape: bf16[576,64], index: 3, kind: input, shape index: {}]   ;;  %s1883_s4 = inlined_call_operand.vmem [shape: f32[1,64], index: 4, kind: input, shape index: {}]   ;;  %s1884_s5 = inlined_call_operand.vmem [shape: bf16[2,4,6,64], index: 5, kind: output, shape index: {}]  }
   0x1   :  { %s1624_s20 = smov 0  }
   0x2 LB: > { %s27_s1 = sadd.s32 1, %s1579_s19  ;;  %p1379_p0 = scmp.ge.s32.totalorder %s1583_s20, 1  ;;  %s1583_s20 = sphi %s1624_s20, %s15_s20   ;;  %s1579_s19 = sphi %s1622_s19, %s1894_s19   ;;  %s1575_s18 = sphi %s1620_s18, %s1893_s18  }
   0x3   : > { %p29_p1 = scmp.ge.s32.totalorder %s27_s1, 2  ;;  %p270_p2 = scmp.lt.s32.totalorder %s1583_s20, 3 }
   0x5   : > { %s1896_s1 = smov (%p29_p1, %s27_s1), 0  ;;  %p271_p3 = pnand %p1379_p0, %p270_p2 }
   0x6   : > { %p331_p4 = scmp.lt.s32.totalorder (!%p271_p3), %s1575_s18, 1  ;;  %v404_v0 = vlaneseq (!%p271_p3)  ;;  %v1585_v1 = vmov (!%p271_p3), 1983009808   ;;  %vm433_vm0 = vsmask.f32 (!%p271_p3), 1280  ;;  %v1522_v5 = vld [vmem:[%s1882_s3 + $0x40] sm:$0xff] (!%p271_p3)  }
   0x7   : > { %274 = sbr.rel (%p271_p3) target bundleno = 397 (0x18d), region = 40  ;;  %v402_v2 = vunpack.c.l.s4 (!%p271_p3), %v1585_v1  ;;  %vm434_vm1 = vsmask.f32 (!%p271_p3), 3336  ;;  %vm436_vm2 = vsmask.f32 (!%p271_p3), 5392  ;;  %v1523_v6 = vld [vmem:[%s1882_s3] sm:$0xff] (!%p271_p3)   ;;  %1430 = vmatprep.subr.bf16.mxu0 (!%p271_p3), %v1522_v5 }
   0x8   : > { %v405_v3 = vshrl.u32 (!%p271_p3), %v404_v0, 7  ;;  %vm438_vm3 = vsmask.f32 (!%p271_p3), 7448  ;;  %v1524_v8 = vld [vmem:[%s1882_s3 + $0x48] sm:$0xff] (!%p271_p3)   ;;  %1431 = vmatpush3.bf16.msra.mxu0 (!%p271_p3), %v1523_v6  ;;  %v1526_v24 = vld [vmem:[%s1882_s3 + $0x50] sm:$0xff] (!%p271_p3)   ;;  %vm1676_vm4 = vmor (!%p271_p3), %vm433_vm0, %vm434_vm1  ;;  %s1586_s23 = smov (!%p271_p3), 64  }
   0x9   : > { %v403_v4 = vunpack.c.0.s8 (!%p271_p3), %v402_v2  ;;  %1432 = vmatprep.subr.bf16.mxu0 (!%p271_p3), %v1524_v8  ;;  %v1525_v19 = vld [vmem:[%s1882_s3 + $0x8] sm:$0xff] (!%p271_p3)   ;;  %v1527_v25 = vld [vmem:[%s1882_s3 + $0x10] sm:$0xff] (!%p271_p3)   ;;  %v1528_v31 = vld [vmem:[%s1882_s3 + $0xc0] sm:$0xff] (!%p271_p3)   ;;  %v1587_v6 = vmov (!%p271_p3), 0   ;;  %vm717_vm7 = vcmask (!%p271_p3), 523264   ;;  %vm1589_vm8 = vmmov (!%p271_p3), 0  }
   0xa   : > { %1452 = vmatprep.subr.bf16.mxu1 (!%p271_p3), %v1528_v31  ;;  %vm1687_vm5 = vmor (!%p271_p3), %vm1676_vm4, %vm436_vm2  ;;  %v1529_v45 = vld [vmem:[%s1882_s3 + $0x58] sm:$0xff] (!%p271_p3)   ;;  %v1530_v54 = vld [vmem:[%s1882_s3 + $0x80] sm:$0xff] (!%p271_p3)   ;;  %vm1233_vm9 = vcmask (!%p271_p3), 1040384   ;;  %vm1234_vm10 = vsmask.f32 (!%p271_p3), 256  ;;  %vm1240_vm11 = vcmask (!%p271_p3), 1042432  }
   0xb   : > { %v1652_v7 = vsub.s32 (!%p271_p3), %v403_v4, %v405_v3  ;;  %v1531_v55 = vld [vmem:[%s1882_s3 + $0x18] sm:$0xff] (!%p271_p3)   ;;  %vm1704_vm6 = vmor (!%p271_p3), %vm1687_vm5, %vm438_vm3  ;;  %1453 = vmatpush3.bf16.msra.mxu1 (!%p271_p3), %v1530_v54  ;;  %v1532_v0 = vld [vmem:[%s1882_s3 + $0xc8] sm:$0xff] (!%p271_p3)   ;;  %vm1241_vm12 = vsmask.f32 (!%p271_p3), 2304  ;;  %vm1247_vm15 = vcmask (!%p271_p3), 518144  }
   0xc   : > { %1433 = vmatpush3.bf16.msra.mxu0 (!%p271_p3), %v1525_v19  ;;  %1454 = vmatprep.subr.bf16.mxu1 (!%p271_p3), %v1532_v0  ;;  %v1533_v5 = vld [vmem:[%s1882_s3 + $0x60] sm:$0xff] (!%p271_p3)   ;;  %v1542_v30 = vld [vmem:[%s1882_s3 + $0x98] sm:$0xff] (!%p271_p3)   ;;  %v1554_v59 = vld [vmem:[%s1882_s3 + $0x108] sm:$0xff] (!%p271_p3)  }
   0xd   : > { %1434 = vmatprep.subr.bf16.mxu0 (!%p271_p3), %v1526_v24  ;;  %v407_v8 = vrot.slane (!%p271_p3), %v1587_v6, %v1652_v7  ;;  %vm1854_vm13 = vmand (!%p271_p3), %vm1233_vm9, %vm1234_vm10 }
   0xe   : > { %s1898_s18 = smov (!%p331_p4, %s1575_s18), 1  ;;  %vm1242_vm14 = vmand %vm1240_vm11, %vm1241_vm12 }
   0xf   : > { %s1427_s22 = sshll.u32 %s1898_s18, 5  ;;  %s1429_s7 = sshll.u32 %s1898_s18, 4 }
  0x10   : > { %s1650_s27 = scalar_lea.vmem %s1879_s0, %s1427_s22  ;;  %1435 = vmatpush3.bf16.msra.mxu0 %v1527_v25  ;;  %v1540_v25 = vld [vmem:[%s1882_s3 + $0xd8] sm:$0xff]   ;;  %s380_s9 = scalar_lea.vmem %s1884_s5, %s1429_s7 }
  0x11   : > { %v389_v9 = vld [vmem:[%s1650_s27] sm:$0x7]  ;;  %v391_v10 = vld [vmem:[%s1650_s27 + $0x8] sm:$0x7]  ;;  %v393_v11 = vld [vmem:[%s1650_s27 + $0x10] sm:$0x7]  ;;  %1436 = vmatprep.subr.bf16.mxu0 %v1529_v45 }
  0x12   : > { %v395_v12 = vld [vmem:[%s1650_s27 + $0x18] sm:$0x7]  ;;  %v514_v13 = vrot.slane %v391_v10, %v1652_v7  ;;  %v522_v14 = vrot.slane %v393_v11, %v1652_v7  ;;  %v645_v16 = vcombine.low %v389_v9, %v391_v10  ;;  %v506_v18 = vrot.slane %v389_v9, %v1652_v7  ;;  %v1534_v10 = vld [vmem:[%s1882_s3 + $0x88] sm:$0xff]  }
  0x13   : > { %v530_v15 = vrot.slane %v395_v12, %v1652_v7  ;;  %v646_v17 = vcombine.low %v393_v11, %v395_v12  ;;  %1455 = vmatpush3.bf16.msra.mxu1 %v1534_v10 }
  0x14   : > { %v515_v20 = vcombine.high %v514_v13, %v514_v13  ;;  %v523_v21 = vcombine.high %v522_v14, %v522_v14  ;;  %v547_v22 = vshrl.u32 %v514_v13, 16  ;;  %v550_v23 = vshll.u32 %v514_v13, 16  ;;  %1437 = vmatpush3.bf16.msra.mxu0 %v1531_v55 }
  0x15   : > { %v531_v26 = vcombine.high %v530_v15, %v530_v15  ;;  %v561_v27 = vshrl.u32 %v522_v14, 16  ;;  %v564_v28 = vshll.u32 %v522_v14, 16  ;;  %v575_v29 = vshrl.u32 %v530_v15, 16  ;;  %1438 = vmatprep.subr.bf16.mxu0 %v1533_v5  ;;  %v1535_v14 = vld [vmem:[%s1882_s3 + $0x20] sm:$0xff]  }
  0x16   : > { %v549_v32 = vrot.slane %v547_v22, 6  ;;  %v552_v33 = vrot.slane %v550_v23, 7  ;;  %v556_v34 = vshll.u32 %v515_v20, 16  ;;  %v570_v35 = vshll.u32 %v523_v21, 16  ;;  %v1538_v21 = vld [vmem:[%s1882_s3 + $0x90] sm:$0xff]   ;;  %v1539_v23 = vld [vmem:[%s1882_s3 + $0x28] sm:$0xff]  }
  0x17   : > { %v563_v36 = vrot.slane %v561_v27, 6  ;;  %v566_v37 = vrot.slane %v564_v28, 7  ;;  %v577_v38 = vrot.slane %v575_v29, 6  ;;  %v578_v39 = vshll.u32 %v530_v15, 16  ;;  %v1536_v15 = vld [vmem:[%s1882_s3 + $0xd0] sm:$0xff]  }
  0x18   : > { %v558_v40 = vrot.slane %v556_v34, 7  ;;  %v572_v41 = vrot.slane %v570_v35, 7  ;;  %v584_v42 = vshll.u32 %v531_v26, 16  ;;  %v653_v43 = vrot.slane %v645_v16, %v1652_v7  ;;  %1439 = vmatpush3.bf16.msra.mxu0 %v1535_v14  ;;  %1456 = vmatprep.subr.bf16.mxu1 %v1536_v15  ;;  %v1541_v27 = vld [vmem:[%s1882_s3 + $0x70] sm:$0xff]   ;;  %v1545_v35 = vld [vmem:[%s1882_s3 + $0x78] sm:$0xff]  }
  0x19   : > { %v580_v46 = vrot.slane %v578_v39, 7  ;;  %v660_v47 = vrot.slane %v646_v17, %v1652_v7  ;;  %v507_v48 = vcombine.high %v506_v18, %v506_v18  ;;  %v533_v49 = vshrl.u32 %v506_v18, 16  ;;  %v1537_v17 = vld [vmem:[%s1882_s3 + $0x68] sm:$0xff]   ;;  %1457 = vmatpush3.bf16.msra.mxu1 %v1538_v21 }
  0x1a   : > { %v586_v50 = vrot.slane %v584_v42, 7  ;;  %v536_v51 = vshll.u32 %v506_v18, 16  ;;  %v553_v52 = vor.u32 %v552_v33, %v549_v32  ;;  %v567_v53 = vor.u32 %v566_v37, %v563_v36  ;;  %1440 = vmatprep.subr.bf16.mxu0 %v1537_v17  ;;  %1458 = vmatprep.subr.bf16.mxu1 %v1540_v25  ;;  %v1543_v32 = vld [vmem:[%s1882_s3 + $0x30] sm:$0xff]   ;;  %v1544_v33 = vld [vmem:[%s1882_s3 + $0xe0] sm:$0xff]   ;;  %v1548_v39 = vld [vmem:[%s1882_s3 + $0xe8] sm:$0xff]  }
  0x1b   : > { %v661_v56 = vcombine.low %v653_v43, %v660_v47  ;;  %v535_v57 = vrot.slane %v533_v49, 6  ;;  %v542_v58 = vshll.u32 %v507_v48, 16  ;;  %v581_v60 = vor.u32 %v580_v46, %v577_v38  ;;  %v1546_v36 = vld [vmem:[%s1882_s3 + $0xa0] sm:$0xff]   ;;  %v1547_v38 = vld [vmem:[%s1882_s3 + $0x38] sm:$0xff]   ;;  %v392_v42 = vld [vmem:[%s1650_s27 + $0xc] sm:$0x7] }
  0x1c   : > { %v538_v61 = vrot.slane %v536_v51, 7  ;;  %v554_v62 = vrot.slane %v553_v52, 2  ;;  %v568_v63 = vrot.slane %v567_v53, 2  ;;  %v441_v18 = vshrl.u32 %v407_v8, 16  ;;  %1441 = vmatpush3.bf16.msra.mxu0 %v1539_v23  ;;  %v1777_v43 = vld [vmem:[%s1650_s27 + $0x14] sm:$0x7] }
  0x1d   : > { %662 = vrot.lane.b32.xlu0 %v661_v56, %s1586_s23  ;;  %v582_v1 = vrot.slane %v581_v60, 2  ;;  %v544_v2 = vrot.slane %v542_v58, 7  ;;  %v444_v22 = vshll.u32 %v407_v8, 16  ;;  %v408_v26 = vcombine.high %v407_v8, %v407_v8  ;;  %1442 = vmatprep.subr.bf16.mxu0 %v1541_v27  ;;  %v1549_v49 = vld [vmem:[%s1882_s3 + $0xa8] sm:$0xff]   ;;  %v1552_v56 = vld [vmem:[%s1882_s3 + $0xf0] sm:$0xff]   ;;  %v1556_v23 = vld [vmem:[%s1882_s3 + $0xb8] sm:$0xff]  }
  0x1e   : > { %v539_v3 = vor.u32 %v538_v61, %v535_v57  ;;  %v573_v4 = vsel %vm1704_vm6, %v568_v63, %v572_v41  ;;  %v559_v12 = vsel %vm1704_vm6, %v554_v62, %v558_v40  ;;  %v443_v28 = vrot.slane %v441_v18, 6  ;;  %1459 = vmatpush3.bf16.msra.mxu1 %v1542_v30  ;;  %v1773_v40 = vld [vmem:[%s1650_s27 + $0x4] sm:$0x7] }
  0x1f   : > { %v587_v9 = vsel %vm1704_vm6, %v582_v1, %v586_v50  ;;  %v446_v31 = vrot.slane %v444_v22, 7  ;;  %v450_v34 = vshll.u32 %v408_v26, 16  ;;  %1460 = vmatprep.subr.bf16.mxu1 %v1544_v33  ;;  %v415_v44 = vrot.slane %v1773_v40, %v1652_v7 }
  0x20   : > { %v540_v11 = vrot.slane %v539_v3, 2  ;;  %v665_v13 = vcombine.low %v573_v4, %v587_v9  ;;  %1443 = vmatpush3.bf16.msra.mxu0 %v1543_v32  ;;  %v611_v45 = vcombine.low %v1587_v6, %v1773_v40  ;;  %v423_v46 = vrot.slane %v392_v42, %v1652_v7 }
  0x21   : > { %v447_v37 = vor.u32 %v446_v31, %v443_v28  ;;  %1444 = vmatprep.subr.bf16.mxu0 %v1545_v35  ;;  %v452_v41 = vrot.slane %v450_v34, 7  ;;  %v431_v47 = vrot.slane %v1777_v43, %v1652_v7  ;;  %v1588_v50 = vmov 0.0  }
  0x22   : > { %v545_v16 = vsel %vm1704_vm6, %v540_v11, %v544_v2  ;;  %v679_v20 = vrot.slane %v665_v13, %v1652_v7  ;;  %1461 = vmatpush3.bf16.msra.mxu1 %v1546_v36  ;;  %v612_v51 = vcombine.low %v392_v42, %v1777_v43  ;;  %v416_v52 = vcombine.high %v415_v44, %v415_v44  ;;  %v1553_v11 = vld [vmem:[%s1882_s3 + $0xb0] sm:$0xff]  }
  0x23   : > { %v664_v19 = vcombine.low %v545_v16, %v559_v12  ;;  %1462 = vmatprep.subr.bf16.mxu1 %v1548_v39  ;;  %v448_v48 = vrot.slane %v447_v37, 2  ;;  %v455_v53 = vshrl.u32 %v415_v44, 16  ;;  %v458_v54 = vshll.u32 %v415_v44, 16  ;;  %v1555_v16 = vld [vmem:[%s1882_s3 + $0xf8] sm:$0xff]  }
  0x24   : > { %1445 = vmatpush3.bf16.msra.mxu0 %v1547_v38  ;;  %v619_v55 = vrot.slane %v611_v45, %v1652_v7  ;;  %v424_v57 = vcombine.high %v423_v46, %v423_v46  ;;  %v432_v58 = vcombine.high %v431_v47, %v431_v47  ;;  %v469_v60 = vshrl.u32 %v423_v46, 16 }
  0x25   : > { %v672_v24 = vrot.slane %v664_v19, %v1652_v7  ;;  %1479 = vmatprep.subr.bf16.mxu0 %v1588_v50  ;;  %v472_v61 = vshll.u32 %v423_v46, 16  ;;  %v457_v62 = vrot.slane %v455_v53, 6  ;;  %v460_v63 = vrot.slane %v458_v54, 7 }
  0x26   : > { %1463 = vmatpush3.bf16.msra.mxu1 %v1549_v49  ;;  %v464_v0 = vshll.u32 %v416_v52, 16  ;;  %v483_v1 = vshrl.u32 %v431_v47, 16  ;;  %v471_v2 = vrot.slane %v469_v60, 6  ;;  %v478_v4 = vshll.u32 %v424_v57, 16  ;;  %v1551_v57 = vld [vmem:[%s1882_s3 + $0x100] sm:$0xff]   ;;  %v1557_v60 = vld [vmem:[%s1882_s3 + $0x110] sm:$0xff]  }
  0x27   : > { %v680_v29 = vcombine.low %v672_v24, %v679_v20  ;;  %1464 = vmatprep.subr.bf16.mxu1 %v1552_v56  ;;  %v474_v3 = vrot.slane %v472_v61, 7  ;;  %v486_v5 = vshll.u32 %v431_v47, 16  ;;  %v461_v6 = vor.u32 %v460_v63, %v457_v62  ;;  %v1560_v62 = vld [vmem:[%s1882_s3 + $0x118] sm:$0xff]  }
  0x28   : > { %v466_v8 = vrot.slane %v464_v0, 7  ;;  %v485_v9 = vrot.slane %v483_v1, 6  ;;  %v492_v10 = vshll.u32 %v432_v58, 16  ;;  %v480_v13 = vrot.slane %v478_v4, 7 }
  0x29   : > { %681 = vrot.lane.b32.xlu0 %v680_v29, %s1586_s23  ;;  %v475_v12 = vor.u32 %v474_v3, %v471_v2  ;;  %v488_v14 = vrot.slane %v486_v5, 7  ;;  %v626_v15 = vrot.slane %v612_v51, %v1652_v7  ;;  %v453_v17 = vsel %vm1704_vm6, %v448_v48, %v452_v41  ;;  %v396_v29 = vld [vmem:[%s1650_s27 + $0x1c] sm:$0x7] }
  0x2a   : > { %v462_v18 = vrot.slane %v461_v6, 2  ;;  %v494_v19 = vrot.slane %v492_v10, 7  ;;  %1465 = vmatpush3.bf16.msra.mxu1 %v1553_v11  ;;  %v683_v24 = vcombine.low %v1773_v40, %v392_v42  ;;  %v595_v31 = vrot.slane %v396_v29, %v1652_v7  ;;  %v1386_v6 = vld [vmem:[%s1883_s4] ss:$0 sm:$0xff] }
  0x2b   : > { %v476_v20 = vrot.slane %v475_v12, 2  ;;  %v489_v21 = vor.u32 %v488_v14, %v485_v9  ;;  %v627_v22 = vcombine.low %v619_v55, %v626_v15  ;;  %1466 = vmatprep.subr.bf16.mxu1 %v1555_v16  ;;  %v684_v32 = vcombine.low %v1777_v43, %v396_v29 }
  0x2c   : > { %v467_v25 = vsel %vm1704_vm6, %v462_v18, %v466_v8  ;;  %v691_v34 = vrot.slane %v683_v24, %v1652_v7  ;;  %v596_v37 = vcombine.high %v595_v31, %v595_v31  ;;  %v598_v38 = vshrl.u32 %v595_v31, 16 }
  0x2d   : > { %v481_v26 = vsel %vm1704_vm6, %v476_v20, %v480_v13  ;;  %v490_v27 = vrot.slane %v489_v21, 2  ;;  %v628_v28 = vcombine.low %v453_v17, %v467_v25  ;;  %v601_v39 = vshll.u32 %v595_v31, 16 }
  0x2e   : > { %v700_v30 = vcombine.low %v467_v25, %v481_v26  ;;  %1467 = vmatpush3.bf16.msra.mxu1 %v1556_v23  ;;  %v698_v40 = vrot.slane %v684_v32, %v1652_v7  ;;  %v600_v42 = vrot.slane %v598_v38, 6  ;;  %v607_v44 = vshll.u32 %v596_v37, 16 }
  0x2f   : > { %v495_v33 = vsel %vm1704_vm6, %v490_v27, %v494_v19  ;;  %v636_v36 = vrot.slane %v628_v28, %v1652_v7  ;;  %v603_v45 = vrot.slane %v601_v39, 7 }
  0x30   : > { %v629_v35 = vcombine.low %v481_v26, %v495_v33  ;;  %v699_v46 = vcombine.low %v691_v34, %v698_v40  ;;  %v609_v48 = vrot.slane %v607_v44, 7  ;;  %v708_v52 = vrot.slane %v700_v30, %v1652_v7 }
  0x31   : > { %v604_v47 = vor.u32 %v603_v45, %v600_v42 }
  0x32   : > { %v643_v41 = vrot.slane %v629_v35, %v1652_v7  ;;  %1102 = vmatprep.mubr.bf16.mxu1 %v699_v46 }
  0x33   : > { %v605_v49 = vrot.slane %v604_v47, 2 }
  0x34   : > { %v644_v43 = vcombine.low %v636_v36, %v643_v41 }
  0x35   : > { %v610_v51 = vsel %vm1704_vm6, %v605_v49, %v609_v48 }
  0x36   : > { %v701_v53 = vcombine.low %v495_v33, %v610_v51 }
  0x38   : > { %v715_v54 = vrot.slane %v701_v53, %v1652_v7 }
  0x3a   : > { %v716_v55 = vcombine.low %v708_v52, %v715_v54 }
  0x8f   : > { %v663_v56 = vpop.permute.xlu0 %662 }
  0x90   : > { %v723_v58 = vsel %vm717_vm7, %v644_v43, %v663_v56 }
  0x91   : > { %1061 = vmatprep.mubr.bf16.mxu0 %v723_v58 }
  0x92   : > { %1062 = vmatmul.mubr.bf16.vlgmr.msra.gmra.mrb[0].mxu0 %v627_v22 }
  0x93   : > { %1480 = vmatpush3.bf16.msra.mxu0 %v1551_v57  ;;  %1487 = vmatprep.mubr.msk.bf16.mxu0 %vm1589_vm8, %v1588_v50 }
  0x94   : > { %1481 = vmatprep.subr.bf16.mxu0 %v1588_v50 }
  0x97   : > { %1482 = vmatpush3.bf16.msra.mxu0 %v1554_v59 }
  0x98   : > { %1483 = vmatprep.subr.bf16.mxu0 %v1588_v50 }
  0x9b   : > { %1484 = vmatpush3.bf16.msra.mxu0 %v1557_v60  ;;  %v682_v61 = vpop.permute.xlu0 %681 }
  0x9c   : > { %v726_v63 = vsel %vm717_vm7, %v663_v56, %v682_v61  ;;  %1485 = vmatprep.subr.bf16.mxu0 %v1588_v50 }
  0x9d   : > { %1103 = vmatmul.mubr.bf16.vlgmr.msra.gmra.mrb[0].mxu1 %v726_v63 }
  0x9f   : > { %1486 = vmatpush3.bf16.msra.mxu0 %v1560_v62 }
  0xa2   : > { %1488 = vmatmul.mubr.msk.bf16.vlgmr.msra.gmra.mrb[4].mxu0 %vm717_vm7, %v716_v55 }
 0x165   : > { %v1446_v0 = vpop.f32.mrb[0].mxu0 }
 0x166   : > { %v1447_v1 = vpop.f32.mrb[1].mxu0 }
 0x167   : > { %v1448_v2 = vadd.f32 %v1447_v1, %v1446_v0  ;;  %v1449_v3 = vpop.f32.mrb[2].mxu0 }
 0x168   : > { %v1450_v4 = vpop.f32.mrb[3].mxu0 }
 0x169   : > { %v1451_v5 = vadd.f32 %v1450_v4, %v1449_v3  ;;  %v1064_v10 = vadd.f32 %v1448_v2, %v1386_v6 }
 0x16b   : > { %v1067_v13 = vadd.f32 %v1451_v5, %v1386_v6 }
 0x170   : > { %v1468_v8 = vpop.f32.mrb[0].mxu1 }
 0x171   : > { %v1469_v9 = vpop.f32.mrb[1].mxu1 }
 0x172   : > { %v1470_v11 = vadd.f32 %v1469_v9, %v1468_v8  ;;  %v1471_v12 = vpop.f32.mrb[2].mxu1 }
 0x173   : > { %v1472_v50 = vpop.f32.mrb[3].mxu1 }
 0x174   : > { %v1473_v14 = vadd.f32 %v1472_v50, %v1471_v12  ;;  %v1105_v15 = vadd.f32 %v1470_v11, %v1064_v10 }
 0x175   : > { %v1145_v16 = vpop.f32.mrb[4].mxu0 }
 0x176   : > { %v1146_v17 = vadd.f32 %v1145_v16, %v1105_v15  ;;  %v1489_v18 = vpop.f32.mrb[5].mxu0  ;;  %v1108_v19 = vadd.f32 %v1473_v14, %v1067_v13 }
 0x177   : > { %v1148_v20 = vpop.f32.mrb[6].mxu0 }
 0x178   : > { %v1149_v21 = vadd.f32 %v1148_v20, %v1108_v19  ;;  %v1490_v22 = vpop.f32.mrb[7].mxu0  ;;  %v1152_v23 = vmax.f32 %v1146_v17, 0.0 }
 0x17a   : > { %v1153_v24 = vmax.f32 %v1149_v21, 0.0 }
 0x17c   : > { %v1154_v25 = vpack.c.bf16 %v1153_v24, %v1152_v23  ;;  %v1424_v26 = vpack.c.bf16 %v1153_v24, %v1153_v24 }
 0x17e   : > { %v1163_v27 = vrot.slane %v1154_v25, %v1652_v7  ;;  %v1170_v28 = vrot.slane %v1424_v26, %v1652_v7 }
 0x180   : > { %v1171_v29 = vcombine.high %v1163_v27, %v1163_v27  ;;  %v1172_v30 = vcombine.high %v1170_v28, %v1170_v28  ;;  %v1179_v31 = vrot.slane %v1163_v27, %v1652_v7  ;;  %v1193_v32 = vrot.slane %v1170_v28, %v1652_v7 }
 0x182   : > { %v1186_v33 = vrot.slane %v1171_v29, %v1652_v7  ;;  %v1200_v34 = vrot.slane %v1172_v30, %v1652_v7  ;;  %v1202_v35 = vshrl.u32 %v1179_v31, 16  ;;  %v1216_v36 = vshrl.u32 %v1193_v32, 16 }
 0x183   : > { %v1205_v38 = vshll.u32 %v1179_v31, 16  ;;  %v1219_v44 = vshll.u32 %v1193_v32, 16 }
 0x184   : > { %v1204_v37 = vrot.slane %v1202_v35, 7  ;;  %v1209_v39 = vshrl.u32 %v1186_v33, 16  ;;  %v1223_v40 = vshrl.u32 %v1200_v34, 16  ;;  %v1212_v41 = vshll.u32 %v1186_v33, 16 }
 0x185   : > { %v1218_v42 = vrot.slane %v1216_v36, 7  ;;  %v1226_v47 = vshll.u32 %v1200_v34, 16 }
 0x186   : > { %v1207_v46 = vor.u32 %v1205_v38, %v1204_v37  ;;  %v1211_v7 = vrot.slane %v1209_v39, 7  ;;  %v1225_v43 = vrot.slane %v1223_v40, 7 }
 0x187   : > { %v1221_v48 = vor.u32 %v1219_v44, %v1218_v42 }
 0x188   : > { %v1214_v49 = vor.u32 %v1212_v41, %v1211_v7  ;;  %v1228_v51 = vor.u32 %v1226_v47, %v1225_v43  ;;  %v1236_v52 = vsel %vm1854_vm13, 0, %v1207_v46 }
 0x189   : > { %v1238_v53 = vsel %vm1854_vm13, 0, %v1221_v48  ;;  %v1243_v54 = vsel %vm1242_vm14, %v1236_v52, 0 }
 0x18a   : > { %v1237_v55 = vsel %vm1854_vm13, 0, %v1214_v49  ;;  %v1239_v56 = vsel %vm1854_vm13, 0, %v1228_v51  ;;  %v1245_v57 = vsel %vm1242_vm14, %v1238_v53, 0  ;;  %1248 = vst.msk [vmem:[%s380_s9] sm:$0x7] %vm1247_vm15, %v1243_v54 }
 0x18b   : > { %v1244_v58 = vsel %vm1242_vm14, %v1237_v55, 0  ;;  %v1246_v59 = vsel %vm1242_vm14, %v1239_v56, 0  ;;  %1250 = vst.msk [vmem:[%s380_s9 + $0x8] sm:$0x7] %vm1247_vm15, %v1245_v57 }
 0x18c   : > { %1249 = vst.msk [vmem:[%s380_s9 + $0x4] sm:$0x7] %vm1247_vm15, %v1244_v58  ;;  %1251 = vst.msk [vmem:[%s380_s9 + $0xc] sm:$0x7] %vm1247_vm15, %v1246_v59 }
 0x18d PF: > { %s15_s20 = sadd.s32 1, %s1583_s20   ;;  %s1893_s18 = smov %s1579_s19 }
 0x18e   : > { %p12_p5 = scmp.ge.s32.totalorder %s15_s20, 4   ;;  %s1894_s19 = smov %s1896_s1 }
 0x190   :  { %14 = sbr.rel (!%p12_p5) target bundleno = 2 (0x2), region = 76 }

// kernel: hu_model_forward.7
= control target key start
LH: loop header
LB: loop body
LE: loop exit
PB: predicated region body
PF: predicated region fallthrough
CT: control target
= control target key end

     0   :  { %s1984_s24 = smov 0   ;;  %s1986_s1 = smov 0   ;;  %s2523_s0 = inlined_call_operand.vmem [shape: bf16[2,4,6,64], index: 0, kind: input, shape index: {}, may-alias: {0,1,2}]   ;;  %s2524_s1 = inlined_call_operand.vmem [shape: bf16[2,4,6,64], index: 1, kind: input, shape index: {}, may-alias: {0,1,2}]   ;;  %s2525_s2 = inlined_call_operand.vmem [shape: bf16[2,4,6,64], index: 2, kind: input, shape index: {}, may-alias: {0,1,2}]   ;;  %s2526_s3 = inlined_call_operand.vmem [shape: bf16[576,192], index: 3, kind: input, shape index: {}]   ;;  %s2527_s4 = inlined_call_operand.vmem [shape: f32[1,192], index: 4, kind: input, shape index: {}]   ;;  %s2528_s5 = inlined_call_operand.vmem [shape: bf16[192,7], index: 5, kind: input, shape index: {}]   ;;  %s2529_s6 = inlined_call_operand.vmem [shape: f32[1,7], index: 6, kind: input, shape index: {}]   ;;  %s2530_s7 = inlined_call_operand.vmem [shape: f32[2,4,4,7], index: 7, kind: output, shape index: {}]  }
   0x1   :  { %s1988_s2 = smov 0  }
   0x2 LB: > { %s29_s25 = sadd.s32 1, %s1935_s1  ;;  %p1646_p0 = scmp.ge.s32.totalorder %s1939_s2, 1  ;;  %s1939_s2 = sphi %s1988_s2, %s17_s2   ;;  %s1935_s1 = sphi %s1986_s1, %s2544_s1   ;;  %s1931_s24 = sphi %s1984_s24, %s2543_s24  }
   0x3   : > { %p31_p1 = scmp.ge.s32.totalorder %s29_s25, 2  ;;  %p320_p2 = scmp.lt.s32.totalorder %s1939_s2, 3 }
   0x5   : > { %s2546_s25 = smov (%p31_p1, %s29_s25), 0  ;;  %p321_p3 = pnand %p1646_p0, %p320_p2 }
   0x6   : > { %p385_p4 = scmp.lt.s32.totalorder (!%p321_p3), %s1931_s24, 1  ;;  %v456_v0 = vlaneseq (!%p321_p3)  ;;  %v1941_v1 = vmov (!%p321_p3), 1983009808   ;;  %vm485_vm0 = vsmask.f32 (!%p321_p3), 1280  ;;  %vm548_vm4 = vcmask (!%p321_p3), 1040384  }
   0x7   : > { %324 = sbr.rel (%p321_p3) target bundleno = 617 (0x269), region = 48  ;;  %v454_v2 = vunpack.c.l.s4 (!%p321_p3), %v1941_v1  ;;  %vm486_vm1 = vsmask.f32 (!%p321_p3), 3336  ;;  %vm488_vm2 = vsmask.f32 (!%p321_p3), 5392  ;;  %vm549_vm5 = vcmask (!%p321_p3), 1042434  }
   0x8   : > { %v2004_v3 = vshrl.u32 (!%p321_p3), %v456_v0, 7  ;;  %v1796_v5 = vld [vmem:[%s2526_s3 + $0x104] ss:$8 sps:$4 sm:$0xff] (!%p321_p3)   ;;  %vm490_vm3 = vsmask.f32 (!%p321_p3), 7448  ;;  %v1942_v12 = vmov (!%p321_p3), 0   ;;  %vm2049_vm7 = vmor (!%p321_p3), %vm485_vm0, %vm486_vm1 }
   0x9   : > { %v455_v4 = vunpack.c.0.s8 (!%p321_p3), %v454_v2  ;;  %v1798_v6 = vld [vmem:[%s2526_s3 + $0x100] ss:$8 sps:$4 sm:$0xff] (!%p321_p3)   ;;  %1269 = vmatprep.subr.bf16.mxu0 (!%p321_p3), %v1796_v5  ;;  %v1799_v8 = vld [vmem:[%s2526_s3 + $0x114] ss:$8 sps:$4 sm:$0xff] (!%p321_p3)   ;;  %vm551_vm6 = vcmask (!%p321_p3), 1044484   ;;  %vm553_vm8 = vcmask (!%p321_p3), 1046534   ;;  %vm2097_vm9 = vmor (!%p321_p3), %vm2049_vm7, %vm488_vm2 }
   0xa   : > { %1270 = vmatpush1.bf16.msra.mxu0 (!%p321_p3), %v1798_v6  ;;  %v1801_v17 = vld [vmem:[%s2526_s3 + $0x110] ss:$8 sps:$4 sm:$0xff] (!%p321_p3)   ;;  %v1802_v27 = vld [vmem:[%s2526_s3 + $0x124] ss:$8 sps:$4 sm:$0xff] (!%p321_p3)   ;;  %v1804_v28 = vld [vmem:[%s2526_s3 + $0x120] ss:$8 sps:$4 sm:$0xff] (!%p321_p3)  }
   0xb   : > { %v2019_v7 = vsub.s32 (!%p321_p3), %v455_v4, %v2004_v3  ;;  %1271 = vmatprep.subr.bf16.mxu0 (!%p321_p3), %v1799_v8  ;;  %v1805_v37 = vld [vmem:[%s2526_s3 + $0x4] ss:$8 sps:$4 sm:$0xff] (!%p321_p3)   ;;  %v1807_v43 = vld [vmem:[%s2526_s3] ss:$8 sps:$4 sm:$0xff] (!%p321_p3)   ;;  %vm2107_vm10 = vmor (!%p321_p3), %vm548_vm4, %vm549_vm5  ;;  %s1943_s19 = smov (!%p321_p3), 64   ;;  %vm762_vm14 = vcmask (!%p321_p3), 523264  }
   0xc   : > { %1226 = vmatprep.subr.bf16.mxu1 (!%p321_p3), %v1805_v37  ;;  %v1808_v53 = vld [vmem:[%s2526_s3 + $0x134] ss:$8 sps:$4 sm:$0xff] (!%p321_p3)   ;;  %v1810_v54 = vld [vmem:[%s2526_s3 + $0x130] ss:$8 sps:$4 sm:$0xff] (!%p321_p3)   ;;  %vm2125_vm11 = vmor (!%p321_p3), %vm2097_vm9, %vm490_vm3  ;;  %vm1514_vm15 = vcmask (!%p321_p3), 52224  }
   0xd   : > { %v2032_v13 = vrot.slane (!%p321_p3), %v1942_v12, %v2019_v7  ;;  %1227 = vmatpush1.bf16.msra.mxu1 (!%p321_p3), %v1807_v43  ;;  %v1811_v60 = vld [vmem:[%s2526_s3 + $0x14] ss:$8 sps:$4 sm:$0xff] (!%p321_p3)   ;;  %v1813_v61 = vld [vmem:[%s2526_s3 + $0x10] ss:$8 sps:$4 sm:$0xff] (!%p321_p3)   ;;  %vm2142_vm12 = vmor (!%p321_p3), %vm2107_vm10, %vm551_vm6 }
   0xe   : > { %s2548_s24 = smov (!%p385_p4, %s1931_s24), 1  ;;  %1272 = vmatpush1.bf16.msra.mxu0 %v1801_v17  ;;  %1228 = vmatprep.subr.bf16.mxu1 %v1811_v60  ;;  %v1814_v17 = vld [vmem:[%s2526_s3 + $0x144] ss:$8 sps:$4 sm:$0xff]   ;;  %vm2169_vm13 = vmor %vm2142_vm12, %vm553_vm8 }
   0xf   : > { %s1750_s28 = sshll.u32 %s2548_s24, 4  ;;  %v2067_v23 = vcombine.high %v2032_v13, %v2032_v13  ;;  %v493_v26 = vshrl.u32 %v2032_v13, 16  ;;  %v496_v29 = vshll.u32 %v2032_v13, 16  ;;  %1273 = vmatprep.subr.bf16.mxu0 %v1802_v27  ;;  %v1829_v55 = vld [vmem:[%s2526_s3 + $0x44] ss:$8 sps:$4 sm:$0xff]  }
  0x10   : > { %s392_s10 = scalar_lea.vmem %s2523_s0, %s1750_s28  ;;  %s434_s22 = scalar_lea.vmem %s2530_s7, %s1750_s28 }
  0x11   : > { %v2024_v9 = vld [vmem:[%s392_s10 + $0x4] sm:$0x7]  ;;  %v2026_v10 = vld [vmem:[%s392_s10 + $0x8] sm:$0x7]  ;;  %v2028_v11 = vld [vmem:[%s392_s10 + $0xc] sm:$0x7]  ;;  %1229 = vmatpush1.bf16.msra.mxu1 %v1813_v61 }
  0x12   : > { %v2036_v14 = vrot.slane %v2024_v9, %v2019_v7  ;;  %v2040_v15 = vrot.slane %v2026_v10, %v2019_v7  ;;  %v2042_v16 = vld [vmem:[%s392_s10] sm:$0x7]  ;;  %v2055_v19 = vrot.slane %v2028_v11, %v2019_v7  ;;  %v679_v22 = vcombine.low %v2026_v10, %v2028_v11  ;;  %1274 = vmatpush1.bf16.msra.mxu0 %v1804_v28 }
  0x13   : > { %v2059_v20 = vrot.slane %v2042_v16, %v2019_v7  ;;  %v678_v21 = vcombine.low %v2042_v16, %v2024_v9  ;;  %v495_v33 = vrot.slane %v493_v26, 6  ;;  %v502_v34 = vshll.u32 %v2067_v23, 16  ;;  %1275 = vmatprep.subr.bf16.mxu0 %v1808_v53  ;;  %v1828_v61 = vld [vmem:[%s2526_s3 + $0x160] ss:$8 sps:$4 sm:$0xff]  }
  0x14   : > { %v2071_v24 = vcombine.high %v2036_v14, %v2036_v14  ;;  %v2075_v25 = vcombine.high %v2040_v15, %v2040_v15  ;;  %v521_v30 = vshrl.u32 %v2036_v14, 16  ;;  %v524_v31 = vshll.u32 %v2036_v14, 16 }
  0x15   : > { %v535_v32 = vshrl.u32 %v2040_v15, 16  ;;  %v538_v36 = vshll.u32 %v2040_v15, 16  ;;  %v498_v39 = vrot.slane %v496_v29, 7  ;;  %v504_v44 = vrot.slane %v502_v34, 7  ;;  %v1816_v29 = vld [vmem:[%s2526_s3 + $0x140] ss:$8 sps:$4 sm:$0xff]  }
  0x16   : > { %v530_v35 = vshll.u32 %v2071_v24, 16  ;;  %v523_v40 = vrot.slane %v521_v30, 6  ;;  %v526_v41 = vrot.slane %v524_v31, 7  ;;  %v544_v47 = vshll.u32 %v2075_v25, 16  ;;  %1276 = vmatpush1.bf16.msra.mxu0 %v1810_v54  ;;  %v1843_v34 = vld [vmem:[%s2526_s3 + $0x60] ss:$8 sps:$4 sm:$0xff]  }
  0x17   : > { %v537_v42 = vrot.slane %v535_v32, 6  ;;  %v540_v46 = vrot.slane %v538_v36, 7  ;;  %v499_v49 = vor.u32 %v498_v39, %v495_v33  ;;  %v2113_v51 = vcombine.high %v2055_v19, %v2055_v19  ;;  %1277 = vmatprep.subr.bf16.mxu0 %v1814_v17  ;;  %v1819_v36 = vld [vmem:[%s2526_s3 + $0x20] ss:$8 sps:$4 sm:$0xff]   ;;  %v1835_v17 = vld [vmem:[%s2526_s3 + $0x54] ss:$8 sps:$4 sm:$0xff]  }
  0x18   : > { %v532_v45 = vrot.slane %v530_v35, 7  ;;  %v527_v50 = vor.u32 %v526_v41, %v523_v40  ;;  %v581_v52 = vshrl.u32 %v2055_v19, 16  ;;  %v546_v57 = vrot.slane %v544_v47, 7  ;;  %v1817_v35 = vld [vmem:[%s2526_s3 + $0x24] ss:$8 sps:$4 sm:$0xff]  }
  0x19   : > { %v541_v56 = vor.u32 %v540_v46, %v537_v42  ;;  %v584_v58 = vshll.u32 %v2055_v19, 16  ;;  %v468_v59 = vcombine.high %v2059_v20, %v2059_v20  ;;  %v500_v62 = vrot.slane %v499_v49, 2  ;;  %1230 = vmatprep.subr.bf16.mxu1 %v1817_v35 }
  0x1a   : > { %v528_v63 = vrot.slane %v527_v50, 2  ;;  %v583_v0 = vrot.slane %v581_v52, 6  ;;  %v590_v1 = vshll.u32 %v2113_v51, 16  ;;  %v507_v6 = vshrl.u32 %v2059_v20, 16  ;;  %1278 = vmatpush1.bf16.msra.mxu0 %v1816_v29  ;;  %1231 = vmatpush1.bf16.msra.mxu1 %v1819_v36 }
  0x1b   : > { %v542_v4 = vrot.slane %v541_v56, 2  ;;  %v586_v5 = vrot.slane %v584_v58, 7  ;;  %v510_v8 = vshll.u32 %v2059_v20, 16  ;;  %v2153_v18 = vsel %vm2125_vm11, %v500_v62, %v504_v44  ;;  %v1826_v58 = vld [vmem:[%s2526_s3 + $0x164] ss:$8 sps:$4 sm:$0xff]  }
  0x1c   : > { %v2157_v26 = vsel %vm2125_vm11, %v528_v63, %v532_v45  ;;  %v592_v27 = vrot.slane %v590_v1, 7  ;;  %v516_v28 = vshll.u32 %v468_v59, 16  ;;  %v509_v32 = vrot.slane %v507_v6, 6  ;;  %v1820_v45 = vld [vmem:[%s2526_s3 + $0x154] ss:$8 sps:$4 sm:$0xff]  }
  0x1d   : > { %v2164_v30 = vsel %vm2125_vm11, %v542_v4, %v546_v57  ;;  %v587_v31 = vor.u32 %v586_v5, %v583_v0  ;;  %v512_v33 = vrot.slane %v510_v8, 7  ;;  %v1656_v39 = vrot.slane %v2059_v20, 9  ;;  %1279 = vmatprep.subr.bf16.mxu0 %v1820_v45  ;;  %v1832_v5 = vld [vmem:[%s2526_s3 + $0x174] ss:$8 sps:$4 sm:$0xff]  }
  0x1e   : > { %v643_v37 = vcombine.low %v2157_v26, %v2164_v30  ;;  %v518_v38 = vrot.slane %v516_v28, 7  ;;  %v561_v40 = vrot.slane %v468_v59, 7  ;;  %v1657_v43 = vrot.slane %v2036_v14, 9  ;;  %v1822_v14 = vld [vmem:[%s2526_s3 + $0x150] ss:$8 sps:$4 sm:$0xff]  }
  0x1f   : > { %v588_v41 = vrot.slane %v587_v31, 2  ;;  %v513_v42 = vor.u32 %v512_v33, %v509_v32  ;;  %v565_v44 = vrot.slane %v2071_v24, 7  ;;  %v1658_v20 = vrot.slane %v2040_v15, 9  ;;  %v1823_v24 = vld [vmem:[%s2526_s3 + $0x34] ss:$8 sps:$4 sm:$0xff]   ;;  %1280 = vmatpush1.bf16.msra.mxu0 %v1822_v14 }
  0x20   : > { %v2188_v46 = vrot.slane %v643_v37, %v2019_v7  ;;  %v2192_v47 = vsel %vm2169_vm13, %v1656_v39, %v561_v40  ;;  %v569_v48 = vrot.slane %v2075_v25, 7  ;;  %v1659_v15 = vrot.slane %v2055_v19, 9  ;;  %v1825_v25 = vld [vmem:[%s2526_s3 + $0x30] ss:$8 sps:$4 sm:$0xff]   ;;  %1232 = vmatprep.subr.bf16.mxu1 %v1823_v24  ;;  %1281 = vmatprep.subr.bf16.mxu0 %v1826_v58  ;;  %v1862_v58 = vld [vmem:[%s2526_s3 + $0x1c4] ss:$8 sps:$4 sm:$0xff]  }
  0x21   : > { %v593_v49 = vsel %vm2125_vm11, %v588_v41, %v592_v27  ;;  %v514_v50 = vrot.slane %v513_v42, 2  ;;  %v2206_v52 = vsel %vm2169_vm13, %v1657_v43, %v565_v44  ;;  %v596_v57 = vrot.slane %v2113_v51, 7  ;;  %1233 = vmatpush1.bf16.msra.mxu1 %v1825_v25  ;;  %v1834_v28 = vld [vmem:[%s2526_s3 + $0x170] ss:$8 sps:$4 sm:$0xff]   ;;  %v1840_v41 = vld [vmem:[%s2526_s3 + $0x180] ss:$8 sps:$4 sm:$0xff]  }
  0x22   : > { %v698_v53 = vcombine.low %v2164_v30, %v593_v49  ;;  %v742_v54 = vcombine.low %v593_v49, %v2153_v18  ;;  %v570_v56 = vsel %vm2169_vm13, %v1658_v20, %v569_v48  ;;  %v714_v59 = vcombine.low %v2192_v47, %v2206_v52  ;;  %1234 = vmatprep.subr.bf16.mxu1 %v1829_v55  ;;  %v1847_v20 = vld [vmem:[%s2526_s3 + $0x74] ss:$8 sps:$4 sm:$0xff]   ;;  %v1846_v14 = vld [vmem:[%s2526_s3 + $0x190] ss:$8 sps:$4 sm:$0xff]   ;;  %v1855_v25 = vld [vmem:[%s2526_s3 + $0x80] ss:$8 sps:$4 sm:$0xff]  }
  0x23   : > { %v519_v19 = vsel %vm2125_vm11, %v514_v50, %v518_v38  ;;  %v686_v60 = vrot.slane %v678_v21, %v2019_v7  ;;  %v693_v51 = vrot.slane %v679_v22, %v2019_v7  ;;  %v597_v21 = vsel %vm2169_vm13, %v1659_v15, %v596_v57  ;;  %v1831_v22 = vld [vmem:[%s2526_s3 + $0x40] ss:$8 sps:$4 sm:$0xff]   ;;  %1282 = vmatpush1.bf16.msra.mxu0 %v1828_v61  ;;  %v1841_v38 = vld [vmem:[%s2526_s3 + $0x64] ss:$8 sps:$4 sm:$0xff]   ;;  %v1861_v57 = vld [vmem:[%s2526_s3 + $0x90] ss:$8 sps:$4 sm:$0xff]  }
  0x24   : > { %v749_v62 = vrot.slane %v742_v54, %v2019_v7  ;;  %v642_v63 = vcombine.low %v2153_v18, %v519_v19  ;;  %v697_v0 = vcombine.low %v519_v19, %v2157_v26  ;;  %v715_v1 = vcombine.low %v570_v56, %v597_v21  ;;  %1283 = vmatprep.subr.bf16.mxu0 %v1832_v5  ;;  %v1850_v50 = vld [vmem:[%s2526_s3 + $0x1a4] ss:$8 sps:$4 sm:$0xff]   ;;  %v1852_v15 = vld [vmem:[%s2526_s3 + $0x1a0] ss:$8 sps:$4 sm:$0xff]   ;;  %v1859_v54 = vld [vmem:[%s2526_s3 + $0x94] ss:$8 sps:$4 sm:$0xff]  }
  0x25   : > { %v722_v2 = vrot.slane %v714_v59, %v2019_v7  ;;  %v694_v4 = vcombine.low %v686_v60, %v693_v51  ;;  %v626_v18 = vcombine.low %v2024_v9, %v2026_v10  ;;  %v733_v26 = vcombine.low %v2028_v11, %v1942_v12  ;;  %v1837_v10 = vld [vmem:[%s2526_s3 + $0x50] ss:$8 sps:$4 sm:$0xff]   ;;  %1235 = vmatpush1.bf16.msra.mxu1 %v1831_v22  ;;  %v1865_v19 = vld [vmem:[%s2526_s3 + $0xa4] ss:$8 sps:$4 sm:$0xff]   ;;  %v1864_v59 = vld [vmem:[%s2526_s3 + $0x1c0] ss:$8 sps:$4 sm:$0xff]  }
  0x26   : > { %v750_v6 = vcombine.low %v2188_v46, %v749_v62  ;;  %v650_v8 = vrot.slane %v642_v63, %v2019_v7  ;;  %v729_v27 = vrot.slane %v715_v1, %v2019_v7  ;;  %v2264_v29 = vrot.slane %v697_v0, %v2019_v7  ;;  %1236 = vmatprep.subr.bf16.mxu1 %v1835_v17  ;;  %v1867_v60 = vld [vmem:[%s2526_s3 + $0xa0] ss:$8 sps:$4 sm:$0xff]   ;;  %v1868_v51 = vld [vmem:[%s2526_s3 + $0x1d4] ss:$8 sps:$4 sm:$0xff]   ;;  %v1870_v55 = vld [vmem:[%s2526_s3 + $0x1d0] ss:$8 sps:$4 sm:$0xff]  }
  0x27   : > { %695 = vrot.lane.b32.xlu1 %v694_v4, %s1943_s19  ;;  %v2267_v30 = vrot.slane %v698_v53, %v2019_v7  ;;  %v1655_v31 = vrot.slane %v2032_v13, 9  ;;  %v640_v11 = vrot.slane %v626_v18, %v2019_v7  ;;  %v740_v32 = vrot.slane %v733_v26, %v2019_v7  ;;  %v1838_v13 = vld [vmem:[%s2526_s3 + $0x184] ss:$8 sps:$4 sm:$0xff]   ;;  %1284 = vmatpush1.bf16.msra.mxu0 %v1834_v28  ;;  %v1856_v53 = vld [vmem:[%s2526_s3 + $0x1b4] ss:$8 sps:$4 sm:$0xff]  }
  0x28   : > { %751 = vrot.lane.b32.xlu0 %v750_v6, %s1943_s19  ;;  %v658_v9 = vcombine.low %v650_v8, %v2188_v46  ;;  %v557_v33 = vrot.slane %v2067_v23, 7  ;;  %v730_v35 = vcombine.low %v722_v2, %v729_v27  ;;  %v662_v37 = vcombine.low %v2206_v52, %v570_v56  ;;  %1285 = vmatprep.subr.bf16.mxu0 %v1838_v13  ;;  %v1853_v52 = vld [vmem:[%s2526_s3 + $0x84] ss:$8 sps:$4 sm:$0xff]   ;;  %v1858_v56 = vld [vmem:[%s2526_s3 + $0x1b0] ss:$8 sps:$4 sm:$0xff]  }
  0x29   : > { %v713_v36 = vcombine.low %v2264_v29, %v2267_v30  ;;  %v2286_v39 = vcombine.low %v640_v11, %v740_v32  ;;  %v625_v40 = vcombine.low %v1942_v12, %v2042_v16  ;;  %1237 = vmatpush1.bf16.msra.mxu1 %v1837_v10  ;;  %v1844_v16 = vld [vmem:[%s2526_s3 + $0x194] ss:$8 sps:$4 sm:$0xff]   ;;  %v1873_v62 = vld [vmem:[%s2526_s3 + $0xb0] ss:$8 sps:$4 sm:$0xff]   ;;  %v1874_v63 = vld [vmem:[%s2526_s3 + $0x1e4] ss:$8 sps:$4 sm:$0xff]  }
  0x2a   : > { %v558_v23 = vsel %vm2169_vm13, %v1655_v31, %v557_v33  ;;  %v2297_v43 = vrot.slane %v662_v37, %v2019_v7  ;;  %1238 = vmatprep.subr.bf16.mxu1 %v1841_v38  ;;  %v1871_v61 = vld [vmem:[%s2526_s3 + $0xb4] ss:$8 sps:$4 sm:$0xff]   ;;  %v1877_v0 = vld [vmem:[%s2526_s3 + $0xc4] ss:$8 sps:$4 sm:$0xff]   ;;  %v1879_v22 = vld [vmem:[%s2526_s3 + $0xc0] ss:$8 sps:$4 sm:$0xff]  }
  0x2b   : > { %659 = vrot.lane.b32.xlu1 %v658_v9, %s1943_s19  ;;  %v661_v42 = vcombine.low %v558_v23, %v2192_v47  ;;  %v753_v44 = vcombine.low %v597_v21, %v558_v23  ;;  %v633_v45 = vrot.slane %v625_v40, %v2019_v7  ;;  %1286 = vmatpush1.bf16.msra.mxu0 %v1840_v41  ;;  %v1876_v21 = vld [vmem:[%s2526_s3 + $0x1e0] ss:$8 sps:$4 sm:$0xff]   ;;  %v1880_v1 = vld [vmem:[%s2526_s3 + $0x1f4] ss:$8 sps:$4 sm:$0xff]   ;;  %v1882_v4 = vld [vmem:[%s2526_s3 + $0x1f0] ss:$8 sps:$4 sm:$0xff]  }
  0x2c   : > { %731 = vrot.lane.b32.xlu0 %v730_v35, %s1943_s19  ;;  %1287 = vmatprep.subr.bf16.mxu0 %v1844_v16  ;;  %v1884_v2 = vld [vmem:[%s2526_s3 + $0xd4] ss:$8 sps:$4 sm:$0xff]   ;;  %v1886_v5 = vld [vmem:[%s2526_s3 + $0xd0] ss:$8 sps:$4 sm:$0xff]   ;;  %v1889_v6 = vld [vmem:[%s2526_s3 + $0x204] ss:$8 sps:$4 sm:$0xff]  }
  0x2d   : > { %v2307_v46 = vrot.slane %v661_v42, %v2019_v7  ;;  %v2310_v47 = vrot.slane %v753_v44, %v2019_v7  ;;  %v2315_v48 = vcombine.low %v633_v45, %v640_v11  ;;  %v1849_v7 = vld [vmem:[%s2526_s3 + $0x70] ss:$8 sps:$4 sm:$0xff]   ;;  %1239 = vmatpush1.bf16.msra.mxu1 %v1843_v34  ;;  %v1890_v8 = vld [vmem:[%s2526_s3 + $0xe4] ss:$8 sps:$4 sm:$0xff]   ;;  %v1892_v17 = vld [vmem:[%s2526_s3 + $0xe0] ss:$8 sps:$4 sm:$0xff]  }
  0x2e   : > { %1240 = vmatprep.subr.bf16.mxu1 %v1847_v20  ;;  %v1896_v18 = vld [vmem:[%s2526_s3 + $0xf4] ss:$8 sps:$4 sm:$0xff]   ;;  %v1898_v26 = vld [vmem:[%s2526_s3 + $0xf0] ss:$8 sps:$4 sm:$0xff]   ;;  %v1905_v10 = vld [vmem:[%s2528_s5] sm:$0xff]  }
  0x2f   : > { %v677_v24 = vcombine.low %v2307_v46, %v2297_v43  ;;  %v761_v49 = vcombine.low %v2297_v43, %v2310_v47  ;;  %1288 = vmatpush1.bf16.msra.mxu0 %v1846_v14  ;;  %v1887_v11 = vld [vmem:[%s2526_s3 + $0x200] ss:$8 sps:$4 sm:$0xff]   ;;  %v1895_v35 = vld [vmem:[%s2526_s3 + $0x214] ss:$8 sps:$4 sm:$0xff]   ;;  %v1901_v29 = vld [vmem:[%s2526_s3 + $0x224] ss:$8 sps:$4 sm:$0xff]  }
  0x30   : > { %1289 = vmatprep.subr.bf16.mxu0 %v1850_v50  ;;  %v1906_v38 = vld [vmem:[%s2528_s5 + $0x8] sm:$0xff]   ;;  %v1907_v30 = vld [vmem:[%s2528_s5 + $0x10] sm:$0xff]   ;;  %v1908_v40 = vld [vmem:[%s2528_s5 + $0x18] sm:$0xff]   ;;  %v859_v50 = vsub.s32 1, %v2004_v3 }
  0x31   : > { %1241 = vmatpush1.bf16.msra.mxu1 %v1849_v7  ;;  %v1904_v23 = vld [vmem:[%s2526_s3 + $0x234] ss:$8 sps:$4 sm:$0xff]   ;;  %v1902_v41 = vld [vmem:[%s2526_s3 + $0x230] ss:$8 sps:$4 sm:$0xff]   ;;  %v1909_v42 = vld [vmem:[%s2528_s5 + $0x20] sm:$0xff]  }
  0x32   : > { %1242 = vmatprep.subr.bf16.mxu1 %v1853_v52  ;;  %v1910_v44 = vld [vmem:[%s2528_s5 + $0x28] sm:$0xff]   ;;  %v1911_v34 = vld [vmem:[%s2528_s5 + $0x30] sm:$0xff]   ;;  %v1912_v43 = vld [vmem:[%s2528_s5 + $0x38] sm:$0xff]  }
  0x33   : > { %1290 = vmatpush1.bf16.msra.mxu0 %v1852_v15  ;;  %v1913_v45 = vld [vmem:[%s2528_s5 + $0x40] sm:$0xff]   ;;  %v1914_v16 = vld [vmem:[%s2528_s5 + $0x48] sm:$0xff]   ;;  %v1915_v46 = vld [vmem:[%s2528_s5 + $0x50] sm:$0xff]  }
  0x34   : > { %1291 = vmatprep.subr.bf16.mxu0 %v1856_v53  ;;  %v1916_v47 = vld [vmem:[%s2528_s5 + $0x58] sm:$0xff]   ;;  %v851_v7 = vld [vmem:[%s2527_s4] sm:$0x3] }
  0x35   : > { %1243 = vmatpush1.bf16.msra.mxu1 %v1855_v25  ;;  %v860_v15 = vrot.slane %v851_v7, %v859_v50 }
  0x36   : > { %1244 = vmatprep.subr.bf16.mxu1 %v1859_v54 }
  0x37   : > { %1292 = vmatpush1.bf16.msra.mxu0 %v1858_v56 }
  0x38   : > { %1293 = vmatprep.subr.bf16.mxu0 %v1862_v58 }
  0x39   : > { %1245 = vmatpush1.bf16.msra.mxu1 %v1861_v57 }
  0x3a   : > { %1246 = vmatprep.subr.bf16.mxu1 %v1865_v19 }
  0x3b   : > { %1294 = vmatpush1.bf16.msra.mxu0 %v1864_v59 }
  0x3c   : > { %1295 = vmatprep.subr.bf16.mxu0 %v1868_v51 }
  0x3d   : > { %1247 = vmatpush1.bf16.msra.mxu1 %v1867_v60 }
  0x3e   : > { %1248 = vmatprep.subr.bf16.mxu1 %v1871_v61 }
  0x3f   : > { %1296 = vmatpush1.bf16.msra.mxu0 %v1870_v55 }
  0x40   : > { %1297 = vmatprep.subr.bf16.mxu0 %v1874_v63 }
  0x41   : > { %1249 = vmatpush1.bf16.msra.mxu1 %v1873_v62 }
  0x42   : > { %1250 = vmatprep.subr.bf16.mxu1 %v1877_v0 }
  0x43   : > { %1298 = vmatpush1.bf16.msra.mxu0 %v1876_v21 }
  0x44   : > { %1299 = vmatprep.subr.bf16.mxu0 %v1880_v1 }
  0x45   : > { %1251 = vmatpush1.bf16.msra.mxu1 %v1879_v22  ;;  %v1734_v22 = vld [vmem:[%s2529_s6] ss:$0 sm:$0xff] }
  0x46   : > { %1252 = vmatprep.subr.bf16.mxu1 %v1884_v2 }
  0x47   : > { %1300 = vmatpush1.bf16.msra.mxu0 %v1882_v4 }
  0x48   : > { %1312 = vmatprep.subr.bf16.mxu0 %v1889_v6 }
  0x49   : > { %1253 = vmatpush1.bf16.msra.mxu1 %v1886_v5 }
  0x4a   : > { %1254 = vmatprep.subr.bf16.mxu1 %v1890_v8 }
  0x4d   : > { %1255 = vmatpush1.bf16.msra.mxu1 %v1892_v17 }
  0x4e   : > { %1256 = vmatprep.subr.bf16.mxu1 %v1896_v18 }
  0x51   : > { %1257 = vmatpush1.bf16.msra.mxu1 %v1898_v26 }
  0x52   : > { %1467 = vmatprep.subr.bf16.mxu1 %v1942_v12 }
  0x99   : > { %v696_v27 = vpop.permute.xlu1 %695 }
  0x9a   : > { %v752_v28 = vpop.permute.xlu0 %751  ;;  %v769_v31 = vsel %vm762_vm14, %v677_v24, %v696_v27 }
  0x9b   : > { %v777_v9 = vsel %vm762_vm14, %v2286_v39, %v752_v28  ;;  %1258 = vmatprep.mubr.bf16.mxu1 %v769_v31  ;;  %v1893_v39 = vld [vmem:[%s2526_s3 + $0x210] ss:$8 sps:$4 sm:$0xff]  }
  0x9c   : > { %1301 = vmatprep.mubr.bf16.mxu0 %v777_v9 }
  0x9d   : > { %v660_v32 = vpop.permute.xlu1 %659 }
  0x9e   : > { %v732_v33 = vpop.permute.xlu0 %731  ;;  %v765_v13 = vsel %vm762_vm14, %v2315_v48, %v660_v32 }
  0x9f   : > { %v773_v37 = vsel %vm762_vm14, %v713_v36, %v732_v33  ;;  %1259 = vmatmul.mubr.bf16.vlgmr.msra.gmra.mrb[0].mxu1 %v765_v13  ;;  %v1899_v36 = vld [vmem:[%s2526_s3 + $0x220] ss:$8 sps:$4 sm:$0xff]  }
  0xa0   : > { %1302 = vmatmul.mubr.bf16.vlgmr.msra.gmra.mrb[0].mxu0 %v773_v37  ;;  %1468 = vmatpush1.bf16.msra.mxu1 %v1905_v10 }
  0xa1   : > { %1313 = vmatpush1.bf16.msra.mxu0 %v1887_v11  ;;  %1344 = vmatprep.mubr.bf16.mxu0 %v1942_v12 }
  0xa2   : > { %1314 = vmatprep.subr.bf16.mxu0 %v1895_v35  ;;  %1469 = vmatprep.subr.bf16.mxu1 %v1942_v12 }
  0xa4   : > { %1470 = vmatpush1.bf16.msra.mxu1 %v1906_v38 }
  0xa5   : > { %1315 = vmatpush1.bf16.msra.mxu0 %v1893_v39  ;;  %1471 = vmatprep.subr.bf16.mxu1 %v1942_v12 }
  0xa6   : > { %1316 = vmatprep.subr.bf16.mxu0 %v1901_v29 }
  0xa8   : > { %1472 = vmatpush1.bf16.msra.mxu1 %v1907_v30 }
  0xa9   : > { %1317 = vmatpush1.bf16.msra.mxu0 %v1899_v36  ;;  %1473 = vmatprep.subr.bf16.mxu1 %v1942_v12 }
  0xaa   : > { %1318 = vmatprep.subr.bf16.mxu0 %v1904_v23 }
  0xac   : > { %1474 = vmatpush1.bf16.msra.mxu1 %v1908_v40 }
  0xad   : > { %1319 = vmatpush1.bf16.msra.mxu0 %v1902_v41  ;;  %1475 = vmatprep.subr.bf16.mxu1 %v1942_v12 }
  0xb0   : > { %1733 = vmatmul.mubr.msk.bf16.vlgmr.msra.gmra.mrb[0].mxu0 %vm762_vm14, %v761_v49  ;;  %1476 = vmatpush1.bf16.msra.mxu1 %v1909_v42  ;;  %v855_v49 = vsub.s32 0, %v2004_v3 }
  0xb1   : > { %1477 = vmatprep.subr.bf16.mxu1 %v1942_v12 }
  0xb2   : > { %v856_v52 = vrot.slane %v851_v7, %v855_v49 }
  0xb4   : > { %1478 = vmatpush1.bf16.msra.mxu1 %v1910_v44 }
  0xb5   : > { %1479 = vmatprep.subr.bf16.mxu1 %v1942_v12 }
  0xb8   : > { %1480 = vmatpush1.bf16.msra.mxu1 %v1911_v34 }
  0xb9   : > { %1481 = vmatprep.subr.bf16.mxu1 %v1942_v12 }
  0xbc   : > { %1482 = vmatpush1.bf16.msra.mxu1 %v1912_v43 }
  0xbd   : > { %1483 = vmatprep.subr.bf16.mxu1 %v1942_v12 }
  0xc0   : > { %1484 = vmatpush1.bf16.msra.mxu1 %v1913_v45 }
  0xc1   : > { %1485 = vmatprep.subr.bf16.mxu1 %v1942_v12 }
  0xc4   : > { %1486 = vmatpush1.bf16.msra.mxu1 %v1914_v16 }
  0xc5   : > { %1487 = vmatprep.subr.bf16.mxu1 %v1942_v12 }
  0xc8   : > { %1488 = vmatpush1.bf16.msra.mxu1 %v1915_v46 }
  0xc9   : > { %1489 = vmatprep.subr.bf16.mxu1 %v1942_v12 }
  0xcc   : > { %1490 = vmatpush1.bf16.msra.mxu1 %v1916_v47 }
 0x172   : > { %v1260_v20 = vpop.f32.mrb[0].mxu1 }
 0x173   : > { %v1262_v48 = vpop.f32.mrb[1].mxu1  ;;  %v1261_v12 = vadd.f32 %v1260_v20, %v856_v52 }
 0x174   : > { %v1264_v14 = vpop.f32.mrb[2].mxu1  ;;  %v1263_v25 = vadd.f32 %v1262_v48, %v860_v15 }
 0x175   : > { %v1266_v24 = vpop.f32.mrb[3].mxu1  ;;  %v1265_v54 = vadd.f32 %v1264_v14, %v856_v52 }
 0x176   : > { %v1267_v58 = vadd.f32 %v1266_v24, %v860_v15 }
 0x183   : > { %v1346_v53 = vpop.f32.mrb[0].mxu0 }
 0x184   : > { %v1756_v56 = vadd.f32 %v1346_v53, %v1261_v12  ;;  %v1348_v57 = vpop.f32.mrb[1].mxu0 }
 0x185   : > { %v1758_v19 = vadd.f32 %v1348_v57, %v1263_v25  ;;  %v1350_v59 = vpop.f32.mrb[2].mxu0 }
 0x186   : > { %v1760_v60 = vadd.f32 %v1350_v59, %v1265_v54  ;;  %v1352_v51 = vpop.f32.mrb[3].mxu0  ;;  %v1355_v55 = vmax.f32 %v1756_v56, 0.0 }
 0x187   : > { %v1762_v61 = vadd.f32 %v1352_v51, %v1267_v58  ;;  %v1356_v63 = vmax.f32 %v1758_v19, 0.0 }
 0x188   : > { %v1357_v62 = vmax.f32 %v1760_v60, 0.0 }
 0x189   : > { %v1358_v0 = vmax.f32 %v1762_v61, 0.0 }
 0x18a   : > { %v1359_v3 = vpack.c.bf16 %v1357_v62, %v1355_v55 }
 0x18b   : > { %v1360_v21 = vpack.c.bf16 %v1358_v0, %v1356_v63 }
 0x18d   : > { %1747 = vmatprep.mubr.msk.bf16.mxu1 %vm762_vm14, %v1360_v21 }
 0x18e   : > { %1500 = vmatmul.mubr.bf16.vlgmr.msra.gmra.mrb[4].mxu1 %v1359_v3 }
 0x261   : > { %v1501_v1 = vpop.f32.mrb[4].mxu1 }
 0x262   : > { %v1502_v2 = vadd.f32 %v1734_v22, %v1501_v1  ;;  %v1503_v4 = vpop.f32.mrb[5].mxu1 }
 0x263   : > { %v1504_v5 = vpop.f32.mrb[6].mxu1 }
 0x264   : > { %v1510_v6 = vcombine.high %v1502_v2, %v1502_v2  ;;  %1515 = vst.msk [vmem:[%s434_s22] sm:$0xf] %vm1514_vm15, %v1502_v2  ;;  %v1505_v8 = vadd.f32 %v1734_v22, %v1504_v5  ;;  %v1506_v17 = vpop.f32.mrb[7].mxu1 }
 0x266   : > { %1516 = vst.msk [vmem:[%s434_s22 + $0x4] sm:$0xf] %vm1514_vm15, %v1510_v6  ;;  %v1511_v18 = vcombine.high %v1505_v8, %v1505_v8  ;;  %1517 = vst.msk [vmem:[%s434_s22 + $0x8] sm:$0xf] %vm1514_vm15, %v1505_v8 }
 0x268   : > { %1518 = vst.msk [vmem:[%s434_s22 + $0xc] sm:$0xf] %vm1514_vm15, %v1511_v18 }
 0x269 PF: > { %s17_s2 = sadd.s32 1, %s1939_s2   ;;  %s2543_s24 = smov %s1935_s1 }
 0x26a   : > { %p14_p5 = scmp.ge.s32.totalorder %s17_s2, 4   ;;  %s2544_s1 = smov %s2546_s25 }
 0x26c   :  { %16 = sbr.rel (!%p14_p5) target bundleno = 2 (0x2), region = 84 }

</bundles_post_ra>
